<compile_context>
chip_gen: v5e
topology: v5e:2x2
jax: 0.10.0
libtpu: 0.0.40
codegen_flags: <defaults>
</compile_context>

<pallas_src>
import functools

import jax
import jax.numpy as jnp
from jax.experimental import pallas as pl
from jax.experimental.pallas import tpu as pltpu


SOURCE_LAYER_INDEXES = [2, 4]


def _round_up(v, m):
    return ((v + m - 1) // m) * m


# ----------------------------------------------------------------------------
# Fused SSD forward kernel (single invocation, whole batch folded into lanes).
# ----------------------------------------------------------------------------
def _ssd_fused_kernel(mask_ref, x_ref, w_ref, b_ref, out_ref, *,
                      W, L, layer_meta, plan):
    """
    mask_ref : (9, L) f32                per-tap validity mask (1 = in-image)
    x_ref    : (C0, L) f32               input, channels x (batch*H*W) lanes
    w_ref    : (n_layers*RS, 9*c_max)    bf16 im2col-folded weight slab
    b_ref    : (n_layers*RS, 1) f32      bias slab
    out_ref  : (n_scales, c_head_pad, L) f32   fused cls+reg head outputs
    layer_meta[i] = (row_offset, cout, cin)   (static)
    plan      = ((layer_idx, relu, out_scale_or_None), ...)   (static)
    """

    def conv3x3(a, idx, relu):
        """3x3 / stride 1 / pad 1 conv on a (Cin, L) activation -> (Cout, L)."""
        row_off, cout, cin = layer_meta[idx]
        taps = []
        for dy in range(3):
            for dx in range(3):
                k = dy * 3 + dx
                off = (dy - 1) * W + (dx - 1)
                if off == 0:
                    # Center tap: its validity mask is identically 1.
                    taps.append(a)
                else:
                    # Cyclic lane roll (XLU); any wrapped value (across the
                    # image border or across batch images) is killed by the
                    # per-tap mask, loaded here at its point of use.
                    rolled = pltpu.roll(a, shift=(-off) % L, axis=1)
                    taps.append(rolled * mask_ref[k:k + 1, :])
        # (9*Cin, L) patch slab built in-vregs, cast once to bf16 for the MXU.
        patches = jnp.concatenate(taps, axis=0).astype(jnp.bfloat16)
        w = w_ref[row_off:row_off + cout, 0:9 * cin]          # (Cout, 9*Cin) bf16
        acc = jnp.dot(w, patches,
                      preferred_element_type=jnp.float32)     # (Cout, L) f32
        acc = acc + b_ref[row_off:row_off + cout, :]          # (Cout,1) bcast
        return jnp.maximum(acc, 0.0) if relu else acc

    a = x_ref[...]                                            # (C0, L) f32
    for idx, relu, scale in plan:
        r = conv3x3(a, idx, relu)
        if scale is None:
            a = r                                             # backbone layer
        else:
            out_ref[scale] = r                                # fused head


# ----------------------------------------------------------------------------
# Wrapper: parameter packing (im2col fold + head fusion + slab) + pallas_call.
# ----------------------------------------------------------------------------
def _fold_conv(w, b, cin_pad=None):
    """(3,3,Cin,Cout) HWIO conv weight -> im2col-folded (Cout, 9*Cin)."""
    kh, kw, cin, cout = w.shape
    if cin_pad is not None and cin_pad > cin:
        w = jnp.pad(w, ((0, 0), (0, 0), (0, cin_pad - cin), (0, 0)))
        cin = cin_pad
    wt = jnp.transpose(w.reshape(kh * kw * cin, cout))        # (Cout, 9*Cin)
    return wt, b.reshape(cout, 1), cin, cout


def _make_tap_masks(H, W):
    """(9, H*W) f32: mask[k, h*W+w] = 1 iff tap k's source pixel is in-image."""
    hw = jnp.arange(H * W, dtype=jnp.int32)
    h, w = hw // W, hw % W
    rows = []
    for dy in range(3):
        for dx in range(3):
            hh, ww = h + dy - 1, w + dx - 1
            rows.append(((hh >= 0) & (hh < H) & (ww >= 0) & (ww < W))
                        .astype(jnp.float32))
    return jnp.stack(rows)


def ssd_forward_pallas(x_nchw, params, num_classes, num_anchors):
    """SSD.forward (train) -> (confidences (N,P,ncls), locations (N,P,4))."""
    N, C, H, W = x_nchw.shape
    HW = H * W
    L = N * HW                                   # batch folded into lanes

    # Channels-first, batch*spatial flattened into the lane axis.
    c0 = _round_up(max(C, 8), 8)
    x_cl = jnp.transpose(x_nchw, (1, 0, 2, 3)).reshape(C, L)
    if c0 > C:
        x_cl = jnp.pad(x_cl, ((0, c0 - C), (0, 0)))

    n_base = len(params["base_net"])
    n_extra = len(params["extras"])
    n_scales = 1 + n_extra

    # Layer order: base_net, extras, fused cls+reg heads (one per scale).
    folded = [_fold_conv(*params["base_net"][0], cin_pad=c0)]
    folded += [_fold_conv(w, b) for (w, b) in params["base_net"][1:]]
    folded += [_fold_conv(w, b) for (w, b) in params["extras"]]
    for i in range(n_scales):
        wc, bc = params["cls"][i]
        wr, br = params["reg"][i]
        folded.append(_fold_conv(jnp.concatenate([wc, wr], axis=-1),
                                 jnp.concatenate([bc, br], axis=0)))
    n_layers = len(folded)

    c_head = num_anchors * (num_classes + 4)
    c_head_pad = _round_up(c_head, 8)            # aligned head stores
    c_max = max(f[2] for f in folded)            # max Cin
    k_max = 9 * c_max
    row_stride = _round_up(max([f[3] for f in folded[:-n_scales]]
                               + [c_head_pad]), 16)   # bf16 sublane alignment

    # Pack all layers into one bf16 weight slab + one f32 bias slab.
    w_slab = jnp.zeros((n_layers * row_stride, k_max), jnp.float32)
    b_slab = jnp.zeros((n_layers * row_stride, 1), jnp.float32)
    layer_meta = []
    for i, (wt, bb, cin, cout) in enumerate(folded):
        ro = i * row_stride
        w_slab = w_slab.at[ro:ro + cout, :9 * cin].set(wt)
        b_slab = b_slab.at[ro:ro + cout, :].set(bb)
        cout_k = c_head_pad if i >= n_layers - n_scales else cout
        layer_meta.append((ro, cout_k, cin))
    layer_meta = tuple(layer_meta)
    w_slab = w_slab.astype(jnp.bfloat16)

    # Per-tap validity masks, tiled over the batch-folded lane axis.
    masks = jnp.tile(_make_tap_masks(H, W), (1, N))          # (9, L)

    # Execution plan mirroring SSD.forward (source_layer_indexes = [2, 4]).
    plan = []
    for i in range(SOURCE_LAYER_INDEXES[0]):
        plan.append((i, True, None))
    plan.append((n_base + n_extra, False, 0))                # header 0
    for i in range(SOURCE_LAYER_INDEXES[0], SOURCE_LAYER_INDEXES[1]):
        plan.append((i, True, None))
    for e in range(n_extra):
        plan.append((n_base + e, True, None))                # extras[e]
        plan.append((n_base + n_extra + 1 + e, False, 1 + e))  # header 1+e
    plan = tuple(plan)

    kern = functools.partial(_ssd_fused_kernel, W=W, L=L,
                             layer_meta=layer_meta, plan=plan)
    # Single invocation, whole arrays resident in VMEM (< 1 MiB total).
    out = pl.pallas_call(
        kern,
        out_shape=jax.ShapeDtypeStruct((n_scales, c_head_pad, L), jnp.float32),
    )(masks, x_cl, w_slab, b_slab)

    # (n_scales, c_head_pad, N*HW) -> PyTorch's permute(0,2,3,1).view layout.
    out = out[:, :c_head, :].reshape(n_scales, c_head, N, HW)
    out = jnp.transpose(out, (2, 0, 3, 1))                   # (N, S, HW, c_head)
    n_cls_ch = num_anchors * num_classes
    confidences = out[..., :n_cls_ch].reshape(
        N, n_scales * HW * num_anchors, num_classes)
    locations = out[..., n_cls_ch:].reshape(
        N, n_scales * HW * num_anchors, 4)
    # TODO(synk): is_test branch (softmax + locations2boxes + center2corner)
    # not implemented -- priors/config are external to the module; train path.
    return confidences, locations


# ----------------------------------------------------------------------------
# Deterministic xavier-uniform init (matches _xavier_init: xavier W, zero b).
# ----------------------------------------------------------------------------
def xavier_conv(key, cin, cout, k=3):
    fan_in, fan_out = cin * k * k, cout * k * k
    bound = (6.0 / (fan_in + fan_out)) ** 0.5
    w = jax.random.uniform(key, (k, k, cin, cout), jnp.float32, -bound, bound)
    b = jnp.zeros((cout,), jnp.float32)
    return w, b


def make_ssd_params(key, *, in_ch, num_classes, num_anchors):
    ks = iter(jax.random.split(key, 32))
    base_channels = [in_ch, 8, 8, 16, 16]            # 4 base_net conv layers
    base_net = [xavier_conv(next(ks), base_channels[i], base_channels[i + 1])
                for i in range(4)]
    extras_channels = [16, 16, 16]                   # 2 extras conv layers
    extras = [xavier_conv(next(ks), extras_channels[i], extras_channels[i + 1])
              for i in range(2)]
    # header feature channels: after base_net[0:2] -> 8, after each extra -> 16
    head_channels = [8, 16, 16]
    cls = [xavier_conv(next(ks), c, num_anchors * num_classes)
           for c in head_channels]
    reg = [xavier_conv(next(ks), c, num_anchors * 4) for c in head_channels]
    return dict(base_net=base_net, extras=extras, cls=cls, reg=reg)


# ----------------------------------------------------------------------------
# Pure-JAX reference (lax.conv) mirroring SSD.forward; bf16 dot operands with
# f32 accumulation to match the kernel's MXU precision.
# ----------------------------------------------------------------------------
def conv3x3_ref(x, w, b, *, relu=False):
    out = jax.lax.conv_general_dilated(
        x.astype(jnp.bfloat16), w.astype(jnp.bfloat16),
        window_strides=(1, 1), padding="SAME",
        dimension_numbers=("NHWC", "HWIO", "NHWC"),
        preferred_element_type=jnp.float32)
    out = out + b
    return jnp.maximum(out, 0.0) if relu else out


def _compute_header_ref(i, x, params, num_classes):
    wc, bc = params["cls"][i]
    conf = conv3x3_ref(x, wc, bc).reshape(x.shape[0], -1, num_classes)
    wr, br = params["reg"][i]
    loc = conv3x3_ref(x, wr, br).reshape(x.shape[0], -1, 4)
    return conf, loc


def ssd_forward_ref(x_nhwc, params, num_classes):
    confidences, locations = [], []
    x = x_nhwc
    for (w, b) in params["base_net"][:SOURCE_LAYER_INDEXES[0]]:
        x = conv3x3_ref(x, w, b, relu=True)
    c, l = _compute_header_ref(0, x, params, num_classes)
    confidences.append(c)
    locations.append(l)
    for (w, b) in params["base_net"][SOURCE_LAYER_INDEXES[0]:
                                     SOURCE_LAYER_INDEXES[1]]:
        x = conv3x3_ref(x, w, b, relu=True)
    header_index = 1
    for (w, b) in params["extras"]:
        x = conv3x3_ref(x, w, b, relu=True)
        c, l = _compute_header_ref(header_index, x, params, num_classes)
        header_index += 1
        confidences.append(c)
        locations.append(l)
    return (jnp.concatenate(confidences, axis=1),
            jnp.concatenate(locations, axis=1))


if __name__ == "__main__":
    num_classes = 3
    num_anchors = 2
    N, C, H, W = 2, 4, 16, 16          # PyTorch-style NCHW input shape

    key = jax.random.PRNGKey(0)
    k_x, k_p = jax.random.split(key)
    x_nchw = jax.random.normal(k_x, (N, C, H, W), jnp.float32)

    params = make_ssd_params(k_p, in_ch=C, num_classes=num_classes,
                             num_anchors=num_anchors)

    fwd = jax.jit(functools.partial(ssd_forward_pallas,
                                    num_classes=num_classes,
                                    num_anchors=num_anchors))
    conf, loc = fwd(x_nchw, params)
    conf, loc = jax.block_until_ready((conf, loc))

    # shape check: 3 scales * H * W * num_anchors priors
    n_priors = 3 * H * W * num_anchors
    assert conf.shape == (N, n_priors, num_classes), conf.shape
    assert loc.shape == (N, n_priors, 4), loc.shape

    # numeric check against the pure-JAX reference
    x_nhwc = jnp.transpose(x_nchw, (0, 2, 3, 1))
    conf_ref, loc_ref = ssd_forward_ref(x_nhwc, params, num_classes)
    assert jnp.allclose(conf, conf_ref, atol=1e-2, rtol=1e-2), (
        float(jnp.max(jnp.abs(conf - conf_ref))))
    assert jnp.allclose(loc, loc_ref, atol=1e-2, rtol=1e-2), (
        float(jnp.max(jnp.abs(loc - loc_ref))))

    print("KERNEL_OK")
</pallas_src>

<mosaic_0001>
module attributes {stable_mosaic.version = 11 : i64} {
  func.func @_ssd_fused_kernel(%arg0: memref<9x512xf32, #tpu.memory_space<vmem>>, %arg1: memref<8x512xf32, #tpu.memory_space<vmem>>, %arg2: memref<144x144xbf16, #tpu.memory_space<vmem>>, %arg3: memref<144x1xf32, #tpu.memory_space<vmem>>, %arg4: memref<3x16x512xf32, #tpu.memory_space<vmem>>) attributes {dimension_semantics = [], scalar_prefetch = 0 : i64, scratch_operands = 0 : i64, tpu.core_type = #tpu.core_type<tc>} {
    %c0 = arith.constant 0 : index
    %c0_0 = arith.constant 0 : index
    %0 = vector.load %arg1[%c0, %c0_0] : memref<8x512xf32, #tpu.memory_space<vmem>>, vector<8x512xf32>
    %c17_i32 = arith.constant 17 : i32
    %1 = tpu.dynamic_rotate %0 by %c17_i32 dim 1 : vector<8x512xf32>, i32 -> vector<8x512xf32>
    %c0_1 = arith.constant 0 : index
    %c0_2 = arith.constant 0 : index
    %2 = vector.load %arg0[%c0_1, %c0_2] : memref<9x512xf32, #tpu.memory_space<vmem>>, vector<1x512xf32>
    %3 = vector.broadcast %2 : vector<1x512xf32> to vector<8x512xf32>
    %4 = arith.mulf %1, %3 : vector<8x512xf32>
    %c16_i32 = arith.constant 16 : i32
    %5 = tpu.dynamic_rotate %0 by %c16_i32 dim 1 : vector<8x512xf32>, i32 -> vector<8x512xf32>
    %c1 = arith.constant 1 : index
    %c0_3 = arith.constant 0 : index
    %6 = vector.load %arg0[%c1, %c0_3] : memref<9x512xf32, #tpu.memory_space<vmem>>, vector<1x512xf32>
    %7 = vector.broadcast %6 : vector<1x512xf32> to vector<8x512xf32>
    %8 = arith.mulf %5, %7 : vector<8x512xf32>
    %c15_i32 = arith.constant 15 : i32
    %9 = tpu.dynamic_rotate %0 by %c15_i32 dim 1 : vector<8x512xf32>, i32 -> vector<8x512xf32>
    %c2 = arith.constant 2 : index
    %c0_4 = arith.constant 0 : index
    %10 = vector.load %arg0[%c2, %c0_4] : memref<9x512xf32, #tpu.memory_space<vmem>>, vector<1x512xf32>
    %11 = vector.broadcast %10 : vector<1x512xf32> to vector<8x512xf32>
    %12 = arith.mulf %9, %11 : vector<8x512xf32>
    %c1_i32 = arith.constant 1 : i32
    %13 = tpu.dynamic_rotate %0 by %c1_i32 dim 1 : vector<8x512xf32>, i32 -> vector<8x512xf32>
    %c3 = arith.constant 3 : index
    %c0_5 = arith.constant 0 : index
    %14 = vector.load %arg0[%c3, %c0_5] : memref<9x512xf32, #tpu.memory_space<vmem>>, vector<1x512xf32>
    %15 = vector.broadcast %14 : vector<1x512xf32> to vector<8x512xf32>
    %16 = arith.mulf %13, %15 : vector<8x512xf32>
    %c511_i32 = arith.constant 511 : i32
    %17 = tpu.dynamic_rotate %0 by %c511_i32 dim 1 : vector<8x512xf32>, i32 -> vector<8x512xf32>
    %c5 = arith.constant 5 : index
    %c0_6 = arith.constant 0 : index
    %18 = vector.load %arg0[%c5, %c0_6] : memref<9x512xf32, #tpu.memory_space<vmem>>, vector<1x512xf32>
    %19 = vector.broadcast %18 : vector<1x512xf32> to vector<8x512xf32>
    %20 = arith.mulf %17, %19 : vector<8x512xf32>
    %c497_i32 = arith.constant 497 : i32
    %21 = tpu.dynamic_rotate %0 by %c497_i32 dim 1 : vector<8x512xf32>, i32 -> vector<8x512xf32>
    %c6 = arith.constant 6 : index
    %c0_7 = arith.constant 0 : index
    %22 = vector.load %arg0[%c6, %c0_7] : memref<9x512xf32, #tpu.memory_space<vmem>>, vector<1x512xf32>
    %23 = vector.broadcast %22 : vector<1x512xf32> to vector<8x512xf32>
    %24 = arith.mulf %21, %23 : vector<8x512xf32>
    %c496_i32 = arith.constant 496 : i32
    %25 = tpu.dynamic_rotate %0 by %c496_i32 dim 1 : vector<8x512xf32>, i32 -> vector<8x512xf32>
    %c7 = arith.constant 7 : index
    %c0_8 = arith.constant 0 : index
    %26 = vector.load %arg0[%c7, %c0_8] : memref<9x512xf32, #tpu.memory_space<vmem>>, vector<1x512xf32>
    %27 = vector.broadcast %26 : vector<1x512xf32> to vector<8x512xf32>
    %28 = arith.mulf %25, %27 : vector<8x512xf32>
    %c495_i32 = arith.constant 495 : i32
    %29 = tpu.dynamic_rotate %0 by %c495_i32 dim 1 : vector<8x512xf32>, i32 -> vector<8x512xf32>
    %c8 = arith.constant 8 : index
    %c0_9 = arith.constant 0 : index
    %30 = vector.load %arg0[%c8, %c0_9] : memref<9x512xf32, #tpu.memory_space<vmem>>, vector<1x512xf32>
    %31 = vector.broadcast %30 : vector<1x512xf32> to vector<8x512xf32>
    %32 = arith.mulf %29, %31 : vector<8x512xf32>
    %33 = tpu.concatenate %4, %8, %12, %16, %0, %20, %24, %28, %32 in 0 : vector<8x512xf32>, vector<8x512xf32>, vector<8x512xf32>, vector<8x512xf32>, vector<8x512xf32>, vector<8x512xf32>, vector<8x512xf32>, vector<8x512xf32>, vector<8x512xf32> -> vector<72x512xf32>
    %34 = arith.truncf %33 : vector<72x512xf32> to vector<72x512xbf16>
    %c0_10 = arith.constant 0 : index
    %c0_11 = arith.constant 0 : index
    %35 = vector.load %arg2[%c0_10, %c0_11] : memref<144x144xbf16, #tpu.memory_space<vmem>>, vector<8x72xbf16>
    %cst = arith.constant dense<0.000000e+00> : vector<8x512xf32>
    %36 = tpu.matmul %35, %34, %cst {dimension_numbers = #tpu.dot_dimension_numbers<[1], [0], [0], [1], [0, 0, 1, 1], [], []>} : vector<8x72xbf16>, vector<72x512xbf16>, vector<8x512xf32> -> vector<8x512xf32>
    %c0_12 = arith.constant 0 : index
    %c0_13 = arith.constant 0 : index
    %37 = vector.load %arg3[%c0_12, %c0_13] : memref<144x1xf32, #tpu.memory_space<vmem>>, vector<8x1xf32>
    %38 = vector.broadcast %37 : vector<8x1xf32> to vector<8x512xf32>
    %39 = arith.addf %36, %38 : vector<8x512xf32>
    %cst_14 = arith.constant 0.000000e+00 : f32
    %40 = vector.broadcast %cst_14 : f32 to vector<8x512xf32>
    %41 = arith.maximumf %39, %40 : vector<8x512xf32>
    %c17_i32_15 = arith.constant 17 : i32
    %42 = tpu.dynamic_rotate %41 by %c17_i32_15 dim 1 : vector<8x512xf32>, i32 -> vector<8x512xf32>
    %c0_16 = arith.constant 0 : index
    %c0_17 = arith.constant 0 : index
    %43 = vector.load %arg0[%c0_16, %c0_17] : memref<9x512xf32, #tpu.memory_space<vmem>>, vector<1x512xf32>
    %44 = vector.broadcast %43 : vector<1x512xf32> to vector<8x512xf32>
    %45 = arith.mulf %42, %44 : vector<8x512xf32>
    %c16_i32_18 = arith.constant 16 : i32
    %46 = tpu.dynamic_rotate %41 by %c16_i32_18 dim 1 : vector<8x512xf32>, i32 -> vector<8x512xf32>
    %c1_19 = arith.constant 1 : index
    %c0_20 = arith.constant 0 : index
    %47 = vector.load %arg0[%c1_19, %c0_20] : memref<9x512xf32, #tpu.memory_space<vmem>>, vector<1x512xf32>
    %48 = vector.broadcast %47 : vector<1x512xf32> to vector<8x512xf32>
    %49 = arith.mulf %46, %48 : vector<8x512xf32>
    %c15_i32_21 = arith.constant 15 : i32
    %50 = tpu.dynamic_rotate %41 by %c15_i32_21 dim 1 : vector<8x512xf32>, i32 -> vector<8x512xf32>
    %c2_22 = arith.constant 2 : index
    %c0_23 = arith.constant 0 : index
    %51 = vector.load %arg0[%c2_22, %c0_23] : memref<9x512xf32, #tpu.memory_space<vmem>>, vector<1x512xf32>
    %52 = vector.broadcast %51 : vector<1x512xf32> to vector<8x512xf32>
    %53 = arith.mulf %50, %52 : vector<8x512xf32>
    %c1_i32_24 = arith.constant 1 : i32
    %54 = tpu.dynamic_rotate %41 by %c1_i32_24 dim 1 : vector<8x512xf32>, i32 -> vector<8x512xf32>
    %c3_25 = arith.constant 3 : index
    %c0_26 = arith.constant 0 : index
    %55 = vector.load %arg0[%c3_25, %c0_26] : memref<9x512xf32, #tpu.memory_space<vmem>>, vector<1x512xf32>
    %56 = vector.broadcast %55 : vector<1x512xf32> to vector<8x512xf32>
    %57 = arith.mulf %54, %56 : vector<8x512xf32>
    %c511_i32_27 = arith.constant 511 : i32
    %58 = tpu.dynamic_rotate %41 by %c511_i32_27 dim 1 : vector<8x512xf32>, i32 -> vector<8x512xf32>
    %c5_28 = arith.constant 5 : index
    %c0_29 = arith.constant 0 : index
    %59 = vector.load %arg0[%c5_28, %c0_29] : memref<9x512xf32, #tpu.memory_space<vmem>>, vector<1x512xf32>
    %60 = vector.broadcast %59 : vector<1x512xf32> to vector<8x512xf32>
    %61 = arith.mulf %58, %60 : vector<8x512xf32>
    %c497_i32_30 = arith.constant 497 : i32
    %62 = tpu.dynamic_rotate %41 by %c497_i32_30 dim 1 : vector<8x512xf32>, i32 -> vector<8x512xf32>
    %c6_31 = arith.constant 6 : index
    %c0_32 = arith.constant 0 : index
    %63 = vector.load %arg0[%c6_31, %c0_32] : memref<9x512xf32, #tpu.memory_space<vmem>>, vector<1x512xf32>
    %64 = vector.broadcast %63 : vector<1x512xf32> to vector<8x512xf32>
    %65 = arith.mulf %62, %64 : vector<8x512xf32>
    %c496_i32_33 = arith.constant 496 : i32
    %66 = tpu.dynamic_rotate %41 by %c496_i32_33 dim 1 : vector<8x512xf32>, i32 -> vector<8x512xf32>
    %c7_34 = arith.constant 7 : index
    %c0_35 = arith.constant 0 : index
    %67 = vector.load %arg0[%c7_34, %c0_35] : memref<9x512xf32, #tpu.memory_space<vmem>>, vector<1x512xf32>
    %68 = vector.broadcast %67 : vector<1x512xf32> to vector<8x512xf32>
    %69 = arith.mulf %66, %68 : vector<8x512xf32>
    %c495_i32_36 = arith.constant 495 : i32
    %70 = tpu.dynamic_rotate %41 by %c495_i32_36 dim 1 : vector<8x512xf32>, i32 -> vector<8x512xf32>
    %c8_37 = arith.constant 8 : index
    %c0_38 = arith.constant 0 : index
    %71 = vector.load %arg0[%c8_37, %c0_38] : memref<9x512xf32, #tpu.memory_space<vmem>>, vector<1x512xf32>
    %72 = vector.broadcast %71 : vector<1x512xf32> to vector<8x512xf32>
    %73 = arith.mulf %70, %72 : vector<8x512xf32>
    %74 = tpu.concatenate %45, %49, %53, %57, %41, %61, %65, %69, %73 in 0 : vector<8x512xf32>, vector<8x512xf32>, vector<8x512xf32>, vector<8x512xf32>, vector<8x512xf32>, vector<8x512xf32>, vector<8x512xf32>, vector<8x512xf32>, vector<8x512xf32> -> vector<72x512xf32>
    %75 = arith.truncf %74 : vector<72x512xf32> to vector<72x512xbf16>
    %c16 = arith.constant 16 : index
    %c0_39 = arith.constant 0 : index
    %76 = vector.load %arg2[%c16, %c0_39] : memref<144x144xbf16, #tpu.memory_space<vmem>>, vector<8x72xbf16>
    %cst_40 = arith.constant dense<0.000000e+00> : vector<8x512xf32>
    %77 = tpu.matmul %76, %75, %cst_40 {dimension_numbers = #tpu.dot_dimension_numbers<[1], [0], [0], [1], [0, 0, 1, 1], [], []>} : vector<8x72xbf16>, vector<72x512xbf16>, vector<8x512xf32> -> vector<8x512xf32>
    %c16_41 = arith.constant 16 : index
    %c0_42 = arith.constant 0 : index
    %78 = vector.load %arg3[%c16_41, %c0_42] : memref<144x1xf32, #tpu.memory_space<vmem>>, vector<8x1xf32>
    %79 = vector.broadcast %78 : vector<8x1xf32> to vector<8x512xf32>
    %80 = arith.addf %77, %79 : vector<8x512xf32>
    %cst_43 = arith.constant 0.000000e+00 : f32
    %81 = vector.broadcast %cst_43 : f32 to vector<8x512xf32>
    %82 = arith.maximumf %80, %81 : vector<8x512xf32>
    %c17_i32_44 = arith.constant 17 : i32
    %83 = tpu.dynamic_rotate %82 by %c17_i32_44 dim 1 : vector<8x512xf32>, i32 -> vector<8x512xf32>
    %c0_45 = arith.constant 0 : index
    %c0_46 = arith.constant 0 : index
    %84 = vector.load %arg0[%c0_45, %c0_46] : memref<9x512xf32, #tpu.memory_space<vmem>>, vector<1x512xf32>
    %85 = vector.broadcast %84 : vector<1x512xf32> to vector<8x512xf32>
    %86 = arith.mulf %83, %85 : vector<8x512xf32>
    %c16_i32_47 = arith.constant 16 : i32
    %87 = tpu.dynamic_rotate %82 by %c16_i32_47 dim 1 : vector<8x512xf32>, i32 -> vector<8x512xf32>
    %c1_48 = arith.constant 1 : index
    %c0_49 = arith.constant 0 : index
    %88 = vector.load %arg0[%c1_48, %c0_49] : memref<9x512xf32, #tpu.memory_space<vmem>>, vector<1x512xf32>
    %89 = vector.broadcast %88 : vector<1x512xf32> to vector<8x512xf32>
    %90 = arith.mulf %87, %89 : vector<8x512xf32>
    %c15_i32_50 = arith.constant 15 : i32
    %91 = tpu.dynamic_rotate %82 by %c15_i32_50 dim 1 : vector<8x512xf32>, i32 -> vector<8x512xf32>
    %c2_51 = arith.constant 2 : index
    %c0_52 = arith.constant 0 : index
    %92 = vector.load %arg0[%c2_51, %c0_52] : memref<9x512xf32, #tpu.memory_space<vmem>>, vector<1x512xf32>
    %93 = vector.broadcast %92 : vector<1x512xf32> to vector<8x512xf32>
    %94 = arith.mulf %91, %93 : vector<8x512xf32>
    %c1_i32_53 = arith.constant 1 : i32
    %95 = tpu.dynamic_rotate %82 by %c1_i32_53 dim 1 : vector<8x512xf32>, i32 -> vector<8x512xf32>
    %c3_54 = arith.constant 3 : index
    %c0_55 = arith.constant 0 : index
    %96 = vector.load %arg0[%c3_54, %c0_55] : memref<9x512xf32, #tpu.memory_space<vmem>>, vector<1x512xf32>
    %97 = vector.broadcast %96 : vector<1x512xf32> to vector<8x512xf32>
    %98 = arith.mulf %95, %97 : vector<8x512xf32>
    %c511_i32_56 = arith.constant 511 : i32
    %99 = tpu.dynamic_rotate %82 by %c511_i32_56 dim 1 : vector<8x512xf32>, i32 -> vector<8x512xf32>
    %c5_57 = arith.constant 5 : index
    %c0_58 = arith.constant 0 : index
    %100 = vector.load %arg0[%c5_57, %c0_58] : memref<9x512xf32, #tpu.memory_space<vmem>>, vector<1x512xf32>
    %101 = vector.broadcast %100 : vector<1x512xf32> to vector<8x512xf32>
    %102 = arith.mulf %99, %101 : vector<8x512xf32>
    %c497_i32_59 = arith.constant 497 : i32
    %103 = tpu.dynamic_rotate %82 by %c497_i32_59 dim 1 : vector<8x512xf32>, i32 -> vector<8x512xf32>
    %c6_60 = arith.constant 6 : index
    %c0_61 = arith.constant 0 : index
    %104 = vector.load %arg0[%c6_60, %c0_61] : memref<9x512xf32, #tpu.memory_space<vmem>>, vector<1x512xf32>
    %105 = vector.broadcast %104 : vector<1x512xf32> to vector<8x512xf32>
    %106 = arith.mulf %103, %105 : vector<8x512xf32>
    %c496_i32_62 = arith.constant 496 : i32
    %107 = tpu.dynamic_rotate %82 by %c496_i32_62 dim 1 : vector<8x512xf32>, i32 -> vector<8x512xf32>
    %c7_63 = arith.constant 7 : index
    %c0_64 = arith.constant 0 : index
    %108 = vector.load %arg0[%c7_63, %c0_64] : memref<9x512xf32, #tpu.memory_space<vmem>>, vector<1x512xf32>
    %109 = vector.broadcast %108 : vector<1x512xf32> to vector<8x512xf32>
    %110 = arith.mulf %107, %109 : vector<8x512xf32>
    %c495_i32_65 = arith.constant 495 : i32
    %111 = tpu.dynamic_rotate %82 by %c495_i32_65 dim 1 : vector<8x512xf32>, i32 -> vector<8x512xf32>
    %c8_66 = arith.constant 8 : index
    %c0_67 = arith.constant 0 : index
    %112 = vector.load %arg0[%c8_66, %c0_67] : memref<9x512xf32, #tpu.memory_space<vmem>>, vector<1x512xf32>
    %113 = vector.broadcast %112 : vector<1x512xf32> to vector<8x512xf32>
    %114 = arith.mulf %111, %113 : vector<8x512xf32>
    %115 = tpu.concatenate %86, %90, %94, %98, %82, %102, %106, %110, %114 in 0 : vector<8x512xf32>, vector<8x512xf32>, vector<8x512xf32>, vector<8x512xf32>, vector<8x512xf32>, vector<8x512xf32>, vector<8x512xf32>, vector<8x512xf32>, vector<8x512xf32> -> vector<72x512xf32>
    %116 = arith.truncf %115 : vector<72x512xf32> to vector<72x512xbf16>
    %c96 = arith.constant 96 : index
    %c0_68 = arith.constant 0 : index
    %117 = vector.load %arg2[%c96, %c0_68] : memref<144x144xbf16, #tpu.memory_space<vmem>>, vector<16x72xbf16>
    %cst_69 = arith.constant dense<0.000000e+00> : vector<16x512xf32>
    %118 = tpu.matmul %117, %116, %cst_69 {dimension_numbers = #tpu.dot_dimension_numbers<[1], [0], [0], [1], [0, 0, 1, 1], [], []>} : vector<16x72xbf16>, vector<72x512xbf16>, vector<16x512xf32> -> vector<16x512xf32>
    %c96_70 = arith.constant 96 : index
    %c0_71 = arith.constant 0 : index
    %119 = vector.load %arg3[%c96_70, %c0_71] : memref<144x1xf32, #tpu.memory_space<vmem>>, vector<16x1xf32>
    %120 = vector.broadcast %119 : vector<16x1xf32> to vector<16x512xf32>
    %121 = arith.addf %118, %120 : vector<16x512xf32>
    %c0_72 = arith.constant 0 : index
    %c0_73 = arith.constant 0 : index
    %c0_74 = arith.constant 0 : index
    %122 = vector.load %arg4[%c0_72, %c0_73, %c0_74] : memref<3x16x512xf32, #tpu.memory_space<vmem>>, vector<1x16x512xf32>
    %123 = vector.shape_cast %122 : vector<1x16x512xf32> to vector<16x512xf32>
    %124 = vector.shape_cast %121 : vector<16x512xf32> to vector<1x16x512xf32>
    tpu.vector_store %arg4[%c0_72, %c0_73, %c0_74], %124 {strides = array<i32>} : memref<3x16x512xf32, #tpu.memory_space<vmem>>, vector<1x16x512xf32>,
    %c17_i32_75 = arith.constant 17 : i32
    %125 = tpu.dynamic_rotate %82 by %c17_i32_75 dim 1 : vector<8x512xf32>, i32 -> vector<8x512xf32>
    %c0_76 = arith.constant 0 : index
    %c0_77 = arith.constant 0 : index
    %126 = vector.load %arg0[%c0_76, %c0_77] : memref<9x512xf32, #tpu.memory_space<vmem>>, vector<1x512xf32>
    %127 = vector.broadcast %126 : vector<1x512xf32> to vector<8x512xf32>
    %128 = arith.mulf %125, %127 : vector<8x512xf32>
    %c16_i32_78 = arith.constant 16 : i32
    %129 = tpu.dynamic_rotate %82 by %c16_i32_78 dim 1 : vector<8x512xf32>, i32 -> vector<8x512xf32>
    %c1_79 = arith.constant 1 : index
    %c0_80 = arith.constant 0 : index
    %130 = vector.load %arg0[%c1_79, %c0_80] : memref<9x512xf32, #tpu.memory_space<vmem>>, vector<1x512xf32>
    %131 = vector.broadcast %130 : vector<1x512xf32> to vector<8x512xf32>
    %132 = arith.mulf %129, %131 : vector<8x512xf32>
    %c15_i32_81 = arith.constant 15 : i32
    %133 = tpu.dynamic_rotate %82 by %c15_i32_81 dim 1 : vector<8x512xf32>, i32 -> vector<8x512xf32>
    %c2_82 = arith.constant 2 : index
    %c0_83 = arith.constant 0 : index
    %134 = vector.load %arg0[%c2_82, %c0_83] : memref<9x512xf32, #tpu.memory_space<vmem>>, vector<1x512xf32>
    %135 = vector.broadcast %134 : vector<1x512xf32> to vector<8x512xf32>
    %136 = arith.mulf %133, %135 : vector<8x512xf32>
    %c1_i32_84 = arith.constant 1 : i32
    %137 = tpu.dynamic_rotate %82 by %c1_i32_84 dim 1 : vector<8x512xf32>, i32 -> vector<8x512xf32>
    %c3_85 = arith.constant 3 : index
    %c0_86 = arith.constant 0 : index
    %138 = vector.load %arg0[%c3_85, %c0_86] : memref<9x512xf32, #tpu.memory_space<vmem>>, vector<1x512xf32>
    %139 = vector.broadcast %138 : vector<1x512xf32> to vector<8x512xf32>
    %140 = arith.mulf %137, %139 : vector<8x512xf32>
    %c511_i32_87 = arith.constant 511 : i32
    %141 = tpu.dynamic_rotate %82 by %c511_i32_87 dim 1 : vector<8x512xf32>, i32 -> vector<8x512xf32>
    %c5_88 = arith.constant 5 : index
    %c0_89 = arith.constant 0 : index
    %142 = vector.load %arg0[%c5_88, %c0_89] : memref<9x512xf32, #tpu.memory_space<vmem>>, vector<1x512xf32>
    %143 = vector.broadcast %142 : vector<1x512xf32> to vector<8x512xf32>
    %144 = arith.mulf %141, %143 : vector<8x512xf32>
    %c497_i32_90 = arith.constant 497 : i32
    %145 = tpu.dynamic_rotate %82 by %c497_i32_90 dim 1 : vector<8x512xf32>, i32 -> vector<8x512xf32>
    %c6_91 = arith.constant 6 : index
    %c0_92 = arith.constant 0 : index
    %146 = vector.load %arg0[%c6_91, %c0_92] : memref<9x512xf32, #tpu.memory_space<vmem>>, vector<1x512xf32>
    %147 = vector.broadcast %146 : vector<1x512xf32> to vector<8x512xf32>
    %148 = arith.mulf %145, %147 : vector<8x512xf32>
    %c496_i32_93 = arith.constant 496 : i32
    %149 = tpu.dynamic_rotate %82 by %c496_i32_93 dim 1 : vector<8x512xf32>, i32 -> vector<8x512xf32>
    %c7_94 = arith.constant 7 : index
    %c0_95 = arith.constant 0 : index
    %150 = vector.load %arg0[%c7_94, %c0_95] : memref<9x512xf32, #tpu.memory_space<vmem>>, vector<1x512xf32>
    %151 = vector.broadcast %150 : vector<1x512xf32> to vector<8x512xf32>
    %152 = arith.mulf %149, %151 : vector<8x512xf32>
    %c495_i32_96 = arith.constant 495 : i32
    %153 = tpu.dynamic_rotate %82 by %c495_i32_96 dim 1 : vector<8x512xf32>, i32 -> vector<8x512xf32>
    %c8_97 = arith.constant 8 : index
    %c0_98 = arith.constant 0 : index
    %154 = vector.load %arg0[%c8_97, %c0_98] : memref<9x512xf32, #tpu.memory_space<vmem>>, vector<1x512xf32>
    %155 = vector.broadcast %154 : vector<1x512xf32> to vector<8x512xf32>
    %156 = arith.mulf %153, %155 : vector<8x512xf32>
    %157 = tpu.concatenate %128, %132, %136, %140, %82, %144, %148, %152, %156 in 0 : vector<8x512xf32>, vector<8x512xf32>, vector<8x512xf32>, vector<8x512xf32>, vector<8x512xf32>, vector<8x512xf32>, vector<8x512xf32>, vector<8x512xf32>, vector<8x512xf32> -> vector<72x512xf32>
    %158 = arith.truncf %157 : vector<72x512xf32> to vector<72x512xbf16>
    %c32 = arith.constant 32 : index
    %c0_99 = arith.constant 0 : index
    %159 = vector.load %arg2[%c32, %c0_99] : memref<144x144xbf16, #tpu.memory_space<vmem>>, vector<16x72xbf16>
    %cst_100 = arith.constant dense<0.000000e+00> : vector<16x512xf32>
    %160 = tpu.matmul %159, %158, %cst_100 {dimension_numbers = #tpu.dot_dimension_numbers<[1], [0], [0], [1], [0, 0, 1, 1], [], []>} : vector<16x72xbf16>, vector<72x512xbf16>, vector<16x512xf32> -> vector<16x512xf32>
    %c32_101 = arith.constant 32 : index
    %c0_102 = arith.constant 0 : index
    %161 = vector.load %arg3[%c32_101, %c0_102] : memref<144x1xf32, #tpu.memory_space<vmem>>, vector<16x1xf32>
    %162 = vector.broadcast %161 : vector<16x1xf32> to vector<16x512xf32>
    %163 = arith.addf %160, %162 : vector<16x512xf32>
    %cst_103 = arith.constant 0.000000e+00 : f32
    %164 = vector.broadcast %cst_103 : f32 to vector<16x512xf32>
    %165 = arith.maximumf %163, %164 : vector<16x512xf32>
    %c17_i32_104 = arith.constant 17 : i32
    %166 = tpu.dynamic_rotate %165 by %c17_i32_104 dim 1 : vector<16x512xf32>, i32 -> vector<16x512xf32>
    %c0_105 = arith.constant 0 : index
    %c0_106 = arith.constant 0 : index
    %167 = vector.load %arg0[%c0_105, %c0_106] : memref<9x512xf32, #tpu.memory_space<vmem>>, vector<1x512xf32>
    %168 = vector.broadcast %167 : vector<1x512xf32> to vector<16x512xf32>
    %169 = arith.mulf %166, %168 : vector<16x512xf32>
    %c16_i32_107 = arith.constant 16 : i32
    %170 = tpu.dynamic_rotate %165 by %c16_i32_107 dim 1 : vector<16x512xf32>, i32 -> vector<16x512xf32>
    %c1_108 = arith.constant 1 : index
    %c0_109 = arith.constant 0 : index
    %171 = vector.load %arg0[%c1_108, %c0_109] : memref<9x512xf32, #tpu.memory_space<vmem>>, vector<1x512xf32>
    %172 = vector.broadcast %171 : vector<1x512xf32> to vector<16x512xf32>
    %173 = arith.mulf %170, %172 : vector<16x512xf32>
    %c15_i32_110 = arith.constant 15 : i32
    %174 = tpu.dynamic_rotate %165 by %c15_i32_110 dim 1 : vector<16x512xf32>, i32 -> vector<16x512xf32>
    %c2_111 = arith.constant 2 : index
    %c0_112 = arith.constant 0 : index
    %175 = vector.load %arg0[%c2_111, %c0_112] : memref<9x512xf32, #tpu.memory_space<vmem>>, vector<1x512xf32>
    %176 = vector.broadcast %175 : vector<1x512xf32> to vector<16x512xf32>
    %177 = arith.mulf %174, %176 : vector<16x512xf32>
    %c1_i32_113 = arith.constant 1 : i32
    %178 = tpu.dynamic_rotate %165 by %c1_i32_113 dim 1 : vector<16x512xf32>, i32 -> vector<16x512xf32>
    %c3_114 = arith.constant 3 : index
    %c0_115 = arith.constant 0 : index
    %179 = vector.load %arg0[%c3_114, %c0_115] : memref<9x512xf32, #tpu.memory_space<vmem>>, vector<1x512xf32>
    %180 = vector.broadcast %179 : vector<1x512xf32> to vector<16x512xf32>
    %181 = arith.mulf %178, %180 : vector<16x512xf32>
    %c511_i32_116 = arith.constant 511 : i32
    %182 = tpu.dynamic_rotate %165 by %c511_i32_116 dim 1 : vector<16x512xf32>, i32 -> vector<16x512xf32>
    %c5_117 = arith.constant 5 : index
    %c0_118 = arith.constant 0 : index
    %183 = vector.load %arg0[%c5_117, %c0_118] : memref<9x512xf32, #tpu.memory_space<vmem>>, vector<1x512xf32>
    %184 = vector.broadcast %183 : vector<1x512xf32> to vector<16x512xf32>
    %185 = arith.mulf %182, %184 : vector<16x512xf32>
    %c497_i32_119 = arith.constant 497 : i32
    %186 = tpu.dynamic_rotate %165 by %c497_i32_119 dim 1 : vector<16x512xf32>, i32 -> vector<16x512xf32>
    %c6_120 = arith.constant 6 : index
    %c0_121 = arith.constant 0 : index
    %187 = vector.load %arg0[%c6_120, %c0_121] : memref<9x512xf32, #tpu.memory_space<vmem>>, vector<1x512xf32>
    %188 = vector.broadcast %187 : vector<1x512xf32> to vector<16x512xf32>
    %189 = arith.mulf %186, %188 : vector<16x512xf32>
    %c496_i32_122 = arith.constant 496 : i32
    %190 = tpu.dynamic_rotate %165 by %c496_i32_122 dim 1 : vector<16x512xf32>, i32 -> vector<16x512xf32>
    %c7_123 = arith.constant 7 : index
    %c0_124 = arith.constant 0 : index
    %191 = vector.load %arg0[%c7_123, %c0_124] : memref<9x512xf32, #tpu.memory_space<vmem>>, vector<1x512xf32>
    %192 = vector.broadcast %191 : vector<1x512xf32> to vector<16x512xf32>
    %193 = arith.mulf %190, %192 : vector<16x512xf32>
    %c495_i32_125 = arith.constant 495 : i32
    %194 = tpu.dynamic_rotate %165 by %c495_i32_125 dim 1 : vector<16x512xf32>, i32 -> vector<16x512xf32>
    %c8_126 = arith.constant 8 : index
    %c0_127 = arith.constant 0 : index
    %195 = vector.load %arg0[%c8_126, %c0_127] : memref<9x512xf32, #tpu.memory_space<vmem>>, vector<1x512xf32>
    %196 = vector.broadcast %195 : vector<1x512xf32> to vector<16x512xf32>
    %197 = arith.mulf %194, %196 : vector<16x512xf32>
    %198 = tpu.concatenate %169, %173, %177, %181, %165, %185, %189, %193, %197 in 0 : vector<16x512xf32>, vector<16x512xf32>, vector<16x512xf32>, vector<16x512xf32>, vector<16x512xf32>, vector<16x512xf32>, vector<16x512xf32>, vector<16x512xf32>, vector<16x512xf32> -> vector<144x512xf32>
    %199 = arith.truncf %198 : vector<144x512xf32> to vector<144x512xbf16>
    %c48 = arith.constant 48 : index
    %c0_128 = arith.constant 0 : index
    %200 = vector.load %arg2[%c48, %c0_128] : memref<144x144xbf16, #tpu.memory_space<vmem>>, vector<16x144xbf16>
    %cst_129 = arith.constant dense<0.000000e+00> : vector<16x512xf32>
    %201 = tpu.matmul %200, %199, %cst_129 {dimension_numbers = #tpu.dot_dimension_numbers<[1], [0], [0], [1], [0, 0, 1, 1], [], []>} : vector<16x144xbf16>, vector<144x512xbf16>, vector<16x512xf32> -> vector<16x512xf32>
    %c48_130 = arith.constant 48 : index
    %c0_131 = arith.constant 0 : index
    %202 = vector.load %arg3[%c48_130, %c0_131] : memref<144x1xf32, #tpu.memory_space<vmem>>, vector<16x1xf32>
    %203 = vector.broadcast %202 : vector<16x1xf32> to vector<16x512xf32>
    %204 = arith.addf %201, %203 : vector<16x512xf32>
    %cst_132 = arith.constant 0.000000e+00 : f32
    %205 = vector.broadcast %cst_132 : f32 to vector<16x512xf32>
    %206 = arith.maximumf %204, %205 : vector<16x512xf32>
    %c17_i32_133 = arith.constant 17 : i32
    %207 = tpu.dynamic_rotate %206 by %c17_i32_133 dim 1 : vector<16x512xf32>, i32 -> vector<16x512xf32>
    %c0_134 = arith.constant 0 : index
    %c0_135 = arith.constant 0 : index
    %208 = vector.load %arg0[%c0_134, %c0_135] : memref<9x512xf32, #tpu.memory_space<vmem>>, vector<1x512xf32>
    %209 = vector.broadcast %208 : vector<1x512xf32> to vector<16x512xf32>
    %210 = arith.mulf %207, %209 : vector<16x512xf32>
    %c16_i32_136 = arith.constant 16 : i32
    %211 = tpu.dynamic_rotate %206 by %c16_i32_136 dim 1 : vector<16x512xf32>, i32 -> vector<16x512xf32>
    %c1_137 = arith.constant 1 : index
    %c0_138 = arith.constant 0 : index
    %212 = vector.load %arg0[%c1_137, %c0_138] : memref<9x512xf32, #tpu.memory_space<vmem>>, vector<1x512xf32>
    %213 = vector.broadcast %212 : vector<1x512xf32> to vector<16x512xf32>
    %214 = arith.mulf %211, %213 : vector<16x512xf32>
    %c15_i32_139 = arith.constant 15 : i32
    %215 = tpu.dynamic_rotate %206 by %c15_i32_139 dim 1 : vector<16x512xf32>, i32 -> vector<16x512xf32>
    %c2_140 = arith.constant 2 : index
    %c0_141 = arith.constant 0 : index
    %216 = vector.load %arg0[%c2_140, %c0_141] : memref<9x512xf32, #tpu.memory_space<vmem>>, vector<1x512xf32>
    %217 = vector.broadcast %216 : vector<1x512xf32> to vector<16x512xf32>
    %218 = arith.mulf %215, %217 : vector<16x512xf32>
    %c1_i32_142 = arith.constant 1 : i32
    %219 = tpu.dynamic_rotate %206 by %c1_i32_142 dim 1 : vector<16x512xf32>, i32 -> vector<16x512xf32>
    %c3_143 = arith.constant 3 : index
    %c0_144 = arith.constant 0 : index
    %220 = vector.load %arg0[%c3_143, %c0_144] : memref<9x512xf32, #tpu.memory_space<vmem>>, vector<1x512xf32>
    %221 = vector.broadcast %220 : vector<1x512xf32> to vector<16x512xf32>
    %222 = arith.mulf %219, %221 : vector<16x512xf32>
    %c511_i32_145 = arith.constant 511 : i32
    %223 = tpu.dynamic_rotate %206 by %c511_i32_145 dim 1 : vector<16x512xf32>, i32 -> vector<16x512xf32>
    %c5_146 = arith.constant 5 : index
    %c0_147 = arith.constant 0 : index
    %224 = vector.load %arg0[%c5_146, %c0_147] : memref<9x512xf32, #tpu.memory_space<vmem>>, vector<1x512xf32>
    %225 = vector.broadcast %224 : vector<1x512xf32> to vector<16x512xf32>
    %226 = arith.mulf %223, %225 : vector<16x512xf32>
    %c497_i32_148 = arith.constant 497 : i32
    %227 = tpu.dynamic_rotate %206 by %c497_i32_148 dim 1 : vector<16x512xf32>, i32 -> vector<16x512xf32>
    %c6_149 = arith.constant 6 : index
    %c0_150 = arith.constant 0 : index
    %228 = vector.load %arg0[%c6_149, %c0_150] : memref<9x512xf32, #tpu.memory_space<vmem>>, vector<1x512xf32>
    %229 = vector.broadcast %228 : vector<1x512xf32> to vector<16x512xf32>
    %230 = arith.mulf %227, %229 : vector<16x512xf32>
    %c496_i32_151 = arith.constant 496 : i32
    %231 = tpu.dynamic_rotate %206 by %c496_i32_151 dim 1 : vector<16x512xf32>, i32 -> vector<16x512xf32>
    %c7_152 = arith.constant 7 : index
    %c0_153 = arith.constant 0 : index
    %232 = vector.load %arg0[%c7_152, %c0_153] : memref<9x512xf32, #tpu.memory_space<vmem>>, vector<1x512xf32>
    %233 = vector.broadcast %232 : vector<1x512xf32> to vector<16x512xf32>
    %234 = arith.mulf %231, %233 : vector<16x512xf32>
    %c495_i32_154 = arith.constant 495 : i32
    %235 = tpu.dynamic_rotate %206 by %c495_i32_154 dim 1 : vector<16x512xf32>, i32 -> vector<16x512xf32>
    %c8_155 = arith.constant 8 : index
    %c0_156 = arith.constant 0 : index
    %236 = vector.load %arg0[%c8_155, %c0_156] : memref<9x512xf32, #tpu.memory_space<vmem>>, vector<1x512xf32>
    %237 = vector.broadcast %236 : vector<1x512xf32> to vector<16x512xf32>
    %238 = arith.mulf %235, %237 : vector<16x512xf32>
    %239 = tpu.concatenate %210, %214, %218, %222, %206, %226, %230, %234, %238 in 0 : vector<16x512xf32>, vector<16x512xf32>, vector<16x512xf32>, vector<16x512xf32>, vector<16x512xf32>, vector<16x512xf32>, vector<16x512xf32>, vector<16x512xf32>, vector<16x512xf32> -> vector<144x512xf32>
    %240 = arith.truncf %239 : vector<144x512xf32> to vector<144x512xbf16>
    %c64 = arith.constant 64 : index
    %c0_157 = arith.constant 0 : index
    %241 = vector.load %arg2[%c64, %c0_157] : memref<144x144xbf16, #tpu.memory_space<vmem>>, vector<16x144xbf16>
    %cst_158 = arith.constant dense<0.000000e+00> : vector<16x512xf32>
    %242 = tpu.matmul %241, %240, %cst_158 {dimension_numbers = #tpu.dot_dimension_numbers<[1], [0], [0], [1], [0, 0, 1, 1], [], []>} : vector<16x144xbf16>, vector<144x512xbf16>, vector<16x512xf32> -> vector<16x512xf32>
    %c64_159 = arith.constant 64 : index
    %c0_160 = arith.constant 0 : index
    %243 = vector.load %arg3[%c64_159, %c0_160] : memref<144x1xf32, #tpu.memory_space<vmem>>, vector<16x1xf32>
    %244 = vector.broadcast %243 : vector<16x1xf32> to vector<16x512xf32>
    %245 = arith.addf %242, %244 : vector<16x512xf32>
    %cst_161 = arith.constant 0.000000e+00 : f32
    %246 = vector.broadcast %cst_161 : f32 to vector<16x512xf32>
    %247 = arith.maximumf %245, %246 : vector<16x512xf32>
    %c17_i32_162 = arith.constant 17 : i32
    %248 = tpu.dynamic_rotate %247 by %c17_i32_162 dim 1 : vector<16x512xf32>, i32 -> vector<16x512xf32>
    %c0_163 = arith.constant 0 : index
    %c0_164 = arith.constant 0 : index
    %249 = vector.load %arg0[%c0_163, %c0_164] : memref<9x512xf32, #tpu.memory_space<vmem>>, vector<1x512xf32>
    %250 = vector.broadcast %249 : vector<1x512xf32> to vector<16x512xf32>
    %251 = arith.mulf %248, %250 : vector<16x512xf32>
    %c16_i32_165 = arith.constant 16 : i32
    %252 = tpu.dynamic_rotate %247 by %c16_i32_165 dim 1 : vector<16x512xf32>, i32 -> vector<16x512xf32>
    %c1_166 = arith.constant 1 : index
    %c0_167 = arith.constant 0 : index
    %253 = vector.load %arg0[%c1_166, %c0_167] : memref<9x512xf32, #tpu.memory_space<vmem>>, vector<1x512xf32>
    %254 = vector.broadcast %253 : vector<1x512xf32> to vector<16x512xf32>
    %255 = arith.mulf %252, %254 : vector<16x512xf32>
    %c15_i32_168 = arith.constant 15 : i32
    %256 = tpu.dynamic_rotate %247 by %c15_i32_168 dim 1 : vector<16x512xf32>, i32 -> vector<16x512xf32>
    %c2_169 = arith.constant 2 : index
    %c0_170 = arith.constant 0 : index
    %257 = vector.load %arg0[%c2_169, %c0_170] : memref<9x512xf32, #tpu.memory_space<vmem>>, vector<1x512xf32>
    %258 = vector.broadcast %257 : vector<1x512xf32> to vector<16x512xf32>
    %259 = arith.mulf %256, %258 : vector<16x512xf32>
    %c1_i32_171 = arith.constant 1 : i32
    %260 = tpu.dynamic_rotate %247 by %c1_i32_171 dim 1 : vector<16x512xf32>, i32 -> vector<16x512xf32>
    %c3_172 = arith.constant 3 : index
    %c0_173 = arith.constant 0 : index
    %261 = vector.load %arg0[%c3_172, %c0_173] : memref<9x512xf32, #tpu.memory_space<vmem>>, vector<1x512xf32>
    %262 = vector.broadcast %261 : vector<1x512xf32> to vector<16x512xf32>
    %263 = arith.mulf %260, %262 : vector<16x512xf32>
    %c511_i32_174 = arith.constant 511 : i32
    %264 = tpu.dynamic_rotate %247 by %c511_i32_174 dim 1 : vector<16x512xf32>, i32 -> vector<16x512xf32>
    %c5_175 = arith.constant 5 : index
    %c0_176 = arith.constant 0 : index
    %265 = vector.load %arg0[%c5_175, %c0_176] : memref<9x512xf32, #tpu.memory_space<vmem>>, vector<1x512xf32>
    %266 = vector.broadcast %265 : vector<1x512xf32> to vector<16x512xf32>
    %267 = arith.mulf %264, %266 : vector<16x512xf32>
    %c497_i32_177 = arith.constant 497 : i32
    %268 = tpu.dynamic_rotate %247 by %c497_i32_177 dim 1 : vector<16x512xf32>, i32 -> vector<16x512xf32>
    %c6_178 = arith.constant 6 : index
    %c0_179 = arith.constant 0 : index
    %269 = vector.load %arg0[%c6_178, %c0_179] : memref<9x512xf32, #tpu.memory_space<vmem>>, vector<1x512xf32>
    %270 = vector.broadcast %269 : vector<1x512xf32> to vector<16x512xf32>
    %271 = arith.mulf %268, %270 : vector<16x512xf32>
    %c496_i32_180 = arith.constant 496 : i32
    %272 = tpu.dynamic_rotate %247 by %c496_i32_180 dim 1 : vector<16x512xf32>, i32 -> vector<16x512xf32>
    %c7_181 = arith.constant 7 : index
    %c0_182 = arith.constant 0 : index
    %273 = vector.load %arg0[%c7_181, %c0_182] : memref<9x512xf32, #tpu.memory_space<vmem>>, vector<1x512xf32>
    %274 = vector.broadcast %273 : vector<1x512xf32> to vector<16x512xf32>
    %275 = arith.mulf %272, %274 : vector<16x512xf32>
    %c495_i32_183 = arith.constant 495 : i32
    %276 = tpu.dynamic_rotate %247 by %c495_i32_183 dim 1 : vector<16x512xf32>, i32 -> vector<16x512xf32>
    %c8_184 = arith.constant 8 : index
    %c0_185 = arith.constant 0 : index
    %277 = vector.load %arg0[%c8_184, %c0_185] : memref<9x512xf32, #tpu.memory_space<vmem>>, vector<1x512xf32>
    %278 = vector.broadcast %277 : vector<1x512xf32> to vector<16x512xf32>
    %279 = arith.mulf %276, %278 : vector<16x512xf32>
    %280 = tpu.concatenate %251, %255, %259, %263, %247, %267, %271, %275, %279 in 0 : vector<16x512xf32>, vector<16x512xf32>, vector<16x512xf32>, vector<16x512xf32>, vector<16x512xf32>, vector<16x512xf32>, vector<16x512xf32>, vector<16x512xf32>, vector<16x512xf32> -> vector<144x512xf32>
    %281 = arith.truncf %280 : vector<144x512xf32> to vector<144x512xbf16>
    %c112 = arith.constant 112 : index
    %c0_186 = arith.constant 0 : index
    %282 = vector.load %arg2[%c112, %c0_186] : memref<144x144xbf16, #tpu.memory_space<vmem>>, vector<16x144xbf16>
    %cst_187 = arith.constant dense<0.000000e+00> : vector<16x512xf32>
    %283 = tpu.matmul %282, %281, %cst_187 {dimension_numbers = #tpu.dot_dimension_numbers<[1], [0], [0], [1], [0, 0, 1, 1], [], []>} : vector<16x144xbf16>, vector<144x512xbf16>, vector<16x512xf32> -> vector<16x512xf32>
    %c112_188 = arith.constant 112 : index
    %c0_189 = arith.constant 0 : index
    %284 = vector.load %arg3[%c112_188, %c0_189] : memref<144x1xf32, #tpu.memory_space<vmem>>, vector<16x1xf32>
    %285 = vector.broadcast %284 : vector<16x1xf32> to vector<16x512xf32>
    %286 = arith.addf %283, %285 : vector<16x512xf32>
    %c1_190 = arith.constant 1 : index
    %c0_191 = arith.constant 0 : index
    %c0_192 = arith.constant 0 : index
    %287 = vector.load %arg4[%c1_190, %c0_191, %c0_192] : memref<3x16x512xf32, #tpu.memory_space<vmem>>, vector<1x16x512xf32>
    %288 = vector.shape_cast %287 : vector<1x16x512xf32> to vector<16x512xf32>
    %289 = vector.shape_cast %286 : vector<16x512xf32> to vector<1x16x512xf32>
    tpu.vector_store %arg4[%c1_190, %c0_191, %c0_192], %289 {strides = array<i32>} : memref<3x16x512xf32, #tpu.memory_space<vmem>>, vector<1x16x512xf32>,
    %c17_i32_193 = arith.constant 17 : i32
    %290 = tpu.dynamic_rotate %247 by %c17_i32_193 dim 1 : vector<16x512xf32>, i32 -> vector<16x512xf32>
    %c0_194 = arith.constant 0 : index
    %c0_195 = arith.constant 0 : index
    %291 = vector.load %arg0[%c0_194, %c0_195] : memref<9x512xf32, #tpu.memory_space<vmem>>, vector<1x512xf32>
    %292 = vector.broadcast %291 : vector<1x512xf32> to vector<16x512xf32>
    %293 = arith.mulf %290, %292 : vector<16x512xf32>
    %c16_i32_196 = arith.constant 16 : i32
    %294 = tpu.dynamic_rotate %247 by %c16_i32_196 dim 1 : vector<16x512xf32>, i32 -> vector<16x512xf32>
    %c1_197 = arith.constant 1 : index
    %c0_198 = arith.constant 0 : index
    %295 = vector.load %arg0[%c1_197, %c0_198] : memref<9x512xf32, #tpu.memory_space<vmem>>, vector<1x512xf32>
    %296 = vector.broadcast %295 : vector<1x512xf32> to vector<16x512xf32>
    %297 = arith.mulf %294, %296 : vector<16x512xf32>
    %c15_i32_199 = arith.constant 15 : i32
    %298 = tpu.dynamic_rotate %247 by %c15_i32_199 dim 1 : vector<16x512xf32>, i32 -> vector<16x512xf32>
    %c2_200 = arith.constant 2 : index
    %c0_201 = arith.constant 0 : index
    %299 = vector.load %arg0[%c2_200, %c0_201] : memref<9x512xf32, #tpu.memory_space<vmem>>, vector<1x512xf32>
    %300 = vector.broadcast %299 : vector<1x512xf32> to vector<16x512xf32>
    %301 = arith.mulf %298, %300 : vector<16x512xf32>
    %c1_i32_202 = arith.constant 1 : i32
    %302 = tpu.dynamic_rotate %247 by %c1_i32_202 dim 1 : vector<16x512xf32>, i32 -> vector<16x512xf32>
    %c3_203 = arith.constant 3 : index
    %c0_204 = arith.constant 0 : index
    %303 = vector.load %arg0[%c3_203, %c0_204] : memref<9x512xf32, #tpu.memory_space<vmem>>, vector<1x512xf32>
    %304 = vector.broadcast %303 : vector<1x512xf32> to vector<16x512xf32>
    %305 = arith.mulf %302, %304 : vector<16x512xf32>
    %c511_i32_205 = arith.constant 511 : i32
    %306 = tpu.dynamic_rotate %247 by %c511_i32_205 dim 1 : vector<16x512xf32>, i32 -> vector<16x512xf32>
    %c5_206 = arith.constant 5 : index
    %c0_207 = arith.constant 0 : index
    %307 = vector.load %arg0[%c5_206, %c0_207] : memref<9x512xf32, #tpu.memory_space<vmem>>, vector<1x512xf32>
    %308 = vector.broadcast %307 : vector<1x512xf32> to vector<16x512xf32>
    %309 = arith.mulf %306, %308 : vector<16x512xf32>
    %c497_i32_208 = arith.constant 497 : i32
    %310 = tpu.dynamic_rotate %247 by %c497_i32_208 dim 1 : vector<16x512xf32>, i32 -> vector<16x512xf32>
    %c6_209 = arith.constant 6 : index
    %c0_210 = arith.constant 0 : index
    %311 = vector.load %arg0[%c6_209, %c0_210] : memref<9x512xf32, #tpu.memory_space<vmem>>, vector<1x512xf32>
    %312 = vector.broadcast %311 : vector<1x512xf32> to vector<16x512xf32>
    %313 = arith.mulf %310, %312 : vector<16x512xf32>
    %c496_i32_211 = arith.constant 496 : i32
    %314 = tpu.dynamic_rotate %247 by %c496_i32_211 dim 1 : vector<16x512xf32>, i32 -> vector<16x512xf32>
    %c7_212 = arith.constant 7 : index
    %c0_213 = arith.constant 0 : index
    %315 = vector.load %arg0[%c7_212, %c0_213] : memref<9x512xf32, #tpu.memory_space<vmem>>, vector<1x512xf32>
    %316 = vector.broadcast %315 : vector<1x512xf32> to vector<16x512xf32>
    %317 = arith.mulf %314, %316 : vector<16x512xf32>
    %c495_i32_214 = arith.constant 495 : i32
    %318 = tpu.dynamic_rotate %247 by %c495_i32_214 dim 1 : vector<16x512xf32>, i32 -> vector<16x512xf32>
    %c8_215 = arith.constant 8 : index
    %c0_216 = arith.constant 0 : index
    %319 = vector.load %arg0[%c8_215, %c0_216] : memref<9x512xf32, #tpu.memory_space<vmem>>, vector<1x512xf32>
    %320 = vector.broadcast %319 : vector<1x512xf32> to vector<16x512xf32>
    %321 = arith.mulf %318, %320 : vector<16x512xf32>
    %322 = tpu.concatenate %293, %297, %301, %305, %247, %309, %313, %317, %321 in 0 : vector<16x512xf32>, vector<16x512xf32>, vector<16x512xf32>, vector<16x512xf32>, vector<16x512xf32>, vector<16x512xf32>, vector<16x512xf32>, vector<16x512xf32>, vector<16x512xf32> -> vector<144x512xf32>
    %323 = arith.truncf %322 : vector<144x512xf32> to vector<144x512xbf16>
    %c80 = arith.constant 80 : index
    %c0_217 = arith.constant 0 : index
    %324 = vector.load %arg2[%c80, %c0_217] : memref<144x144xbf16, #tpu.memory_space<vmem>>, vector<16x144xbf16>
    %cst_218 = arith.constant dense<0.000000e+00> : vector<16x512xf32>
    %325 = tpu.matmul %324, %323, %cst_218 {dimension_numbers = #tpu.dot_dimension_numbers<[1], [0], [0], [1], [0, 0, 1, 1], [], []>} : vector<16x144xbf16>, vector<144x512xbf16>, vector<16x512xf32> -> vector<16x512xf32>
    %c80_219 = arith.constant 80 : index
    %c0_220 = arith.constant 0 : index
    %326 = vector.load %arg3[%c80_219, %c0_220] : memref<144x1xf32, #tpu.memory_space<vmem>>, vector<16x1xf32>
    %327 = vector.broadcast %326 : vector<16x1xf32> to vector<16x512xf32>
    %328 = arith.addf %325, %327 : vector<16x512xf32>
    %cst_221 = arith.constant 0.000000e+00 : f32
    %329 = vector.broadcast %cst_221 : f32 to vector<16x512xf32>
    %330 = arith.maximumf %328, %329 : vector<16x512xf32>
    %c17_i32_222 = arith.constant 17 : i32
    %331 = tpu.dynamic_rotate %330 by %c17_i32_222 dim 1 : vector<16x512xf32>, i32 -> vector<16x512xf32>
    %c0_223 = arith.constant 0 : index
    %c0_224 = arith.constant 0 : index
    %332 = vector.load %arg0[%c0_223, %c0_224] : memref<9x512xf32, #tpu.memory_space<vmem>>, vector<1x512xf32>
    %333 = vector.broadcast %332 : vector<1x512xf32> to vector<16x512xf32>
    %334 = arith.mulf %331, %333 : vector<16x512xf32>
    %c16_i32_225 = arith.constant 16 : i32
    %335 = tpu.dynamic_rotate %330 by %c16_i32_225 dim 1 : vector<16x512xf32>, i32 -> vector<16x512xf32>
    %c1_226 = arith.constant 1 : index
    %c0_227 = arith.constant 0 : index
    %336 = vector.load %arg0[%c1_226, %c0_227] : memref<9x512xf32, #tpu.memory_space<vmem>>, vector<1x512xf32>
    %337 = vector.broadcast %336 : vector<1x512xf32> to vector<16x512xf32>
    %338 = arith.mulf %335, %337 : vector<16x512xf32>
    %c15_i32_228 = arith.constant 15 : i32
    %339 = tpu.dynamic_rotate %330 by %c15_i32_228 dim 1 : vector<16x512xf32>, i32 -> vector<16x512xf32>
    %c2_229 = arith.constant 2 : index
    %c0_230 = arith.constant 0 : index
    %340 = vector.load %arg0[%c2_229, %c0_230] : memref<9x512xf32, #tpu.memory_space<vmem>>, vector<1x512xf32>
    %341 = vector.broadcast %340 : vector<1x512xf32> to vector<16x512xf32>
    %342 = arith.mulf %339, %341 : vector<16x512xf32>
    %c1_i32_231 = arith.constant 1 : i32
    %343 = tpu.dynamic_rotate %330 by %c1_i32_231 dim 1 : vector<16x512xf32>, i32 -> vector<16x512xf32>
    %c3_232 = arith.constant 3 : index
    %c0_233 = arith.constant 0 : index
    %344 = vector.load %arg0[%c3_232, %c0_233] : memref<9x512xf32, #tpu.memory_space<vmem>>, vector<1x512xf32>
    %345 = vector.broadcast %344 : vector<1x512xf32> to vector<16x512xf32>
    %346 = arith.mulf %343, %345 : vector<16x512xf32>
    %c511_i32_234 = arith.constant 511 : i32
    %347 = tpu.dynamic_rotate %330 by %c511_i32_234 dim 1 : vector<16x512xf32>, i32 -> vector<16x512xf32>
    %c5_235 = arith.constant 5 : index
    %c0_236 = arith.constant 0 : index
    %348 = vector.load %arg0[%c5_235, %c0_236] : memref<9x512xf32, #tpu.memory_space<vmem>>, vector<1x512xf32>
    %349 = vector.broadcast %348 : vector<1x512xf32> to vector<16x512xf32>
    %350 = arith.mulf %347, %349 : vector<16x512xf32>
    %c497_i32_237 = arith.constant 497 : i32
    %351 = tpu.dynamic_rotate %330 by %c497_i32_237 dim 1 : vector<16x512xf32>, i32 -> vector<16x512xf32>
    %c6_238 = arith.constant 6 : index
    %c0_239 = arith.constant 0 : index
    %352 = vector.load %arg0[%c6_238, %c0_239] : memref<9x512xf32, #tpu.memory_space<vmem>>, vector<1x512xf32>
    %353 = vector.broadcast %352 : vector<1x512xf32> to vector<16x512xf32>
    %354 = arith.mulf %351, %353 : vector<16x512xf32>
    %c496_i32_240 = arith.constant 496 : i32
    %355 = tpu.dynamic_rotate %330 by %c496_i32_240 dim 1 : vector<16x512xf32>, i32 -> vector<16x512xf32>
    %c7_241 = arith.constant 7 : index
    %c0_242 = arith.constant 0 : index
    %356 = vector.load %arg0[%c7_241, %c0_242] : memref<9x512xf32, #tpu.memory_space<vmem>>, vector<1x512xf32>
    %357 = vector.broadcast %356 : vector<1x512xf32> to vector<16x512xf32>
    %358 = arith.mulf %355, %357 : vector<16x512xf32>
    %c495_i32_243 = arith.constant 495 : i32
    %359 = tpu.dynamic_rotate %330 by %c495_i32_243 dim 1 : vector<16x512xf32>, i32 -> vector<16x512xf32>
    %c8_244 = arith.constant 8 : index
    %c0_245 = arith.constant 0 : index
    %360 = vector.load %arg0[%c8_244, %c0_245] : memref<9x512xf32, #tpu.memory_space<vmem>>, vector<1x512xf32>
    %361 = vector.broadcast %360 : vector<1x512xf32> to vector<16x512xf32>
    %362 = arith.mulf %359, %361 : vector<16x512xf32>
    %363 = tpu.concatenate %334, %338, %342, %346, %330, %350, %354, %358, %362 in 0 : vector<16x512xf32>, vector<16x512xf32>, vector<16x512xf32>, vector<16x512xf32>, vector<16x512xf32>, vector<16x512xf32>, vector<16x512xf32>, vector<16x512xf32>, vector<16x512xf32> -> vector<144x512xf32>
    %364 = arith.truncf %363 : vector<144x512xf32> to vector<144x512xbf16>
    %c128 = arith.constant 128 : index
    %c0_246 = arith.constant 0 : index
    %365 = vector.load %arg2[%c128, %c0_246] : memref<144x144xbf16, #tpu.memory_space<vmem>>, vector<16x144xbf16>
    %cst_247 = arith.constant dense<0.000000e+00> : vector<16x512xf32>
    %366 = tpu.matmul %365, %364, %cst_247 {dimension_numbers = #tpu.dot_dimension_numbers<[1], [0], [0], [1], [0, 0, 1, 1], [], []>} : vector<16x144xbf16>, vector<144x512xbf16>, vector<16x512xf32> -> vector<16x512xf32>
    %c128_248 = arith.constant 128 : index
    %c0_249 = arith.constant 0 : index
    %367 = vector.load %arg3[%c128_248, %c0_249] : memref<144x1xf32, #tpu.memory_space<vmem>>, vector<16x1xf32>
    %368 = vector.broadcast %367 : vector<16x1xf32> to vector<16x512xf32>
    %369 = arith.addf %366, %368 : vector<16x512xf32>
    %c2_250 = arith.constant 2 : index
    %c0_251 = arith.constant 0 : index
    %c0_252 = arith.constant 0 : index
    %370 = vector.load %arg4[%c2_250, %c0_251, %c0_252] : memref<3x16x512xf32, #tpu.memory_space<vmem>>, vector<1x16x512xf32>
    %371 = vector.shape_cast %370 : vector<1x16x512xf32> to vector<16x512xf32>
    %372 = vector.shape_cast %369 : vector<16x512xf32> to vector<1x16x512xf32>
    tpu.vector_store %arg4[%c2_250, %c0_251, %c0_252], %372 {strides = array<i32>} : memref<3x16x512xf32, #tpu.memory_space<vmem>>, vector<1x16x512xf32>,
    return
  }
}

</mosaic_0001>

<bundles_post_ra>
// kernel: ssd_forward_pallas.1
= control target key start
LH: loop header
LB: loop body
LE: loop exit
PB: predicated region body
PF: predicated region fallthrough
CT: control target
= control target key end

     0   :  { %s3275_s21 = smov 111   ;;  %s3276_s22 = smov 113   ;;  %v30_v6 = vlaneseq  ;;  %vm278_vm1 = vcmask 1043456   ;;  %vm274_vm9 = vcmask 588800   ;;  %vm1364_vm10 = vcmask 130048   ;;  %s7430_s1 = inlined_call_operand.vmem [shape: f32[8,512], index: 1, kind: input, shape index: {}]   ;;  %s7431_s0 = inlined_call_operand.vmem [shape: f32[9,512], index: 0, kind: input, shape index: {}]   ;;  %s7432_s3 = inlined_call_operand.vmem [shape: f32[144,1], index: 3, kind: input, shape index: {}]   ;;  %s7433_s2 = inlined_call_operand.vmem [shape: bf16[144,144], index: 2, kind: input, shape index: {}]   ;;  %s7434_s4 = inlined_call_operand.vmem [shape: f32[3,16,512], index: 4, kind: output, shape index: {}]  }
   0x1   :  { %v3312_v0 = vld [vmem:[%s7430_s1 + $0x18] sm:$0xff]  ;;  %v3317_v1 = vld [vmem:[%s7430_s1 + $0x10] sm:$0xff]  ;;  %v3322_v2 = vld [vmem:[%s7430_s1] sm:$0xff]  ;;  %s3277_s23 = smov 112   ;;  %s3278_s26 = smov 127  }
   0x2   :  { %225 = vrot.lane.b32.xlu1 %v3312_v0, %s3275_s21  ;;  %167 = vrot.lane.b32.xlu2 %v3317_v1, %s3276_s22  ;;  %v3345_v3 = vld [vmem:[%s7430_s1 + $0x8] sm:$0xff]  ;;  %s3279_s1 = smov 15   ;;  %s3280_s27 = smov 1   ;;  %v3395_v7 = vand.u32 127, %v30_v6 }
   0x3   :  { %219 = vrot.lane.b32.xlu0 %v3322_v2, %s3275_s21  ;;  %s3281_s28 = smov 17   ;;  %s3282_s29 = smov 16   ;;  %v3136_v8 = vld [vmem:[%s7431_s0 + $0x20] ss:$8 sm:$0xf] }
   0x4   :  { %vm227_vm0 = vcmp.lt.s32.totalorder %v3395_v7, 111  ;;  %v3401_v10 = vperm.slane %v3136_v8, 3  ;;  %v3407_v17 = vperm.slane %v3136_v8, 2  ;;  %v3134_v23 = vld [vmem:[%s7431_s0 + $0x6] ss:$8 sm:$0xf] }
   0x5   :  { %v3135_v24 = vld [vmem:[%s7431_s0 + $0x7] ss:$8 sm:$0xf]  ;;  %vm171_vm2 = vcmp.lt.s32.totalorder %v3395_v7, 113  ;;  %vm199_vm3 = vcmp.lt.s32.totalorder %v3395_v7, 112  ;;  %v3422_v26 = vperm.slane %v3134_v23, 2 }
   0x6   :  { %v3424_v27 = vperm.slane %v3135_v24, 2  ;;  %v3430_v30 = vperm.slane %v3134_v23, 3  ;;  %v3432_v31 = vperm.slane %v3135_v24, 3  ;;  %v3444_v44 = vperm.slane %v3136_v8, 0 }
   0x7   :  { %v3446_v45 = vperm.slane %v3136_v8, 1  ;;  %v3458_v53 = vperm.slane %v3135_v24, 0  ;;  %v3133_v54 = vld [vmem:[%s7431_s0 + $0x5] ss:$8 sm:$0xf]  ;;  %vm143_vm4 = vcmp.lt.s32.totalorder %v3395_v7, 127 }
   0x8   :  { %7650 = vst [vmem:[#allocation2_spill] sm:$0xff] %v3430_v30  ;;  %v3464_v57 = vperm.slane %v3135_v24, 1  ;;  %v3470_v60 = vperm.slane %v3134_v23, 0  ;;  %v3472_v61 = vperm.slane %v3134_v23, 1  ;;  %v3478_v6 = vperm.slane %v3133_v54, 3 }
   0x9   :  { %vm87_vm5 = vcmp.lt.s32.totalorder %v3395_v7, 15  ;;  %vm115_vm6 = vcmp.lt.s32.totalorder %v3395_v7, 1  ;;  %vm32_vm7 = vcmp.lt.s32.totalorder %v3395_v7, 17  ;;  %vm59_vm8 = vcmp.lt.s32.totalorder %v3395_v7, 16 }
   0xa   :  { %169 = vrot.lane.b32.xlu2 %v3312_v0, %s3276_s22  ;;  %163 = vrot.lane.b32.xlu1 %v3322_v2, %s3276_s22  ;;  %7651 = vst [vmem:[#allocation3_spill] sm:$0xff] %v3478_v6 }
   0xb   :  { %223 = vrot.lane.b32.xlu0 %v3317_v1, %s3275_s21 }
  0x12   :  { %197 = vrot.lane.b32.xlu2 %v3312_v0, %s3277_s23  ;;  %195 = vrot.lane.b32.xlu1 %v3317_v1, %s3277_s23 }
  0x13   :  { %191 = vrot.lane.b32.xlu0 %v3322_v2, %s3277_s23 }
  0x1a   :  { %139 = vrot.lane.b32.xlu2 %v3317_v1, %s3278_s26  ;;  %135 = vrot.lane.b32.xlu1 %v3322_v2, %s3278_s26 }
  0x1b   :  { %221 = vrot.lane.b32.xlu0 %v3345_v3, %s3275_s21 }
  0x22   :  { %193 = vrot.lane.b32.xlu2 %v3345_v3, %s3277_s23  ;;  %165 = vrot.lane.b32.xlu1 %v3345_v3, %s3276_s22 }
  0x23   :  { %141 = vrot.lane.b32.xlu0 %v3312_v0, %s3278_s26 }
  0x2a   :  { %85 = vrot.lane.b32.xlu2 %v3312_v0, %s3279_s1  ;;  %83 = vrot.lane.b32.xlu1 %v3317_v1, %s3279_s1 }
  0x2b   :  { %81 = vrot.lane.b32.xlu0 %v3345_v3, %s3279_s1 }
  0x32   :  { %113 = vrot.lane.b32.xlu2 %v3312_v0, %s3280_s27  ;;  %111 = vrot.lane.b32.xlu1 %v3317_v1, %s3280_s27 }
  0x33   :  { %109 = vrot.lane.b32.xlu0 %v3345_v3, %s3280_s27 }
  0x3a   :  { %26 = vrot.lane.b32.xlu2 %v3317_v1, %s3281_s28  ;;  %24 = vrot.lane.b32.xlu1 %v3345_v3, %s3281_s28 }
  0x3b   :  { %137 = vrot.lane.b32.xlu0 %v3345_v3, %s3278_s26 }
  0x42   :  { %55 = vrot.lane.b32.xlu2 %v3317_v1, %s3282_s29  ;;  %53 = vrot.lane.b32.xlu1 %v3345_v3, %s3282_s29 }
  0x43   :  { %28 = vrot.lane.b32.xlu0 %v3312_v0, %s3281_s28 }
  0x4a   :  { %107 = vrot.lane.b32.xlu2 %v3322_v2, %s3280_s27  ;;  %79 = vrot.lane.b32.xlu1 %v3322_v2, %s3279_s1 }
  0x4b   :  { %57 = vrot.lane.b32.xlu0 %v3312_v0, %s3282_s29 }
  0x52   :  { %51 = vrot.lane.b32.xlu1 %v3322_v2, %s3282_s29 }
  0x53   :  { %22 = vrot.lane.b32.xlu0 %v3322_v2, %s3281_s28 }
  0x5c   :  { %v3393_v4 = vpop.permute.xlu2 %167 }
  0x64   :  { %v170_v5 = vpop.permute.xlu2 %169 }
  0x65   :  { %v172_v28 = vsel %vm171_vm2, %v3393_v4, %v170_v5 }
  0x66   :  { %v189_v38 = vmul.f32 %v3422_v26, %v172_v28 }
  0x6c   :  { %v198_v9 = vpop.permute.xlu2 %197 }
  0x74   :  { %v226_v11 = vpop.permute.xlu1 %225  ;;  %v3409_v18 = vpop.permute.xlu2 %139 }
  0x75   :  { %v220_v12 = vpop.permute.xlu0 %219 }
  0x76   :  { %v231_v13 = vsel %vm227_vm0, %v226_v11, %v220_v12 }
  0x77   :  { %v246_v14 = vmul.f32 %v3401_v10, %v231_v13 }
  0x79   :  { %v266_v15 = vpack.c.bf16 %v246_v14, %v246_v14 }
  0x7b   :  { %v289_v16 = vsel %vm278_vm1, %v266_v15, 0 }
  0x7c   :  { %333 = vmatpush.bf16.msra.mxu3 %v289_v16  ;;  %v164_v19 = vpop.permute.xlu1 %163  ;;  %v194_v36 = vpop.permute.xlu2 %193 }
  0x7d   :  { %v224_v20 = vpop.permute.xlu0 %223  ;;  %v175_v32 = vsel %vm171_vm2, %v170_v5, %v164_v19  ;;  %v3476_v5 = vperm.slane %v3133_v54, 2 }
  0x7e   :  { %v228_v21 = vsel %vm227_vm0, %v224_v20, %v226_v11  ;;  %v190_v40 = vmul.f32 %v3430_v30, %v175_v32 }
  0x7f   :  { %v245_v22 = vmul.f32 %v3407_v17, %v228_v21 }
  0x81   :  { %v265_v25 = vpack.c.bf16 %v245_v22, %v245_v22 }
  0x83   :  { %v286_v29 = vsel %vm278_vm1, %v265_v25, 0 }
  0x84   :  { %320 = vmatpush.bf16.msra.mxu2 %v286_v29  ;;  %v196_v33 = vpop.permute.xlu1 %195  ;;  %v3456_v52 = vpop.permute.xlu2 %85 }
  0x85   :  { %v200_v34 = vsel %vm199_vm3, %v196_v33, %v198_v9  ;;  %v192_v35 = vpop.permute.xlu0 %191  ;;  %v201_v58 = vsel %vm199_vm3, %v194_v36, %v196_v33  ;;  %v3131_v33 = vld [vmem:[%s7431_s0 + $0x2] ss:$8 sm:$0xf] }
  0x86   :  { %v203_v37 = vsel %vm199_vm3, %v198_v9, %v192_v35  ;;  %v217_v39 = vmul.f32 %v3424_v27, %v200_v34  ;;  %v202_v59 = vsel %vm199_vm3, %v192_v35, %v194_v36  ;;  %v216_v14 = vmul.f32 %v3464_v57, %v201_v58  ;;  %v3132_v34 = vld [vmem:[%s7431_s0 + $0x3] ss:$8 sm:$0xf] }
  0x87   :  { %v218_v41 = vmul.f32 %v3432_v31, %v203_v37  ;;  %v215_v13 = vmul.f32 %v3458_v53, %v202_v59  ;;  %v3518_v36 = vperm.slane %v3131_v33, 2  ;;  %v3520_v37 = vperm.slane %v3132_v34, 2 }
  0x88   :  { %v261_v42 = vpack.c.bf16 %v217_v39, %v189_v38  ;;  %v3536_v58 = vperm.slane %v3133_v54, 1 }
  0x89   :  { %v262_v43 = vpack.c.bf16 %v218_v41, %v190_v40 }
  0x8a   :  { %321 = vmatpush.bf16.msra.mxu2 %v261_v42 }
  0x8b   :  { %334 = vmatpush.bf16.msra.mxu3 %v262_v43 }
  0x8c   :  { %v3448_v46 = vpop.permute.xlu1 %135  ;;  %v3499_v28 = vpop.permute.xlu2 %113 }
  0x8d   :  { %v222_v47 = vpop.permute.xlu0 %221 }
  0x8e   :  { %v230_v48 = vsel %vm227_vm0, %v220_v12, %v222_v47  ;;  %v229_v49 = vsel %vm227_vm0, %v222_v47, %v224_v20 }
  0x8f   :  { %v243_v50 = vmul.f32 %v3444_v44, %v230_v48  ;;  %v244_v51 = vmul.f32 %v3446_v45, %v229_v49 }
  0x91   :  { %v263_v55 = vpack.c.bf16 %v243_v50, %v243_v50  ;;  %v264_v56 = vpack.c.bf16 %v244_v51, %v244_v51 }
  0x93   :  { %v280_v62 = vsel %vm278_vm1, %v263_v55, 0  ;;  %v283_v63 = vsel %vm278_vm1, %v264_v56, 0  ;;  %v3534_v56 = vperm.slane %v3133_v54, 0 }
  0x94   :  { %294 = vmatpush.bf16.msra.mxu0 %v280_v62  ;;  %307 = vmatpush.bf16.msra.mxu1 %v283_v63  ;;  %v166_v8 = vpop.permute.xlu1 %165  ;;  %v27_v38 = vpop.permute.xlu2 %26 }
  0x95   :  { %v173_v9 = vsel %vm171_vm2, %v166_v8, %v3393_v4  ;;  %v174_v11 = vsel %vm171_vm2, %v164_v19, %v166_v8  ;;  %v142_v12 = vpop.permute.xlu0 %141 }
  0x96   :  { %v144_v15 = vsel %vm143_vm4, %v3409_v18, %v142_v12  ;;  %v147_v16 = vsel %vm143_vm4, %v142_v12, %v3448_v46  ;;  %v187_v20 = vmul.f32 %v3470_v60, %v174_v11  ;;  %v188_v4 = vmul.f32 %v3472_v61, %v173_v9  ;;  %v268_v11 = vld [vmem:[%s7432_s3] sm:$0xff] }
  0x97   :  { %v161_v21 = vmul.f32 %v3476_v5, %v144_v15  ;;  %v162_v19 = vmul.f32 %v3478_v6, %v147_v16 }
  0x98   :  { %v259_v22 = vpack.c.bf16 %v215_v13, %v187_v20  ;;  %v260_v23 = vpack.c.bf16 %v216_v14, %v188_v4  ;;  %v37_v13 = vld [vmem:[%s7431_s0] ss:$8 sm:$0xf]  ;;  %v3283_v14 = vmov 0  }
  0x99   :  { %v257_v24 = vpack.c.bf16 %v161_v21, %v3317_v1  ;;  %v258_v25 = vpack.c.bf16 %v162_v19, %v3312_v0  ;;  %v3511_v0 = vperm.slane %v3131_v33, 3  ;;  %v3513_v1 = vperm.slane %v3132_v34, 3  ;;  %3272 = vset.pattern.permute.xlu2 %v3283_v14  ;;  %3273 = vset.pattern.permute.xlu0 %v3283_v14 }
  0x9a   :  { %295 = vmatpush.bf16.msra.mxu0 %v259_v22  ;;  %308 = vmatpush.bf16.msra.mxu1 %v260_v23  ;;  %v3561_v16 = vperm.slane %v37_v13, 2 }
  0x9b   :  { %322 = vmatpush.bf16.msra.mxu2 %v257_v24  ;;  %335 = vmatpush.bf16.msra.mxu3 %v258_v25  ;;  %v3572_v25 = vperm.slane %v3132_v34, 0 }
  0x9c   :  { %v84_v29 = vpop.permute.xlu1 %83  ;;  %v56_v63 = vpop.permute.xlu2 %55  ;;  %271 = vperm.xlu2 %3272, %v268_v11   ;;  %3274 = vset.pattern.permute.xlu1 %v3283_v14  ;;  %v3615_v14 = vperm.slane %v37_v13, 1 }
  0x9d   :  { %v3501_v32 = vpop.permute.xlu0 %81  ;;  %v88_v35 = vsel %vm87_vm5, %v84_v29, %v3456_v52 }
  0x9e   :  { %v89_v39 = vsel %vm87_vm5, %v3501_v32, %v84_v29  ;;  %v106_v47 = vmul.f32 %v3511_v0, %v88_v35  ;;  %v3577_v35 = vperm.slane %v3131_v33, 0 }
  0x9f   :  { %v105_v49 = vmul.f32 %v3518_v36, %v89_v39  ;;  %v3579_v39 = vperm.slane %v3131_v33, 1 }
  0xa4   :  { %v112_v40 = vpop.permute.xlu1 %111  ;;  %v108_v23 = vpop.permute.xlu2 %107 }
  0xa5   :  { %v116_v41 = vsel %vm115_vm6, %v112_v40, %v3499_v28  ;;  %v110_v42 = vpop.permute.xlu0 %109  ;;  %v119_v29 = vsel %vm115_vm6, %v3499_v28, %v108_v23  ;;  %v267_v28 = vld [vmem:[%s7433_s2] sm:$0xf] }
  0xa6   :  { %v117_v43 = vsel %vm115_vm6, %v110_v42, %v112_v40  ;;  %v134_v48 = vmul.f32 %v3513_v1, %v116_v41  ;;  %v3581_v40 = vperm.slane %v3132_v34, 1  ;;  %v118_v41 = vsel %vm115_vm6, %v108_v23, %v110_v42 }
  0xa7   :  { %v133_v50 = vmul.f32 %v3520_v37, %v117_v43  ;;  %v3585_v43 = vperm.slane %v37_v13, 3 }
  0xa8   :  { %v254_v51 = vpack.c.bf16 %v134_v48, %v106_v47 }
  0xa9   :  { %v253_v55 = vpack.c.bf16 %v133_v50, %v105_v49  ;;  %v131_v50 = vmul.f32 %v3572_v25, %v119_v29 }
  0xaa   :  { %336 = vmatpush.bf16.msra.mxu3 %v254_v51 }
  0xab   :  { %323 = vmatpush.bf16.msra.mxu2 %v253_v55 }
  0xac   :  { %v3538_v59 = vpop.permute.xlu1 %24 }
  0xad   :  { %v138_v62 = vpop.permute.xlu0 %137  ;;  %v34_v4 = vsel %vm32_vm7, %v3538_v59, %v27_v38 }
  0xae   :  { %v145_v8 = vsel %vm143_vm4, %v138_v62, %v3409_v18  ;;  %v146_v9 = vsel %vm143_vm4, %v3448_v46, %v138_v62  ;;  %v3130_v18 = vld [vmem:[%s7431_s0 + $0x1] ss:$8 sm:$0xf]  ;;  %v132_v62 = vmul.f32 %v3581_v40, %v118_v41 }
  0xaf   :  { %v159_v12 = vmul.f32 %v3534_v56, %v146_v9  ;;  %v160_v54 = vmul.f32 %v3536_v58, %v145_v8  ;;  %v3563_v20 = vperm.slane %v3130_v18, 2  ;;  %v3587_v47 = vperm.slane %v3130_v18, 3 }
  0xb1   :  { %v255_v46 = vpack.c.bf16 %v159_v12, %v3322_v2  ;;  %v256_v15 = vpack.c.bf16 %v160_v54, %v3345_v3  ;;  %v49_v2 = vmul.f32 %v3561_v16, %v34_v4  ;;  %v3609_v12 = vperm.slane %v3130_v18, 0 }
  0xb2   :  { %v3611_v54 = vperm.slane %v3130_v18, 1 }
  0xb3   :  { %296 = vmatpush.bf16.msra.mxu0 %v255_v46  ;;  %309 = vmatpush.bf16.msra.mxu1 %v256_v15 }
  0xb4   :  { %v54_v21 = vpop.permute.xlu1 %53 }
  0xb5   :  { %v61_v19 = vsel %vm59_vm8, %v54_v21, %v56_v63  ;;  %v29_v22 = vpop.permute.xlu0 %28 }
  0xb6   :  { %v77_v3 = vmul.f32 %v3563_v20, %v61_v19  ;;  %v33_v48 = vsel %vm32_vm7, %v27_v38, %v29_v22 }
  0xb8   :  { %v249_v24 = vpack.c.bf16 %v77_v3, %v49_v2 }
  0xba   :  { %324 = vmatpush.bf16.msra.mxu2 %v249_v24 }
  0xbc   :  { %v80_v49 = vpop.permute.xlu1 %79 }
  0xbd   :  { %v90_v33 = vsel %vm87_vm5, %v80_v49, %v3501_v32  ;;  %v91_v34 = vsel %vm87_vm5, %v3456_v52, %v80_v49  ;;  %v58_v42 = vpop.permute.xlu0 %57  ;;  %3139 = vmatmul.msk.bf16.vlgmr.msra.gmra.mxu2 %vm274_vm9, %v267_v28  ;;  %v50_v32 = vmul.f32 %v3585_v43, %v33_v48 }
  0xbe   :  { %v60_v38 = vsel %vm59_vm8, %v56_v63, %v58_v42  ;;  %v103_v51 = vmul.f32 %v3577_v35, %v91_v34  ;;  %v104_v55 = vmul.f32 %v3579_v39, %v90_v33  ;;  %v3613_v63 = vperm.slane %v37_v13, 0 }
  0xbf   :  { %v78_v8 = vmul.f32 %v3587_v47, %v60_v38 }
  0xc0   :  { %v251_v9 = vpack.c.bf16 %v131_v50, %v103_v51  ;;  %v252_v52 = vpack.c.bf16 %v132_v62, %v104_v55 }
  0xc1   :  { %v250_v11 = vpack.c.bf16 %v78_v8, %v50_v32 }
  0xc2   :  { %297 = vmatpush.bf16.msra.mxu0 %v251_v9  ;;  %310 = vmatpush.bf16.msra.mxu1 %v252_v52  ;;  %v496_v52 = vld [vmem:[%s7432_s3 + $0x10] sm:$0xff] }
  0xc3   :  { %337 = vmatpush.bf16.msra.mxu3 %v250_v11 }
  0xc4   :  { %v52_v46 = vpop.permute.xlu1 %51 }
  0xc5   :  { %v62_v15 = vsel %vm59_vm8, %v52_v46, %v54_v21  ;;  %v63_v4 = vsel %vm59_vm8, %v58_v42, %v52_v46  ;;  %v23_v19 = vpop.permute.xlu0 %22 }
  0xc6   :  { %v35_v2 = vsel %vm32_vm7, %v23_v19, %v3538_v59  ;;  %v36_v18 = vsel %vm32_vm7, %v29_v22, %v23_v19  ;;  %3140 = vmatmul.msk.bf16.vlgmr.msra.gmra.mxu3 %vm274_vm9, %v267_v28  ;;  %v75_v13 = vmul.f32 %v3609_v12, %v63_v4  ;;  %v76_v3 = vmul.f32 %v3611_v54, %v62_v15 }
  0xc7   :  { %v47_v23 = vmul.f32 %v3613_v63, %v36_v18  ;;  %v48_v21 = vmul.f32 %v3615_v14, %v35_v2 }
  0xc9   :  { %v247_v24 = vpack.c.bf16 %v75_v13, %v47_v23  ;;  %v248_v29 = vpack.c.bf16 %v76_v3, %v48_v21 }
  0xcb   :  { %298 = vmatpush.bf16.msra.mxu0 %v247_v24  ;;  %311 = vmatpush.bf16.msra.mxu1 %v248_v29 }
  0xce   :  { %3137 = vmatmul.msk.bf16.vlgmr.msra.gmra.mxu0 %vm274_vm9, %v267_v28  ;;  %3138 = vmatmul.msk.bf16.vlgmr.msra.gmra.mxu1 %vm274_vm9, %v267_v28 }
  0xf6   :  { %v272_v22 = vpop.permute.xlu2 %271 }
 0x140   :  { %v326_v59 = vpop.f32.mrf.mxu2 }
 0x141   :  { %v327_v8 = vadd.f32 %v326_v59, %v272_v22 }
 0x143   :  { %v3663_v9 = vmax.f32 %v327_v8, 0.0 }
 0x148   :  { %v328_v41 = vpop.f32.mrf.mxu2 }
 0x149   :  { %v339_v48 = vpop.f32.mrf.mxu3 }
 0x14a   :  { %v340_v49 = vadd.f32 %v339_v48, %v272_v22 }
 0x14b   :  { %v300_v33 = vpop.f32.mrf.mxu0  ;;  %v313_v34 = vpop.f32.mrf.mxu1 }
 0x14c   :  { %v3633_v42 = vmax.f32 %v340_v49, 0.0  ;;  %v301_v50 = vadd.f32 %v300_v33, %v272_v22  ;;  %v314_v38 = vadd.f32 %v313_v34, %v272_v22 }
 0x14e   :  { %v3635_v51 = vmax.f32 %v301_v50, 0.0  ;;  %v3637_v55 = vmax.f32 %v314_v38, 0.0  ;;  %465 = vrot.lane.b32.xlu2 %v3633_v42, %s3275_s21 }
 0x150   :  { %381 = vrot.lane.b32.xlu1 %v3637_v55, %s3279_s1  ;;  %459 = vrot.lane.b32.xlu0 %v3635_v51, %s3275_s21 }
 0x151   :  { %v341_v28 = vpop.f32.mrf.mxu3 }
 0x153   :  { %v302_v62 = vpop.f32.mrf.mxu0  ;;  %v315_v32 = vpop.f32.mrf.mxu1 }
 0x156   :  { %433 = vrot.lane.b32.xlu2 %v3633_v42, %s3276_s22 }
 0x158   :  { %397 = vrot.lane.b32.xlu1 %v3637_v55, %s3280_s27  ;;  %427 = vrot.lane.b32.xlu0 %v3635_v51, %s3276_s22 }
 0x15e   :  { %449 = vrot.lane.b32.xlu2 %v3633_v42, %s3277_s23 }
 0x160   :  { %349 = vrot.lane.b32.xlu1 %v3637_v55, %s3281_s28  ;;  %443 = vrot.lane.b32.xlu0 %v3635_v51, %s3277_s23 }
 0x166   :  { %445 = vrot.lane.b32.xlu2 %v3637_v55, %s3277_s23 }
 0x168   :  { %365 = vrot.lane.b32.xlu1 %v3637_v55, %s3282_s29  ;;  %411 = vrot.lane.b32.xlu0 %v3635_v51, %s3278_s26 }
 0x16e   :  { %417 = vrot.lane.b32.xlu2 %v3633_v42, %s3278_s26 }
 0x170   :  { %463 = vrot.lane.b32.xlu1 %v3663_v9, %s3275_s21  ;;  %461 = vrot.lane.b32.xlu0 %v3637_v55, %s3275_s21 }
 0x176   :  { %383 = vrot.lane.b32.xlu2 %v3663_v9, %s3279_s1 }
 0x178   :  { %431 = vrot.lane.b32.xlu1 %v3663_v9, %s3276_s22  ;;  %385 = vrot.lane.b32.xlu0 %v3633_v42, %s3279_s1 }
 0x17e   :  { %399 = vrot.lane.b32.xlu2 %v3663_v9, %s3280_s27 }
 0x180   :  { %447 = vrot.lane.b32.xlu1 %v3663_v9, %s3277_s23  ;;  %401 = vrot.lane.b32.xlu0 %v3633_v42, %s3280_s27 }
 0x186   :  { %351 = vrot.lane.b32.xlu2 %v3663_v9, %s3281_s28 }
 0x188   :  { %415 = vrot.lane.b32.xlu1 %v3663_v9, %s3278_s26  ;;  %353 = vrot.lane.b32.xlu0 %v3633_v42, %s3281_s28 }
 0x18e   :  { %367 = vrot.lane.b32.xlu2 %v3663_v9, %s3282_s29 }
 0x190   :  { %429 = vrot.lane.b32.xlu1 %v3637_v55, %s3276_s22  ;;  %369 = vrot.lane.b32.xlu0 %v3633_v42, %s3282_s29 }
 0x196   :  { %395 = vrot.lane.b32.xlu2 %v3635_v51, %s3280_s27 }
 0x198   :  { %379 = vrot.lane.b32.xlu1 %v3635_v51, %s3279_s1  ;;  %413 = vrot.lane.b32.xlu0 %v3637_v55, %s3278_s26 }
 0x19e   :  { %499 = vperm.xlu2 %3272, %v496_v52  }
 0x1a0   :  { %363 = vrot.lane.b32.xlu1 %v3635_v51, %s3282_s29  ;;  %347 = vrot.lane.b32.xlu0 %v3635_v51, %s3281_s28 }
 0x1a8   :  { %v466_v11 = vpop.permute.xlu2 %465 }
 0x1b0   :  { %v434_v46 = vpop.permute.xlu2 %433 }
 0x1b8   :  { %v450_v15 = vpop.permute.xlu2 %449 }
 0x1c0   :  { %v3714_v23 = vpop.permute.xlu2 %445 }
 0x1c2   :  { %v3708_v4 = vpop.permute.xlu1 %381  ;;  %v460_v19 = vpop.permute.xlu0 %459 }
 0x1c3   :  { %v470_v2 = vsel %vm227_vm0, %v466_v11, %v460_v19 }
 0x1c4   :  { %v474_v18 = vmul.f32 %v470_v2, %v3401_v10 }
 0x1c6   :  { %v494_v13 = vpack.c.bf16 %v474_v18, %v474_v18 }
 0x1c8   :  { %v515_v3 = vsel %vm278_vm1, %v494_v13, 0  ;;  %v418_v41 = vpop.permute.xlu2 %417 }
 0x1c9   :  { %559 = vmatpush.bf16.msrb.mxu3 %v515_v3 }
 0x1ca   :  { %v3716_v21 = vpop.permute.xlu1 %397  ;;  %v3718_v24 = vpop.permute.xlu0 %427 }
 0x1cb   :  { %v438_v29 = vsel %vm171_vm2, %v434_v46, %v3718_v24 }
 0x1cc   :  { %v442_v49 = vmul.f32 %v438_v29, %v3430_v30 }
 0x1d0   :  { %v384_v32 = vpop.permute.xlu2 %383 }
 0x1d2   :  { %v3723_v59 = vpop.permute.xlu1 %349  ;;  %v444_v22 = vpop.permute.xlu0 %443 }
 0x1d3   :  { %v454_v48 = vsel %vm199_vm3, %v450_v15, %v444_v22 }
 0x1d4   :  { %v458_v33 = vmul.f32 %v454_v48, %v3432_v31 }
 0x1d6   :  { %v490_v34 = vpack.c.bf16 %v458_v33, %v442_v49 }
 0x1d8   :  { %560 = vmatpush.bf16.msrb.mxu3 %v490_v34 }
 0x1da   :  { %v3729_v50 = vpop.permute.xlu1 %365  ;;  %v3731_v38 = vpop.permute.xlu0 %411 }
 0x1db   :  { %v422_v28 = vsel %vm143_vm4, %v418_v41, %v3731_v38 }
 0x1dc   :  { %v426_v62 = vmul.f32 %v422_v28, %v3478_v6  ;;  %v400_v28 = vpop.permute.xlu2 %399 }
 0x1de   :  { %v486_v8 = vpack.c.bf16 %v426_v62, %v3633_v42 }
 0x1e0   :  { %561 = vmatpush.bf16.msrb.mxu3 %v486_v8 }
 0x1e2   :  { %v464_v52 = vpop.permute.xlu1 %463  ;;  %v462_v2 = vpop.permute.xlu0 %461 }
 0x1e3   :  { %v467_v18 = vsel %vm227_vm0, %v464_v52, %v466_v11  ;;  %v468_v13 = vsel %vm227_vm0, %v462_v2, %v464_v52  ;;  %v469_v3 = vsel %vm227_vm0, %v460_v19, %v462_v2 }
 0x1e4   :  { %v471_v29 = vmul.f32 %v469_v3, %v3444_v44  ;;  %v472_v48 = vmul.f32 %v468_v13, %v3446_v45  ;;  %v473_v49 = vmul.f32 %v467_v18, %v3407_v17  ;;  %v352_v2 = vpop.permute.xlu2 %351 }
 0x1e6   :  { %v491_v33 = vpack.c.bf16 %v471_v29, %v471_v29  ;;  %v492_v42 = vpack.c.bf16 %v472_v48, %v472_v48  ;;  %v493_v34 = vpack.c.bf16 %v473_v49, %v473_v49 }
 0x1e8   :  { %v506_v62 = vsel %vm278_vm1, %v491_v33, 0  ;;  %v509_v11 = vsel %vm278_vm1, %v492_v42, 0  ;;  %v512_v8 = vsel %vm278_vm1, %v493_v34, 0 }
 0x1e9   :  { %520 = vmatpush.bf16.msrb.mxu0 %v506_v62  ;;  %533 = vmatpush.bf16.msrb.mxu1 %v509_v11 }
 0x1ea   :  { %546 = vmatpush.bf16.msrb.mxu2 %v512_v8  ;;  %v432_v19 = vpop.permute.xlu1 %431  ;;  %v386_v52 = vpop.permute.xlu0 %385 }
 0x1eb   :  { %v435_v13 = vsel %vm171_vm2, %v432_v19, %v434_v46  ;;  %v387_v18 = vsel %vm87_vm5, %v384_v32, %v386_v52 }
 0x1ec   :  { %v441_v33 = vmul.f32 %v435_v13, %v3422_v26  ;;  %v394_v34 = vmul.f32 %v387_v18, %v3511_v0  ;;  %v368_v30 = vpop.permute.xlu2 %367  ;;  %v388_v18 = vsel %vm87_vm5, %v3708_v4, %v384_v32  ;;  %v356_v32 = vsel %vm32_vm7, %v3723_v59, %v352_v2 }
 0x1f2   :  { %v448_v3 = vpop.permute.xlu1 %447  ;;  %v3754_v29 = vpop.permute.xlu0 %401 }
 0x1f3   :  { %v451_v48 = vsel %vm199_vm3, %v448_v3, %v450_v15  ;;  %v403_v49 = vsel %vm115_vm6, %v400_v28, %v3754_v29  ;;  %v404_v15 = vsel %vm115_vm6, %v3716_v21, %v400_v28  ;;  %v372_v28 = vsel %vm59_vm8, %v3729_v50, %v368_v30 }
 0x1f4   :  { %v457_v42 = vmul.f32 %v451_v48, %v3424_v27  ;;  %v410_v46 = vmul.f32 %v403_v49, %v3513_v1 }
 0x1f6   :  { %v489_v62 = vpack.c.bf16 %v457_v42, %v441_v33  ;;  %v482_v11 = vpack.c.bf16 %v410_v46, %v394_v34  ;;  %v409_v33 = vmul.f32 %v404_v15, %v3520_v37  ;;  %v453_v42 = vsel %vm199_vm3, %v444_v22, %v3714_v23 }
 0x1f7   :  { %v393_v34 = vmul.f32 %v388_v18, %v3518_v36  ;;  %v377_v15 = vmul.f32 %v372_v28, %v3563_v20 }
 0x1f8   :  { %547 = vmatpush.bf16.msrb.mxu2 %v489_v62  ;;  %562 = vmatpush.bf16.msrb.mxu3 %v482_v11  ;;  %v455_v11 = vmul.f32 %v453_v42, %v3458_v53 }
 0x1f9   :  { %v481_v62 = vpack.c.bf16 %v409_v33, %v393_v34 }
 0x1fa   :  { %v416_v8 = vpop.permute.xlu1 %415  ;;  %v3765_v6 = vpop.permute.xlu0 %353 }
 0x1fb   :  { %v419_v13 = vsel %vm143_vm4, %v416_v8, %v418_v41  ;;  %v452_v41 = vsel %vm199_vm3, %v3714_v23, %v448_v3 }
 0x1fc   :  { %v425_v48 = vmul.f32 %v419_v13, %v3476_v5 }
 0x1fe   :  { %v485_v49 = vpack.c.bf16 %v425_v48, %v3663_v9  ;;  %v355_v9 = vsel %vm32_vm7, %v352_v2, %v3765_v6  ;;  %v456_v48 = vmul.f32 %v452_v41, %v3464_v57  ;;  %v495_v41 = vld [vmem:[%s7433_s2 + $0x10] sm:$0xf] }
 0x200   :  { %548 = vmatpush.bf16.msrb.mxu2 %v485_v49  ;;  %v362_v49 = vmul.f32 %v355_v9, %v3585_v43 }
 0x202   :  { %v430_v22 = vpop.permute.xlu1 %429  ;;  %v370_v46 = vpop.permute.xlu0 %369 }
 0x203   :  { %v436_v23 = vsel %vm171_vm2, %v430_v22, %v432_v19  ;;  %v437_v3 = vsel %vm171_vm2, %v3718_v24, %v430_v22  ;;  %v371_v13 = vsel %vm59_vm8, %v368_v30, %v370_v46  ;;  %v361_v19 = vmul.f32 %v356_v32, %v3561_v16  ;;  %v396_v30 = vpop.permute.xlu2 %395 }
 0x204   :  { %549 = vmatpush.bf16.msrb.mxu2 %v481_v62  ;;  %v439_v2 = vmul.f32 %v437_v3, %v3470_v60  ;;  %v440_v18 = vmul.f32 %v436_v23, %v3472_v61  ;;  %v378_v33 = vmul.f32 %v371_v13, %v3587_v47 }
 0x205   :  { %v477_v24 = vpack.c.bf16 %v377_v15, %v361_v19 }
 0x206   :  { %v487_v42 = vpack.c.bf16 %v455_v11, %v439_v2  ;;  %v488_v28 = vpack.c.bf16 %v456_v48, %v440_v18  ;;  %v478_v34 = vpack.c.bf16 %v378_v33, %v362_v49 }
 0x208   :  { %521 = vmatpush.bf16.msrb.mxu0 %v487_v42  ;;  %534 = vmatpush.bf16.msrb.mxu1 %v488_v28 }
 0x209   :  { %550 = vmatpush.bf16.msrb.mxu2 %v477_v24  ;;  %563 = vmatpush.bf16.msrb.mxu3 %v478_v34 }
 0x20a   :  { %v380_v22 = vpop.permute.xlu1 %379  ;;  %v414_v62 = vpop.permute.xlu0 %413 }
 0x20b   :  { %v389_v9 = vsel %vm87_vm5, %v380_v22, %v3708_v4  ;;  %v390_v32 = vsel %vm87_vm5, %v386_v52, %v380_v22  ;;  %v420_v11 = vsel %vm143_vm4, %v414_v62, %v416_v8  ;;  %v421_v15 = vsel %vm143_vm4, %v3731_v38, %v414_v62 }
 0x20c   :  { %3143 = vmatmul.msk.bf16.vlgmr.msrb.gmra.mxu2 %vm274_vm9, %v495_v41  ;;  %3144 = vmatmul.msk.bf16.vlgmr.msrb.gmra.mxu3 %vm274_vm9, %v495_v41  ;;  %v423_v23 = vmul.f32 %v421_v15, %v3534_v56  ;;  %v424_v3 = vmul.f32 %v420_v11, %v3536_v58  ;;  %v405_v4 = vsel %vm115_vm6, %v396_v30, %v3716_v21 }
 0x20d   :  { %v406_v52 = vsel %vm115_vm6, %v3754_v29, %v396_v30  ;;  %v391_v13 = vmul.f32 %v390_v32, %v3577_v35  ;;  %v392_v48 = vmul.f32 %v389_v9, %v3579_v39  ;;  %v408_v18 = vmul.f32 %v405_v4, %v3581_v40  ;;  %v500_v9 = vpop.permute.xlu2 %499 }
 0x20e   :  { %v483_v8 = vpack.c.bf16 %v423_v23, %v3635_v51  ;;  %v484_v38 = vpack.c.bf16 %v424_v3, %v3637_v55  ;;  %v407_v2 = vmul.f32 %v406_v52, %v3572_v25 }
 0x20f   :  { %v480_v19 = vpack.c.bf16 %v408_v18, %v392_v48 }
 0x210   :  { %522 = vmatpush.bf16.msrb.mxu0 %v483_v8  ;;  %535 = vmatpush.bf16.msrb.mxu1 %v484_v38  ;;  %v479_v33 = vpack.c.bf16 %v407_v2, %v391_v13  ;;  %v953_v2 = vld [vmem:[%s7432_s3 + $0x20] sm:$0xff] }
 0x212   :  { %v364_v49 = vpop.permute.xlu1 %363  ;;  %v348_v21 = vpop.permute.xlu0 %347 }
 0x213   :  { %v373_v51 = vsel %vm59_vm8, %v364_v49, %v3729_v50  ;;  %v374_v55 = vsel %vm59_vm8, %v370_v46, %v364_v49  ;;  %v357_v29 = vsel %vm32_vm7, %v348_v21, %v3723_v59  ;;  %v358_v42 = vsel %vm32_vm7, %v3765_v6, %v348_v21 }
 0x214   :  { %523 = vmatpush.bf16.msrb.mxu0 %v479_v33  ;;  %536 = vmatpush.bf16.msrb.mxu1 %v480_v19  ;;  %v359_v28 = vmul.f32 %v358_v42, %v3613_v63  ;;  %v375_v34 = vmul.f32 %v374_v55, %v3609_v12  ;;  %v360_v24 = vmul.f32 %v357_v29, %v3615_v14 }
 0x215   :  { %v376_v50 = vmul.f32 %v373_v51, %v3611_v54 }
 0x216   :  { %v475_v30 = vpack.c.bf16 %v375_v34, %v359_v28 }
 0x217   :  { %v476_v46 = vpack.c.bf16 %v376_v50, %v360_v24 }
 0x218   :  { %524 = vmatpush.bf16.msrb.mxu0 %v475_v30 }
 0x219   :  { %537 = vmatpush.bf16.msrb.mxu1 %v476_v46 }
 0x21b   :  { %3141 = vmatmul.msk.bf16.vlgmr.msrb.gmra.mxu0 %vm274_vm9, %v495_v41 }
 0x21c   :  { %3142 = vmatmul.msk.bf16.vlgmr.msrb.gmra.mxu1 %vm274_vm9, %v495_v41 }
 0x28f   :  { %v552_v59 = vpop.f32.mrf.mxu2  ;;  %v565_v6 = vpop.f32.mrf.mxu3 }
 0x290   :  { %v553_v8 = vadd.f32 %v552_v59, %v500_v9  ;;  %v566_v38 = vadd.f32 %v565_v6, %v500_v9 }
 0x292   :  { %v3889_v13 = vmax.f32 %v553_v8, 0.0  ;;  %v3891_v48 = vmax.f32 %v566_v38, 0.0 }
 0x294   :  { %7653 = vst [vmem:[#allocation5_spill] sm:$0xff] %v3891_v48 }
 0x297   :  { %v554_v22 = vpop.f32.mrf.mxu2  ;;  %v567_v62 = vpop.f32.mrf.mxu3 }
 0x298   :  { %v526_v32 = vpop.f32.mrf.mxu0 }
 0x299   :  { %v527_v11 = vadd.f32 %v526_v32, %v500_v9  ;;  %v539_v15 = vpop.f32.mrf.mxu1 }
 0x29a   :  { %v540_v4 = vadd.f32 %v539_v15, %v500_v9 }
 0x29b   :  { %v3855_v23 = vmax.f32 %v527_v11, 0.0 }
 0x29c   :  { %v3869_v52 = vmax.f32 %v540_v4, 0.0 }
 0x29d   :  { %7652 = vst [vmem:[#allocation4_spill] sm:$0xff] %v3855_v23  ;;  %669 = vrot.lane.b32.xlu1 %v3855_v23, %s3277_s23  ;;  %653 = vrot.lane.b32.xlu0 %v3855_v23, %s3276_s22 }
 0x29e   :  { %685 = vrot.lane.b32.xlu2 %v3855_v23, %s3275_s21 }
 0x2a0   :  { %v528_v41 = vpop.f32.mrf.mxu0 }
 0x2a1   :  { %v541_v3 = vpop.f32.mrf.mxu1 }
 0x2a5   :  { %637 = vrot.lane.b32.xlu1 %v3855_v23, %s3278_s26  ;;  %621 = vrot.lane.b32.xlu0 %v3855_v23, %s3280_s27 }
 0x2a6   :  { %605 = vrot.lane.b32.xlu2 %v3855_v23, %s3279_s1 }
 0x2ad   :  { %671 = vrot.lane.b32.xlu1 %v3869_v52, %s3277_s23  ;;  %687 = vrot.lane.b32.xlu0 %v3869_v52, %s3275_s21 }
 0x2ae   :  { %573 = vrot.lane.b32.xlu2 %v3855_v23, %s3281_s28 }
 0x2b5   :  { %639 = vrot.lane.b32.xlu1 %v3869_v52, %s3278_s26  ;;  %655 = vrot.lane.b32.xlu0 %v3869_v52, %s3276_s22 }
 0x2b6   :  { %623 = vrot.lane.b32.xlu2 %v3869_v52, %s3280_s27 }
 0x2bd   :  { %591 = vrot.lane.b32.xlu1 %v3869_v52, %s3282_s29  ;;  %607 = vrot.lane.b32.xlu0 %v3869_v52, %s3279_s1 }
 0x2be   :  { %575 = vrot.lane.b32.xlu2 %v3869_v52, %s3281_s28 }
 0x2c5   :  { %691 = vrot.lane.b32.xlu1 %v3891_v48, %s3275_s21  ;;  %689 = vrot.lane.b32.xlu0 %v3889_v13, %s3275_s21 }
 0x2c6   :  { %657 = vrot.lane.b32.xlu2 %v3889_v13, %s3276_s22 }
 0x2cd   :  { %673 = vrot.lane.b32.xlu1 %v3889_v13, %s3277_s23  ;;  %659 = vrot.lane.b32.xlu0 %v3891_v48, %s3276_s22 }
 0x2ce   :  { %675 = vrot.lane.b32.xlu2 %v3891_v48, %s3277_s23 }
 0x2d5   :  { %641 = vrot.lane.b32.xlu1 %v3889_v13, %s3278_s26  ;;  %625 = vrot.lane.b32.xlu0 %v3889_v13, %s3280_s27 }
 0x2d6   :  { %643 = vrot.lane.b32.xlu2 %v3891_v48, %s3278_s26 }
 0x2dd   :  { %609 = vrot.lane.b32.xlu1 %v3889_v13, %s3279_s1  ;;  %577 = vrot.lane.b32.xlu0 %v3889_v13, %s3281_s28 }
 0x2de   :  { %593 = vrot.lane.b32.xlu2 %v3889_v13, %s3282_s29 }
 0x2e5   :  { %611 = vrot.lane.b32.xlu1 %v3891_v48, %s3279_s1  ;;  %589 = vrot.lane.b32.xlu0 %v3855_v23, %s3282_s29 }
 0x2e6   :  { %627 = vrot.lane.b32.xlu2 %v3891_v48, %s3280_s27 }
 0x2ed   :  { %595 = vrot.lane.b32.xlu1 %v3891_v48, %s3282_s29  ;;  %579 = vrot.lane.b32.xlu0 %v3891_v48, %s3281_s28 }
 0x2ee   :  { %957 = vperm.xlu2 %3272, %v953_v2  }
 0x2f8   :  { %v686_v18 = vpop.permute.xlu2 %685 }
 0x300   :  { %v3930_v49 = vpop.permute.xlu2 %605 }
 0x308   :  { %v3932_v21 = vpop.permute.xlu2 %573 }
 0x30f   :  { %v670_v33 = vpop.permute.xlu1 %669  ;;  %v654_v19 = vpop.permute.xlu0 %653 }
 0x310   :  { %v3934_v51 = vpop.permute.xlu2 %623 }
 0x317   :  { %v638_v55 = vpop.permute.xlu1 %637  ;;  %v3936_v29 = vpop.permute.xlu0 %621 }
 0x318   :  { %v3938_v34 = vpop.permute.xlu2 %575 }
 0x31f   :  { %v672_v42 = vpop.permute.xlu1 %671  ;;  %v688_v28 = vpop.permute.xlu0 %687 }
 0x320   :  { %v3942_v24 = vsel %vm227_vm0, %v686_v18, %v688_v28  ;;  %v3949_v59 = vsel %vm199_vm3, %v670_v33, %v672_v42  ;;  %v658_v11 = vpop.permute.xlu2 %657 }
 0x321   :  { %v697_v50 = vmul.f32 %v3942_v24, %v3444_v44  ;;  %v681_v44 = vmul.f32 %v3949_v59, %v3458_v53 }
 0x323   :  { %v717_v30 = vpack.c.bf16 %v697_v50, %v697_v50 }
 0x325   :  { %v744_v46 = vsel %vm278_vm1, %v717_v30, 0 }
 0x326   :  { %758 = vmatpush.bf16.msra.mxu0 %v744_v46 }
 0x327   :  { %v640_v6 = vpop.permute.xlu1 %639  ;;  %v656_v22 = vpop.permute.xlu0 %655 }
 0x328   :  { %v3953_v62 = vsel %vm143_vm4, %v638_v55, %v640_v6  ;;  %v3957_v9 = vsel %vm171_vm2, %v654_v19, %v656_v22  ;;  %v676_v38 = vpop.permute.xlu2 %675 }
 0x329   :  { %7654 = vst [vmem:[#allocation6_spill] sm:$0xff] %v3953_v62  ;;  %v665_v32 = vmul.f32 %v3957_v9, %v3470_v60  ;;  %v649_v15 = vmul.f32 %v3953_v62, %v3534_v56 }
 0x32b   :  { %v713_v41 = vpack.c.bf16 %v681_v44, %v665_v32  ;;  %v709_v8 = vpack.c.bf16 %v649_v15, %v3855_v23 }
 0x32d   :  { %759 = vmatpush.bf16.msra.mxu0 %v713_v41 }
 0x32f   :  { %v3965_v3 = vpop.permute.xlu1 %591  ;;  %v3967_v4 = vpop.permute.xlu0 %607 }
 0x331   :  { %760 = vmatpush.bf16.msra.mxu0 %v709_v8 }
 0x337   :  { %v692_v2 = vpop.permute.xlu1 %691  ;;  %v690_v50 = vpop.permute.xlu0 %689 }
 0x338   :  { %v3972_v53 = vsel %vm227_vm0, %v692_v2, %v686_v18  ;;  %v693_v60 = vsel %vm227_vm0, %v690_v50, %v692_v2  ;;  %v3978_v56 = vsel %vm227_vm0, %v688_v28, %v690_v50  ;;  %v3989_v2 = vsel %vm171_vm2, %v656_v22, %v658_v11  ;;  %v644_v28 = vpop.permute.xlu2 %643 }
 0x339   :  { %v700_v30 = vmul.f32 %v3972_v53, %v3401_v10  ;;  %v698_v46 = vmul.f32 %v3978_v56, %v3446_v45  ;;  %v699_v44 = vmul.f32 %v693_v60, %v3407_v17  ;;  %v3994_v45 = vsel %vm199_vm3, %v676_v38, %v670_v33 }
 0x33a   :  { %7655 = vst [vmem:[#allocation7_spill] sm:$0xff] %v3994_v45  ;;  %v666_v33 = vmul.f32 %v3989_v2, %v3472_v61 }
 0x33b   :  { %v720_v32 = vpack.c.bf16 %v700_v30, %v700_v30  ;;  %v718_v15 = vpack.c.bf16 %v698_v46, %v698_v46  ;;  %v719_v41 = vpack.c.bf16 %v699_v44, %v699_v44 }
 0x33d   :  { %v747_v18 = vsel %vm278_vm1, %v718_v15, 0  ;;  %v753_v8 = vsel %vm278_vm1, %v720_v32, 0  ;;  %v750_v10 = vsel %vm278_vm1, %v719_v41, 0  ;;  %v7657_v15 = vld [vmem:[#allocation2_spill] sm:$0xff] }
 0x33e   :  { %772 = vmatpush.bf16.msra.mxu1 %v747_v18  ;;  %800 = vmatpush.bf16.msra.mxu3 %v753_v8  ;;  %v7658_v8 = vld [vmem:[#allocation3_spill] sm:$0xff] }
 0x33f   :  { %786 = vmatpush.bf16.msra.mxu2 %v750_v10  ;;  %v674_v17 = vpop.permute.xlu1 %673  ;;  %v660_v50 = vpop.permute.xlu0 %659 }
 0x340   :  { %v3998_v30 = vsel %vm199_vm3, %v674_v17, %v676_v38  ;;  %v4002_v22 = vsel %vm199_vm3, %v672_v42, %v674_v17  ;;  %v4006_v46 = vsel %vm171_vm2, %v658_v11, %v660_v50  ;;  %v4010_v44 = vsel %vm171_vm2, %v660_v50, %v654_v19  ;;  %v4044_v50 = vpop.permute.xlu2 %593 }
 0x341   :  { %v682_v32 = vmul.f32 %v4002_v22, %v3464_v57  ;;  %v683_v38 = vmul.f32 %v3998_v30, %v3424_v27  ;;  %v4020_v42 = vsel %vm143_vm4, %v644_v28, %v638_v55  ;;  %v667_v11 = vmul.f32 %v4006_v46, %v3422_v26 }
 0x342   :  { %7656 = vst [vmem:[#allocation8_spill] sm:$0xff] %v4020_v42  ;;  %v684_v19 = vmul.f32 %v3994_v45, %v3432_v31  ;;  %v668_v41 = vmul.f32 %v4010_v44, %v7657_v15  ;;  %v652_v57 = vmul.f32 %v4020_v42, %v7658_v8  ;;  %v4034_v26 = vsel %vm87_vm5, %v3930_v49, %v3967_v4 }
 0x343   :  { %v714_v61 = vpack.c.bf16 %v682_v32, %v666_v33  ;;  %v715_v18 = vpack.c.bf16 %v683_v38, %v667_v11  ;;  %v618_v11 = vmul.f32 %v4034_v26, %v3579_v39 }
 0x344   :  { %v716_v27 = vpack.c.bf16 %v684_v19, %v668_v41  ;;  %v712_v38 = vpack.c.bf16 %v652_v57, %v3891_v48 }
 0x345   :  { %773 = vmatpush.bf16.msra.mxu1 %v714_v61  ;;  %787 = vmatpush.bf16.msra.mxu2 %v715_v18 }
 0x346   :  { %801 = vmatpush.bf16.msra.mxu3 %v716_v27 }
 0x347   :  { %v642_v55 = vpop.permute.xlu1 %641  ;;  %v626_v10 = vpop.permute.xlu0 %625 }
 0x348   :  { %v4038_v31 = vsel %vm143_vm4, %v642_v55, %v644_v28  ;;  %v4042_v17 = vsel %vm143_vm4, %v640_v6, %v642_v55  ;;  %v4055_v28 = vsel %vm115_vm6, %v3936_v29, %v3934_v51  ;;  %v4060_v6 = vld [vmem:[%s7431_s0 + $0x20] ss:$8 sm:$0xf]  ;;  %v4074_v41 = vsel %vm115_vm6, %v3934_v51, %v626_v10  ;;  %v4093_v51 = vld [vmem:[%s7431_s0 + $0x7] ss:$8 sm:$0xf] }
 0x349   :  { %v650_v33 = vmul.f32 %v4042_v17, %v3536_v58  ;;  %v651_v32 = vmul.f32 %v4038_v31, %v3476_v5  ;;  %v4065_v58 = vperm.slane %v4060_v6, 2  ;;  %v634_v15 = vmul.f32 %v4055_v28, %v3581_v40 }
 0x34a   :  { %802 = vmatpush.bf16.msra.mxu3 %v712_v38  ;;  %v4106_v55 = vsel %vm59_vm8, %v3965_v3, %v4044_v50  ;;  %v628_v38 = vpop.permute.xlu2 %627 }
 0x34b   :  { %7659 = vst [vmem:[#allocation2_spill] sm:$0xff] %v4065_v58  ;;  %v710_v5 = vpack.c.bf16 %v650_v33, %v3869_v52  ;;  %v711_v19 = vpack.c.bf16 %v651_v32, %v3889_v13  ;;  %v929_v39 = vmul.f32 %v4065_v58, %v693_v60  ;;  %v706_v8 = vpack.c.bf16 %v634_v15, %v618_v11  ;;  %v3147_v15 = vld [vmem:[%s7433_s2 + $0x60] sm:$0xf] }
 0x34c   :  { %v635_v60 = vmul.f32 %v4074_v41, %v3520_v37  ;;  %7660 = vst [vmem:[#allocation3_spill] sm:$0xff] %v4106_v55  ;;  %v4109_v33 = vperm.slane %v4060_v6, 1  ;;  %v4112_v37 = vperm.slane %v4093_v51, 2  ;;  %v4143_v58 = vperm.slane %v4093_v51, 1 }
 0x34d   :  { %774 = vmatpush.bf16.msra.mxu1 %v710_v5  ;;  %788 = vmatpush.bf16.msra.mxu2 %v711_v19  ;;  %v949_v32 = vpack.c.bf16 %v929_v39, %v929_v39  ;;  %v4117_v5 = vperm.slane %v4060_v6, 0  ;;  %v3251_v39 = vld [vmem:[%s7433_s2 + $0x64] sm:$0xf0]  ;;  %v4157_v42 = vsel %vm115_vm6, %v626_v10, %v628_v38 }
 0x34e   :  { %7661 = vst [vmem:[#allocation9_spill] sm:$0xff] %v4109_v33  ;;  %v928_v48 = vmul.f32 %v4109_v33, %v3978_v56  ;;  %v4162_v33 = vor.u32 %v3251_v39, %v3147_v15 }
 0x34f   :  { %v610_v61 = vpop.permute.xlu1 %609  ;;  %v4077_v18 = vpop.permute.xlu0 %577  ;;  %7662 = vst [vmem:[#allocation10_spill] sm:$0xff] %v4112_v37  ;;  %v980_v56 = vsel %vm278_vm1, %v949_v32, 0  ;;  %v4183_v32 = vld [vmem:[%s7431_s0 + $0x3] ss:$8 sm:$0xf] }
 0x350   :  { %v4082_v57 = vsel %vm87_vm5, %v3967_v4, %v610_v61  ;;  %v4088_v40 = vsel %vm32_vm7, %v3938_v34, %v4077_v18  ;;  %v3157_v4 = vld [vmem:[%s7431_s0 + $0x6] ss:$8 sm:$0xf]  ;;  %7665 = vst [vmem:[#allocation13_spill] sm:$0xff] %v4143_v58  ;;  %v4215_v15 = vperm.slane %v4183_v32, 1 }
 0x351   :  { %v619_v27 = vmul.f32 %v4082_v57, %v3518_v36  ;;  %775 = vmatpush.bf16.msra.mxu1 %v706_v8  ;;  %v587_v36 = vmul.f32 %v4088_v40, %v3561_v16  ;;  %v4119_v19 = vperm.slane %v3157_v4, 2  ;;  %v4131_v8 = vsel %vm32_vm7, %v3932_v21, %v3938_v34  ;;  %v4136_v16 = vld [vmem:[%s7431_s0 + $0x5] ss:$8 sm:$0xf] }
 0x352   :  { %v4150_v34 = vsel %vm115_vm6, %v628_v38, %v3936_v29  ;;  %v4153_v23 = vperm.slane %v4136_v16, 2  ;;  %v4197_v38 = vmul.f32 %v4117_v5, %v3942_v24  ;;  %v954_v24 = vld [vmem:[%s7432_s3 + $0x28] sm:$0xff]  ;;  %7668 = vst [vmem:[#allocation16_spill] sm:$0xff] %v4215_v15  ;;  %v4222_v39 = vperm.slane %v3157_v4, 0 }
 0x353   :  { %v707_v11 = vpack.c.bf16 %v635_v60, %v619_v27  ;;  %7663 = vst [vmem:[#allocation11_spill] sm:$0xff] %v4119_v19  ;;  %v4138_v60 = vperm.slane %v3157_v4, 1  ;;  %v603_v27 = vmul.f32 %v4106_v55, %v3563_v20  ;;  %v915_v20 = vmul.f32 %v4112_v37, %v3998_v30  ;;  %962 = vperm.xlu0 %3273, %v954_v24  }
 0x354   :  { %7666 = vst [vmem:[#allocation14_spill] sm:$0xff] %v4153_v23  ;;  %v901_v29 = vmul.f32 %v4119_v19, %v4006_v46  ;;  %v633_v46 = vmul.f32 %v4150_v34, %v3572_v25  ;;  %v4202_v25 = vld [vmem:[%s7431_s0 + $0x2] ss:$8 sm:$0xf] }
 0x355   :  { %7664 = vst [vmem:[#allocation12_spill] sm:$0xff] %v4138_v60  ;;  %789 = vmatpush.bf16.msra.mxu2 %v707_v11  ;;  %v703_v62 = vpack.c.bf16 %v603_v27, %v587_v36  ;;  %v914_v27 = vmul.f32 %v4143_v58, %v4002_v22  ;;  %v900_v22 = vmul.f32 %v4138_v60, %v3989_v2 }
 0x356   :  { %7670 = vst [vmem:[#allocation18_spill] sm:$0xff] %v4222_v39 }
 0x357   :  { %v612_v55 = vpop.permute.xlu1 %611  ;;  %v590_v11 = vpop.permute.xlu0 %589 }
 0x358   :  { %v4168_v45 = vsel %vm87_vm5, %v610_v61, %v612_v55  ;;  %v4173_v10 = vsel %vm87_vm5, %v612_v55, %v3930_v49  ;;  %v4178_v30 = vsel %vm59_vm8, %v590_v11, %v3965_v3  ;;  %v636_v61 = vmul.f32 %v4157_v42, %v3513_v1 }
 0x359   :  { %v617_v49 = vmul.f32 %v4173_v10, %v3577_v35  ;;  %v620_v55 = vmul.f32 %v4168_v45, %v3511_v0  ;;  %790 = vmatpush.bf16.msra.mxu2 %v703_v62  ;;  %v586_v3 = vmul.f32 %v4131_v8, %v3615_v14  ;;  %v948_v1 = vpack.c.bf16 %v928_v48, %v928_v48 }
 0x35a   :  { %v602_v35 = vmul.f32 %v4178_v30, %v3611_v54  ;;  %v4207_v0 = vperm.slane %v4060_v6, 3  ;;  %v887_v14 = vmul.f32 %v4153_v23, %v4038_v31  ;;  %v4218_v48 = vperm.slane %v4093_v51, 0 }
 0x35b   :  { %v705_v62 = vpack.c.bf16 %v633_v46, %v617_v49  ;;  %v708_v36 = vpack.c.bf16 %v636_v61, %v620_v55  ;;  %v945_v6 = vpack.c.bf16 %v915_v20, %v901_v29  ;;  %v4225_v31 = vperm.slane %v4202_v25, 1 }
 0x35c   :  { %7667 = vst [vmem:[#allocation15_spill] sm:$0xff] %v4207_v0  ;;  %v702_v54 = vpack.c.bf16 %v602_v35, %v586_v3  ;;  %3151 = vmatmul.msk.bf16.vlgmr.msra.gmra.mxu2 %vm274_vm9, %v4162_v33  ;;  %v947_v46 = vpack.c.bf16 %v4197_v38, %v4197_v38  ;;  %v4234_v61 = vperm.slane %v3157_v4, 3  ;;  %v4237_v20 = vperm.slane %v4202_v25, 2 }
 0x35d   :  { %1016 = vmatpush.bf16.msrb.mxu2 %v980_v56  ;;  %7669 = vst [vmem:[#allocation17_spill] sm:$0xff] %v4218_v48  ;;  %v4230_v56 = vperm.slane %v4136_v16, 1  ;;  %761 = vmatpush.bf16.msra.mxu0 %v705_v62  ;;  %v977_v29 = vsel %vm278_vm1, %v948_v1, 0  ;;  %v930_v49 = vmul.f32 %v4207_v0, %v3972_v53  ;;  %v4245_v55 = vperm.slane %v4183_v32, 2 }
 0x35e   :  { %7671 = vst [vmem:[#allocation19_spill] sm:$0xff] %v4225_v31  ;;  %803 = vmatpush.bf16.msra.mxu3 %v708_v36  ;;  %776 = vmatpush.bf16.msra.mxu1 %v702_v54  ;;  %v941_v38 = vpack.c.bf16 %v887_v14, %v3889_v13  ;;  %v4270_v13 = vld [vmem:[%s7431_s0] ss:$8 sm:$0xf]  ;;  %v944_v14 = vpack.c.bf16 %v914_v27, %v900_v22  ;;  %v4301_v54 = vperm.slane %v4136_v16, 3  ;;  %v974_v22 = vsel %vm278_vm1, %v947_v46, 0 }
 0x35f   :  { %7672 = vst [vmem:[#allocation20_spill] sm:$0xff] %v4234_v61  ;;  %v596_v3 = vpop.permute.xlu1 %595  ;;  %v580_v4 = vpop.permute.xlu0 %579  ;;  %v859_v62 = vmul.f32 %v4237_v20, %v4082_v57  ;;  %v4288_v36 = vperm.slane %v4270_v13, 2  ;;  %v950_v57 = vpack.c.bf16 %v930_v49, %v930_v49  ;;  %v902_v49 = vmul.f32 %v4234_v61, %v4010_v44 }
 0x360   :  { %7673 = vst [vmem:[#allocation21_spill] sm:$0xff] %v4237_v20  ;;  %v4251_v35 = vsel %vm59_vm8, %v4044_v50, %v596_v3  ;;  %v4255_v1 = vsel %vm59_vm8, %v596_v3, %v590_v11  ;;  %v4260_v53 = vsel %vm32_vm7, %v4077_v18, %v580_v4  ;;  %v4265_v2 = vsel %vm32_vm7, %v580_v4, %v3932_v21  ;;  %v4275_v50 = vld [vmem:[%s7431_s0 + $0x1] ss:$8 sm:$0xf] }
 0x361   :  { %1017 = vmatpush.bf16.msrb.mxu2 %v945_v6  ;;  %7674 = vst [vmem:[#allocation22_spill] sm:$0xff] %v4245_v55  ;;  %v886_v11 = vmul.f32 %v4230_v56, %v4042_v17  ;;  %v601_v18 = vmul.f32 %v4255_v1, %v3609_v12  ;;  %v604_v21 = vmul.f32 %v4251_v35, %v3587_v47  ;;  %v4295_v12 = vperm.slane %v4093_v51, 3 }
 0x362   :  { %1002 = vmatpush.bf16.msrb.mxu1 %v977_v29  ;;  %7675 = vst [vmem:[#allocation23_spill] sm:$0xff] %v4288_v36  ;;  %v585_v24 = vmul.f32 %v4265_v2, %v3613_v63  ;;  %v588_v17 = vmul.f32 %v4260_v53, %v3585_v43  ;;  %v4298_v47 = vperm.slane %v4136_v16, 0  ;;  %v4304_v6 = vperm.slane %v4275_v50, 2 }
 0x363   :  { %3150 = vmatmul.msk.bf16.vlgmr.msra.gmra.mxu1 %vm274_vm9, %v4162_v33  ;;  %7676 = vst [vmem:[#allocation24_spill] sm:$0xff] %v4295_v12  ;;  %v873_v63 = vmul.f32 %v4245_v55, %v4074_v41  ;;  %v899_v51 = vmul.f32 %v4222_v39, %v3957_v9  ;;  %v858_v29 = vmul.f32 %v4225_v31, %v4034_v26  ;;  %v4319_v41 = vperm.slane %v4275_v50, 1 }
 0x364   :  { %7677 = vst [vmem:[#allocation25_spill] sm:$0xff] %v4301_v54  ;;  %v701_v27 = vpack.c.bf16 %v601_v18, %v585_v24  ;;  %v704_v43 = vpack.c.bf16 %v604_v21, %v588_v17  ;;  %v940_v16 = vpack.c.bf16 %v886_v11, %v3869_v52  ;;  %v831_v3 = vmul.f32 %v4288_v36, %v4088_v40  ;;  %v7681_v40 = vld [vmem:[#allocation7_spill] sm:$0xff] }
 0x365   :  { %1018 = vmatpush.bf16.msrb.mxu2 %v941_v38  ;;  %7678 = vst [vmem:[#allocation26_spill] sm:$0xff] %v4304_v6  ;;  %v937_v4 = vpack.c.bf16 %v873_v63, %v859_v62  ;;  %v872_v9 = vmul.f32 %v4215_v15, %v4055_v28  ;;  %v913_v26 = vmul.f32 %v4218_v48, %v3949_v59  ;;  %v983_v52 = vsel %vm278_vm1, %v950_v57, 0  ;;  %v7682_v38 = vld [vmem:[#allocation6_spill] sm:$0xff]  ;;  %v7683_v18 = vld [vmem:[#allocation3_spill] sm:$0xff] }
 0x366   :  { %1003 = vmatpush.bf16.msrb.mxu1 %v944_v14  ;;  %7679 = vst [vmem:[#allocation27_spill] sm:$0xff] %v4319_v41  ;;  %762 = vmatpush.bf16.msra.mxu0 %v701_v27  ;;  %v4327_v44 = vperm.slane %v4270_v13, 1  ;;  %v916_v46 = vmul.f32 %v4295_v12, %v7681_v40  ;;  %v885_v11 = vmul.f32 %v4298_v47, %v7682_v38  ;;  %v3162_v59 = vld [vmem:[%s7433_s2 + $0x20] sm:$0xf]  ;;  %v3252_v28 = vld [vmem:[%s7433_s2 + $0x24] sm:$0xf0] }
 0x367   :  { %804 = vmatpush.bf16.msra.mxu3 %v704_v43  ;;  %v845_v21 = vmul.f32 %v4304_v6, %v7683_v18  ;;  %v7684_v14 = vld [vmem:[#allocation8_spill] sm:$0xff]  ;;  %v4344_v24 = vperm.slane %v4202_v25, 0  ;;  %v943_v17 = vpack.c.bf16 %v913_v26, %v899_v51  ;;  %v936_v57 = vpack.c.bf16 %v872_v9, %v858_v29 }
 0x368   :  { %7680 = vst [vmem:[#allocation28_spill] sm:$0xff] %v4327_v44  ;;  %v888_v62 = vmul.f32 %v4301_v54, %v7684_v14  ;;  %v4351_v63 = vperm.slane %v4202_v25, 3  ;;  %v844_v27 = vmul.f32 %v4319_v41, %v4178_v30  ;;  %v7688_v25 = vld [vmem:[#allocation4_spill] sm:$0xff]  ;;  %v4367_v29 = vperm.slane %v4275_v50, 0 }
 0x369   :  { %1019 = vmatpush.bf16.msrb.mxu2 %v937_v4  ;;  %7685 = vst [vmem:[#allocation7_spill] sm:$0xff] %v4344_v24  ;;  %3149 = vmatmul.msk.bf16.vlgmr.msra.gmra.mxu0 %vm274_vm9, %v4162_v33  ;;  %v933_v43 = vpack.c.bf16 %v845_v21, %v831_v3  ;;  %v3163_v4 = vor.u32 %v3252_v28, %v3162_v59  ;;  %v7691_v3 = vld [vmem:[#allocation5_spill] sm:$0xff]  ;;  %v4379_v26 = vperm.slane %v4270_v13, 3 }
 0x36a   :  { %988 = vmatpush.bf16.msrb.mxu0 %v974_v22  ;;  %1004 = vmatpush.bf16.msrb.mxu1 %v940_v16  ;;  %7686 = vst [vmem:[#allocation6_spill] sm:$0xff] %v4351_v63  ;;  %v946_v22 = vpack.c.bf16 %v916_v46, %v902_v49  ;;  %v4356_v16 = vperm.slane %v4183_v32, 0  ;;  %v939_v51 = vpack.c.bf16 %v885_v11, %v7688_v25  ;;  %v4370_v49 = vperm.slane %v4270_v13, 0 }
 0x36b   :  { %1030 = vmatpush.bf16.msrb.mxu3 %v983_v52  ;;  %v830_v52 = vmul.f32 %v4327_v44, %v4131_v8  ;;  %v857_v30 = vmul.f32 %v4344_v24, %v4173_v10  ;;  %7689 = vst [vmem:[#allocation8_spill] sm:$0xff] %v4367_v29  ;;  %v942_v9 = vpack.c.bf16 %v888_v62, %v7691_v3 }
 0x36c   :  { %3152 = vmatmul.msk.bf16.vlgmr.msra.gmra.mxu3 %vm274_vm9, %v4162_v33  ;;  %v4361_v33 = vperm.slane %v4183_v32, 3  ;;  %7690 = vst [vmem:[#allocation4_spill] sm:$0xff] %v4370_v49  ;;  %v860_v8 = vmul.f32 %v4351_v63, %v4168_v45  ;;  %v4376_v32 = vperm.slane %v4275_v50, 3  ;;  %v871_v10 = vmul.f32 %v4356_v16, %v4150_v34 }
 0x36d   :  { %1020 = vmatpush.bf16.msrb.mxu2 %v933_v43  ;;  %7693 = vst [vmem:[#allocation29_spill] sm:$0xff] %v4379_v26  ;;  %v932_v40 = vpack.c.bf16 %v844_v27, %v830_v52  ;;  %v843_v45 = vmul.f32 %v4367_v29, %v4255_v1  ;;  %v829_v50 = vmul.f32 %v4370_v49, %v4265_v2 }
 0x36e   :  { %989 = vmatpush.bf16.msrb.mxu0 %v943_v17  ;;  %1005 = vmatpush.bf16.msrb.mxu1 %v936_v57  ;;  %7687 = vst [vmem:[#allocation3_spill] sm:$0xff] %v4361_v33  ;;  %v874_v46 = vmul.f32 %v4361_v33, %v4157_v42  ;;  %v935_v13 = vpack.c.bf16 %v871_v10, %v857_v30 }
 0x36f   :  { %1031 = vmatpush.bf16.msrb.mxu3 %v946_v22  ;;  %7692 = vst [vmem:[#allocation5_spill] sm:$0xff] %v4376_v32  ;;  %v846_v38 = vmul.f32 %v4376_v32, %v4251_v35  ;;  %v832_v34 = vmul.f32 %v4379_v26, %v4260_v53  ;;  %v931_v42 = vpack.c.bf16 %v843_v45, %v829_v50  ;;  %v958_v53 = vpop.permute.xlu2 %957 }
 0x370   :  { %3166 = vmatmul.msk.bf16.vlgmr.msrb.gmra.mxu2 %vm274_vm9, %v3163_v4  ;;  %v938_v11 = vpack.c.bf16 %v874_v46, %v860_v8 }
 0x371   :  { %v934_v18 = vpack.c.bf16 %v846_v38, %v832_v34 }
 0x372   :  { %990 = vmatpush.bf16.msrb.mxu0 %v939_v51  ;;  %1006 = vmatpush.bf16.msrb.mxu1 %v932_v40 }
 0x373   :  { %1032 = vmatpush.bf16.msrb.mxu3 %v942_v9 }
 0x375   :  { %3165 = vmatmul.msk.bf16.vlgmr.msrb.gmra.mxu1 %vm274_vm9, %v3163_v4 }
 0x376   :  { %991 = vmatpush.bf16.msrb.mxu0 %v935_v13 }
 0x377   :  { %1033 = vmatpush.bf16.msrb.mxu3 %v938_v11 }
 0x37a   :  { %992 = vmatpush.bf16.msrb.mxu0 %v931_v42 }
 0x37b   :  { %1034 = vmatpush.bf16.msrb.mxu3 %v934_v18 }
 0x37d   :  { %3164 = vmatmul.msk.bf16.vlgmr.msrb.gmra.mxu0 %vm274_vm9, %v3163_v4 }
 0x37e   :  { %3167 = vmatmul.msk.bf16.vlgmr.msrb.gmra.mxu3 %vm274_vm9, %v3163_v4 }
 0x3c5   :  { %v4413_v62 = vpop.permute.xlu0 %962 }
 0x3df   :  { %v4434_v25 = vpop.f32.mrf.mxu2 }
 0x3e0   :  { %v4401_v35 = vpop.f32.mrf.mxu1  ;;  %7698 = vst [vmem:[#allocation34_spill] sm:$0xff] %v4434_v25 }
 0x3e1   :  { %7696 = vst [vmem:[#allocation32_spill] sm:$0xff] %v4401_v35 }
 0x3e6   :  { %v4397_v1 = vpop.f32.mrf.mxu0 }
 0x3e7   :  { %7694 = vst [vmem:[#allocation30_spill] sm:$0xff] %v4397_v1  ;;  %v4442_v51 = vpop.f32.mrf.mxu2 }
 0x3e8   :  { %v4403_v28 = vpop.f32.mrf.mxu1  ;;  %7699 = vst [vmem:[#allocation35_spill] sm:$0xff] %v4442_v51 }
 0x3e9   :  { %7697 = vst [vmem:[#allocation33_spill] sm:$0xff] %v4403_v28 }
 0x3ee   :  { %v4399_v2 = vpop.f32.mrf.mxu0 }
 0x3ef   :  { %7695 = vst [vmem:[#allocation31_spill] sm:$0xff] %v4399_v2  ;;  %v4450_v30 = vpop.f32.mrf.mxu3 }
 0x3f0   :  { %7700 = vst [vmem:[#allocation36_spill] sm:$0xff] %v4450_v30 }
 0x3f2   :  { %v1008_v43 = vpop.f32.mrf.mxu1 }
 0x3f3   :  { %v1009_v4 = vadd.f32 %v1008_v43, %v958_v53  ;;  %v1022_v3 = vpop.f32.mrf.mxu2 }
 0x3f4   :  { %v1023_v9 = vadd.f32 %v1022_v3, %v958_v53 }
 0x3f5   :  { %v4426_v52 = vmax.f32 %v1009_v4, 0.0 }
 0x3f6   :  { %v4460_v40 = vmax.f32 %v1023_v9, 0.0 }
 0x3f7   :  { %v4458_v8 = vpop.f32.mrf.mxu3 }
 0x3f8   :  { %7701 = vst [vmem:[#allocation37_spill] sm:$0xff] %v4458_v8  ;;  %v1343_v8 = vld [vmem:[%s7432_s3 + $0x30] sm:$0xff] }
 0x3f9   :  { %7702 = vst [vmem:[#allocation38_spill] sm:$0xff] %v4460_v40 }
 0x3fa   :  { %v994_v21 = vpop.f32.mrf.mxu0  ;;  %v1010_v50 = vpop.f32.mrf.mxu1 }
 0x3fb   :  { %v995_v59 = vadd.f32 %v994_v21, %v958_v53  ;;  %v1011_v13 = vadd.f32 %v1010_v50, %v4413_v62  ;;  %v1024_v34 = vpop.f32.mrf.mxu2 }
 0x3fc   :  { %v1025_v11 = vadd.f32 %v1024_v34, %v4413_v62 }
 0x3fd   :  { %v4405_v14 = vmax.f32 %v995_v59, 0.0  ;;  %v4495_v38 = vmax.f32 %v1011_v13, 0.0 }
 0x3fe   :  { %v4506_v18 = vmax.f32 %v1025_v11, 0.0 }
 0x3ff   :  { %1145 = vrot.lane.b32.xlu2 %v4405_v14, %s3280_s27  ;;  %1177 = vrot.lane.b32.xlu0 %v4405_v14, %s3278_s26 }
 0x400   :  { %1241 = vrot.lane.b32.xlu1 %v4405_v14, %s3277_s23  ;;  %7704 = vst [vmem:[#allocation40_spill] sm:$0xff] %v4506_v18 }
 0x401   :  { %v1036_v10 = vpop.f32.mrf.mxu3 }
 0x402   :  { %v996_v17 = vpop.f32.mrf.mxu0  ;;  %v1037_v46 = vadd.f32 %v1036_v10, %v958_v53 }
 0x403   :  { %v997_v57 = vadd.f32 %v996_v17, %v4413_v62 }
 0x404   :  { %v4474_v45 = vmax.f32 %v1037_v46, 0.0 }
 0x405   :  { %v4416_v27 = vmax.f32 %v997_v57, 0.0 }
 0x406   :  { %7703 = vst [vmem:[#allocation39_spill] sm:$0xff] %v4474_v45 }
 0x407   :  { %1081 = vrot.lane.b32.xlu2 %v4405_v14, %s3282_s29  ;;  %1113 = vrot.lane.b32.xlu0 %v4405_v14, %s3279_s1 }
 0x408   :  { %1209 = vrot.lane.b32.xlu1 %v4405_v14, %s3276_s22 }
 0x409   :  { %v1038_v59 = vpop.f32.mrf.mxu3 }
 0x40a   :  { %v1039_v17 = vadd.f32 %v1038_v59, %v4413_v62 }
 0x40c   :  { %v4537_v3 = vmax.f32 %v1039_v17, 0.0 }
 0x40e   :  { %7707 = vst [vmem:[#allocation43_spill] sm:$0xff] %v4537_v3 }
 0x40f   :  { %1117 = vrot.lane.b32.xlu2 %v4426_v52, %s3279_s1  ;;  %1273 = vrot.lane.b32.xlu0 %v4405_v14, %s3275_s21 }
 0x410   :  { %1049 = vrot.lane.b32.xlu1 %v4405_v14, %s3281_s28 }
 0x417   :  { %1213 = vrot.lane.b32.xlu0 %v4426_v52, %s3276_s22  ;;  %1243 = vrot.lane.b32.xlu2 %v4416_v27, %s3277_s23 }
 0x418   :  { %1245 = vrot.lane.b32.xlu1 %v4426_v52, %s3277_s23 }
 0x41f   :  { %1181 = vrot.lane.b32.xlu0 %v4426_v52, %s3278_s26  ;;  %1211 = vrot.lane.b32.xlu2 %v4416_v27, %s3276_s22 }
 0x420   :  { %1149 = vrot.lane.b32.xlu1 %v4426_v52, %s3280_s27 }
 0x427   :  { %1053 = vrot.lane.b32.xlu0 %v4426_v52, %s3281_s28  ;;  %1051 = vrot.lane.b32.xlu2 %v4416_v27, %s3281_s28 }
 0x428   :  { %1085 = vrot.lane.b32.xlu1 %v4426_v52, %s3282_s29 }
 0x42f   :  { %1277 = vrot.lane.b32.xlu0 %v4426_v52, %s3275_s21  ;;  %1217 = vrot.lane.b32.xlu2 %v4460_v40, %s3276_s22 }
 0x430   :  { %1179 = vrot.lane.b32.xlu1 %v4416_v27, %s3278_s26 }
 0x437   :  { %1147 = vrot.lane.b32.xlu0 %v4416_v27, %s3280_s27  ;;  %1185 = vrot.lane.b32.xlu2 %v4460_v40, %s3278_s26 }
 0x438   :  { %1115 = vrot.lane.b32.xlu1 %v4416_v27, %s3279_s1 }
 0x43f   :  { %1083 = vrot.lane.b32.xlu0 %v4416_v27, %s3282_s29  ;;  %1221 = vrot.lane.b32.xlu2 %v4474_v45, %s3276_s22 }
 0x440   :  { %1275 = vrot.lane.b32.xlu1 %v4416_v27, %s3275_s21 }
 0x447   :  { %1253 = vrot.lane.b32.xlu0 %v4474_v45, %s3277_s23  ;;  %1093 = vrot.lane.b32.xlu2 %v4474_v45, %s3282_s29 }
 0x448   :  { %1249 = vrot.lane.b32.xlu1 %v4460_v40, %s3277_s23 }
 0x44f   :  { %1125 = vrot.lane.b32.xlu0 %v4474_v45, %s3279_s1  ;;  %1281 = vrot.lane.b32.xlu2 %v4460_v40, %s3275_s21 }
 0x450   :  { %1157 = vrot.lane.b32.xlu1 %v4474_v45, %s3280_s27 }
 0x457   :  { %1119 = vrot.lane.b32.xlu0 %v4495_v38, %s3279_s1  ;;  %1247 = vrot.lane.b32.xlu2 %v4495_v38, %s3277_s23 }
 0x458   :  { %1189 = vrot.lane.b32.xlu1 %v4474_v45, %s3278_s26 }
 0x459   :  { %v4504_v42 = vpop.permute.xlu2 %1145 }
 0x45f   :  { %1219 = vrot.lane.b32.xlu0 %v4506_v18, %s3276_s22  ;;  %1151 = vrot.lane.b32.xlu2 %v4495_v38, %s3280_s27 }
 0x460   :  { %1061 = vrot.lane.b32.xlu1 %v4474_v45, %s3281_s28 }
 0x461   :  { %v4514_v53 = vpop.permute.xlu2 %1081 }
 0x467   :  { %1187 = vrot.lane.b32.xlu0 %v4506_v18, %s3278_s26  ;;  %1087 = vrot.lane.b32.xlu2 %v4495_v38, %s3282_s29 }
 0x468   :  { %1215 = vrot.lane.b32.xlu1 %v4495_v38, %s3276_s22 }
 0x469   :  { %v4522_v21 = vpop.permute.xlu2 %1117 }
 0x46f   :  { %1089 = vrot.lane.b32.xlu0 %v4460_v40, %s3282_s29  ;;  %1251 = vrot.lane.b32.xlu2 %v4506_v18, %s3277_s23 }
 0x470   :  { %1183 = vrot.lane.b32.xlu1 %v4495_v38, %s3278_s26 }
 0x471   :  { %v4531_v57 = vpop.permute.xlu2 %1243  ;;  %v4533_v43 = vpop.permute.xlu0 %1177 }
 0x472   :  { %7705 = vst [vmem:[#allocation41_spill] sm:$0xff] %v4531_v57  ;;  %v4535_v4 = vpop.permute.xlu1 %1241 }
 0x473   :  { %7706 = vst [vmem:[#allocation42_spill] sm:$0xff] %v4535_v4 }
 0x477   :  { %1223 = vrot.lane.b32.xlu0 %v4537_v3, %s3276_s22  ;;  %1153 = vrot.lane.b32.xlu2 %v4460_v40, %s3280_s27 }
 0x478   :  { %1055 = vrot.lane.b32.xlu1 %v4495_v38, %s3281_s28 }
 0x479   :  { %v4545_v9 = vpop.permute.xlu2 %1211  ;;  %v4547_v62 = vpop.permute.xlu0 %1113 }
 0x47a   :  { %v4549_v10 = vpop.permute.xlu1 %1209 }
 0x47b   :  { %7708 = vst [vmem:[#allocation44_spill] sm:$0xff] %v4549_v10 }
 0x47f   :  { %1095 = vrot.lane.b32.xlu0 %v4537_v3, %s3282_s29  ;;  %1159 = vrot.lane.b32.xlu2 %v4537_v3, %s3280_s27 }
 0x480   :  { %1279 = vrot.lane.b32.xlu1 %v4495_v38, %s3275_s21 }
 0x481   :  { %v4557_v46 = vpop.permute.xlu2 %1051  ;;  %v4559_v50 = vpop.permute.xlu0 %1273 }
 0x482   :  { %v4561_v13 = vpop.permute.xlu1 %1049 }
 0x487   :  { %1283 = vrot.lane.b32.xlu0 %v4506_v18, %s3275_s21  ;;  %1285 = vrot.lane.b32.xlu2 %v4474_v45, %s3275_s21 }
 0x488   :  { %1255 = vrot.lane.b32.xlu1 %v4537_v3, %s3277_s23 }
 0x489   :  { %v4569_v34 = vpop.permute.xlu2 %1217  ;;  %v1214_v11 = vpop.permute.xlu0 %1213 }
 0x48a   :  { %v1246_v59 = vpop.permute.xlu1 %1245  ;;  %v1227_v24 = vsel %vm171_vm2, %v1214_v11, %v4569_v34 }
 0x48b   :  { %v1261_v63 = vsel %vm199_vm3, %v4535_v4, %v1246_v59 }
 0x48c   :  { %v1265_v6 = vmul.f32 %v1261_v63, %v4218_v48 }
 0x48f   :  { %1155 = vrot.lane.b32.xlu0 %v4506_v18, %s3280_s27  ;;  %1191 = vrot.lane.b32.xlu2 %v4537_v3, %s3278_s26 }
 0x490   :  { %1127 = vrot.lane.b32.xlu1 %v4537_v3, %s3279_s1 }
 0x491   :  { %v4577_v17 = vpop.permute.xlu2 %1185  ;;  %v4579_v22 = vpop.permute.xlu0 %1181 }
 0x492   :  { %v4581_v30 = vpop.permute.xlu1 %1149 }
 0x497   :  { %1287 = vrot.lane.b32.xlu0 %v4537_v3, %s3275_s21  ;;  %1063 = vrot.lane.b32.xlu2 %v4537_v3, %s3281_s28 }
 0x498   :  { %1121 = vrot.lane.b32.xlu1 %v4460_v40, %s3279_s1 }
 0x499   :  { %v4589_v25 = vpop.permute.xlu2 %1221  ;;  %v4591_v35 = vpop.permute.xlu0 %1053 }
 0x49a   :  { %v4593_v1 = vpop.permute.xlu1 %1085 }
 0x49f   :  { %1347 = vperm.xlu0 %3273, %v1343_v8   ;;  %1123 = vrot.lane.b32.xlu2 %v4506_v18, %s3279_s1 }
 0x4a0   :  { %1091 = vrot.lane.b32.xlu1 %v4506_v18, %s3282_s29 }
 0x4a1   :  { %v4602_v51 = vpop.permute.xlu2 %1093  ;;  %v4604_v28 = vpop.permute.xlu0 %1277 }
 0x4a2   :  { %7709 = vst [vmem:[#allocation45_spill] sm:$0xff] %v4602_v51  ;;  %v4606_v2 = vpop.permute.xlu1 %1179 }
 0x4a7   :  { %1059 = vrot.lane.b32.xlu2 %v4506_v18, %s3281_s28 }
 0x4a8   :  { %1057 = vrot.lane.b32.xlu1 %v4460_v40, %s3281_s28 }
 0x4a9   :  { %v4612_v26 = vpop.permute.xlu2 %1281  ;;  %v1148_v8 = vpop.permute.xlu0 %1147 }
 0x4aa   :  { %v4614_v32 = vpop.permute.xlu1 %1115 }
 0x4b1   :  { %v1248_v36 = vpop.permute.xlu2 %1247  ;;  %v4619_v3 = vpop.permute.xlu0 %1083 }
 0x4b2   :  { %v4621_v45 = vpop.permute.xlu1 %1275  ;;  %v1262_v33 = vsel %vm199_vm3, %v4531_v57, %v1248_v36 }
 0x4b3   :  { %v1269_v54 = vmul.f32 %v1262_v33, %v4218_v48 }
 0x4b5   :  { %v1333_v61 = vpack.c.bf16 %v1269_v54, %v1265_v6 }
 0x4b7   :  { %1368 = vmatpush.bf16.msra.mxu0 %v1333_v61 }
 0x4b9   :  { %v4628_v20 = vpop.permute.xlu2 %1151  ;;  %v4630_v12 = vpop.permute.xlu0 %1253 }
 0x4ba   :  { %v4632_v55 = vpop.permute.xlu1 %1249 }
 0x4bb   :  { %v1259_v63 = vsel %vm199_vm3, %v1246_v59, %v4632_v55 }
 0x4bc   :  { %v1266_v33 = vmul.f32 %v1259_v63, %v4143_v58 }
 0x4c1   :  { %v4634_v49 = vpop.permute.xlu2 %1087  ;;  %v4636_v0 = vpop.permute.xlu0 %1125 }
 0x4c2   :  { %v4638_v4 = vpop.permute.xlu1 %1157 }
 0x4c9   :  { %v4643_v57 = vpop.permute.xlu2 %1251  ;;  %v4645_v54 = vpop.permute.xlu0 %1119 }
 0x4ca   :  { %v4647_v61 = vpop.permute.xlu1 %1189  ;;  %v1260_v6 = vsel %vm199_vm3, %v1248_v36, %v4643_v57  ;;  %v1229_v36 = vsel %vm171_vm2, %v4549_v10, %v1214_v11 }
 0x4cb   :  { %v1270_v48 = vmul.f32 %v1260_v6, %v4143_v58  ;;  %v1233_v6 = vmul.f32 %v1229_v36, %v4222_v39  ;;  %v1197_v36 = vsel %vm143_vm4, %v4533_v43, %v4579_v22 }
 0x4cd   :  { %v1334_v18 = vpack.c.bf16 %v1270_v48, %v1266_v33  ;;  %v1234_v33 = vmul.f32 %v1227_v24, %v4138_v60 }
 0x4cf   :  { %1396 = vmatpush.bf16.msra.mxu2 %v1334_v18 }
 0x4d1   :  { %v4654_v40 = vpop.permute.xlu0 %1219  ;;  %v4658_v59 = vpop.permute.xlu2 %1153 }
 0x4d2   :  { %v4656_v29 = vpop.permute.xlu1 %1061  ;;  %7711 = vst [vmem:[#allocation47_spill] sm:$0xff] %v4658_v59  ;;  %v1195_v59 = vsel %vm143_vm4, %v4579_v22, %v4577_v17 }
 0x4d3   :  { %7710 = vst [vmem:[#allocation46_spill] sm:$0xff] %v4656_v29 }
 0x4d9   :  { %v4666_v51 = vpop.permute.xlu0 %1187  ;;  %v4688_v24 = vpop.permute.xlu2 %1159 }
 0x4da   :  { %v1216_v63 = vpop.permute.xlu1 %1215 }
 0x4db   :  { %v1228_v48 = vsel %vm171_vm2, %v1216_v63, %v4654_v40  ;;  %v1230_v18 = vsel %vm171_vm2, %v4545_v9, %v1216_v63 }
 0x4dc   :  { %v1237_v58 = vmul.f32 %v1230_v18, %v4222_v39  ;;  %v1238_v29 = vmul.f32 %v1228_v48, %v4138_v60  ;;  %v1202_v48 = vmul.f32 %v1195_v59, %v4230_v56  ;;  %v1166_v60 = vsel %vm115_vm6, %v1148_v8, %v4628_v20 }
 0x4dd   :  { %v1168_v39 = vsel %vm115_vm6, %v4688_v24, %v1148_v8  ;;  %v1165_v59 = vsel %vm115_vm6, %v4504_v42, %v4581_v30  ;;  %v1322_v8 = vpack.c.bf16 %v4495_v38, %v4426_v52 }
 0x4de   :  { %v1329_v11 = vpack.c.bf16 %v1237_v58, %v1233_v6  ;;  %v1330_v10 = vpack.c.bf16 %v1238_v29, %v1234_v33 }
 0x4e0   :  { %1369 = vmatpush.bf16.msra.mxu0 %v1329_v11  ;;  %1397 = vmatpush.bf16.msra.mxu2 %v1330_v10  ;;  %v1201_v10 = vmul.f32 %v1197_v36, %v4298_v47  ;;  %v1167_v36 = vsel %vm115_vm6, %v4638_v4, %v4504_v42 }
 0x4e1   :  { %v4686_v63 = vpop.permute.xlu0 %1089  ;;  %v1169_v42 = vmul.f32 %v1167_v36, %v4356_v16 }
 0x4e2   :  { %v1184_v18 = vpop.permute.xlu1 %1183 }
 0x4e3   :  { %v1196_v58 = vsel %vm143_vm4, %v1184_v18, %v4666_v51  ;;  %v1198_v29 = vsel %vm143_vm4, %v4606_v2, %v1184_v18 }
 0x4e4   :  { %v1205_v6 = vmul.f32 %v1198_v29, %v4298_v47  ;;  %v1206_v22 = vmul.f32 %v1196_v58, %v4230_v56  ;;  %v1174_v58 = vmul.f32 %v1166_v60, %v4215_v15  ;;  %v1173_v29 = vmul.f32 %v1168_v39, %v4356_v16 }
 0x4e5   :  { %v7712_v60 = vpack.c.bf16 %v4416_v27, %v4405_v14  ;;  %v1133_v39 = vsel %vm87_vm5, %v4547_v62, %v4522_v21  ;;  %v1101_v14 = vsel %vm59_vm8, %v4514_v53, %v4593_v1  ;;  %v1293_v27 = vsel %vm227_vm0, %v4559_v50, %v4604_v28 }
 0x4e6   :  { %v1325_v33 = vpack.c.bf16 %v1205_v6, %v1201_v10  ;;  %v1326_v11 = vpack.c.bf16 %v1206_v22, %v1202_v48  ;;  %v1134_v48 = vsel %vm87_vm5, %v4614_v32, %v4645_v54  ;;  %v1170_v6 = vmul.f32 %v1165_v59, %v4215_v15  ;;  %v4728_v22 = vpop.permute.xlu2 %1285 }
 0x4e7   :  { %v1142_v52 = vmul.f32 %v1134_v48, %v4225_v31  ;;  %v1317_v38 = vpack.c.bf16 %v1173_v29, %v1169_v42  ;;  %v1138_v59 = vmul.f32 %v1133_v39, %v4225_v31  ;;  %v1106_v42 = vmul.f32 %v1101_v14, %v4319_v41  ;;  %v3253_v14 = vld [vmem:[%s7433_s2 + $0x34] sm:$0xf] }
 0x4e8   :  { %1370 = vmatpush.bf16.msra.mxu0 %v1325_v33  ;;  %1398 = vmatpush.bf16.msra.mxu2 %v1326_v11  ;;  %v1318_v33 = vpack.c.bf16 %v1174_v58, %v1170_v6  ;;  %v1102_v11 = vsel %vm59_vm8, %v4619_v3, %v4634_v49 }
 0x4e9   :  { %v4714_v18 = vpop.permute.xlu0 %1223  ;;  %v1110_v58 = vmul.f32 %v1102_v11, %v4319_v41 }
 0x4ea   :  { %v4718_v10 = vpop.permute.xlu1 %1055 }
 0x4eb   :  { %v1070_v48 = vsel %vm32_vm7, %v4557_v46, %v4718_v10 }
 0x4ec   :  { %1371 = vmatpush.bf16.msra.mxu0 %v7712_v60  ;;  %1399 = vmatpush.bf16.msra.mxu2 %v1322_v8  ;;  %v1314_v8 = vpack.c.bf16 %v1142_v52, %v1138_v59  ;;  %v1297_v60 = vmul.f32 %v1293_v27, %v4117_v5  ;;  %v1069_v52 = vsel %vm32_vm7, %v4561_v13, %v4591_v35  ;;  %v3172_v27 = vld [vmem:[%s7433_s2 + $0x38] sm:$0xf0] }
 0x4ed   :  { %v1310_v59 = vpack.c.bf16 %v1110_v58, %v1106_v42  ;;  %v3170_v58 = vld [vmem:[%s7433_s2 + $0x30] sm:$0xf]  ;;  %v1257_v42 = vsel %vm199_vm3, %v4632_v55, %v4630_v12  ;;  %v1226_v55 = vsel %vm171_vm2, %v4654_v40, %v4714_v18  ;;  %v1225_v40 = vsel %vm171_vm2, %v4569_v34, %v4589_v25 }
 0x4ee   :  { %v1135_v34 = vsel %vm87_vm5, %v4636_v0, %v4547_v62 }
 0x4f0   :  { %1372 = vmatpush.bf16.msra.mxu0 %v1317_v38  ;;  %1400 = vmatpush.bf16.msra.mxu2 %v1318_v33  ;;  %v1078_v38 = vmul.f32 %v1070_v48, %v4327_v44  ;;  %v4769_v33 = vpop.permute.xlu2 %1191  ;;  %v3254_v48 = vld [vmem:[%s7433_s2 + $0x34] sm:$0xf0] }
 0x4f1   :  { %v4751_v36 = vpop.permute.xlu0 %1095 }
 0x4f2   :  { %v1280_v29 = vpop.permute.xlu1 %1279  ;;  %v1104_v62 = vsel %vm59_vm8, %v4751_v36, %v4619_v3  ;;  %v1289_v3 = vsel %vm227_vm0, %v4612_v26, %v4728_v22 }
 0x4f3   :  { %v1294_v6 = vsel %vm227_vm0, %v4621_v45, %v1280_v29 }
 0x4f4   :  { %v1301_v39 = vmul.f32 %v1294_v6, %v4117_v5  ;;  %1401 = vmatpush.bf16.msra.mxu2 %v1314_v8  ;;  %v1291_v8 = vsel %vm227_vm0, %v4604_v28, %v4612_v26  ;;  %v1074_v6 = vmul.f32 %v1069_v52, %v4327_v44  ;;  %v4794_v28 = vor.u32 %v3253_v14, %v3172_v27  ;;  %v7713_v52 = vld [vmem:[#allocation9_spill] sm:$0xff] }
 0x4f6   :  { %v1337_v11 = vpack.c.bf16 %v1301_v39, %v1297_v60  ;;  %v1344_v39 = vld [vmem:[%s7432_s3 + $0x38] sm:$0xff]  ;;  %v1306_v41 = vpack.c.bf16 %v1078_v38, %v1074_v6 }
 0x4f7   :  { %1352 = vperm.xlu1 %3274, %v1344_v39  }
 0x4f8   :  { %1389 = vmatpush.bf16.msra.mxu1 %v1337_v11  ;;  %1402 = vmatpush.bf16.msra.mxu2 %v1310_v59  ;;  %v1298_v11 = vmul.f32 %v1291_v8, %v7713_v52  ;;  %v4811_v8 = vor.u32 %v3254_v48, %v3170_v58  ;;  %v1235_v58 = vmul.f32 %v1225_v40, %v4119_v19 }
 0x4f9   :  { %v4792_v60 = vpop.permute.xlu0 %1283  ;;  %v1193_v48 = vsel %vm143_vm4, %v4577_v17, %v4647_v61 }
 0x4fa   :  { %v1256_v59 = vpop.permute.xlu1 %1255  ;;  %v1292_v44 = vsel %vm227_vm0, %v1280_v29, %v4792_v60  ;;  %v1267_v29 = vmul.f32 %v1257_v42, %v4112_v37  ;;  %v1203_v40 = vmul.f32 %v1193_v48, %v4153_v23  ;;  %v7717_v48 = vld [vmem:[#allocation38_spill] sm:$0xff] }
 0x4fb   :  { %v1258_v14 = vsel %vm199_vm3, %v4643_v57, %v1256_v59  ;;  %v1302_v27 = vmul.f32 %v1292_v44, %v7713_v52  ;;  %3176 = vmatmul.msk.bf16.vlgmr.msra.gmra.mxu1 %vm1364_vm10, %v4794_v28  ;;  %v1239_v57 = vmul.f32 %v1226_v55, %v4119_v19  ;;  %v1194_v44 = vsel %vm143_vm4, %v4666_v51, %v4769_v33 }
 0x4fc   :  { %v1271_v38 = vmul.f32 %v1258_v14, %v4112_v37  ;;  %1403 = vmatpush.bf16.msra.mxu2 %v1306_v41  ;;  %v4828_v41 = vpop.permute.xlu2 %1063  ;;  %v1207_v51 = vmul.f32 %v1194_v44, %v4153_v23  ;;  %v7714_v14 = vld [vmem:[#allocation45_spill] sm:$0xff] }
 0x4fd   :  { %v1338_v6 = vpack.c.bf16 %v1302_v27, %v1298_v11  ;;  %v1331_v55 = vpack.c.bf16 %v1239_v57, %v1235_v58  ;;  %v1103_v27 = vsel %vm59_vm8, %v7714_v14, %v4514_v53  ;;  %v1072_v53 = vsel %vm32_vm7, %v4828_v41, %v4557_v46  ;;  %v7716_v57 = vld [vmem:[#allocation8_spill] sm:$0xff]  ;;  %v7720_v46 = vld [vmem:[#allocation47_spill] sm:$0xff] }
 0x4fe   :  { %v1335_v39 = vpack.c.bf16 %v1271_v38, %v1267_v29  ;;  %v7715_v29 = vld [vmem:[#allocation7_spill] sm:$0xff]  ;;  %v1327_v58 = vpack.c.bf16 %v1207_v51, %v1203_v40  ;;  %v1163_v51 = vsel %vm115_vm6, %v4581_v30, %v7720_v46  ;;  %v7723_v40 = vld [vmem:[#allocation2_spill] sm:$0xff] }
 0x4ff   :  { %1404 = vmatmul.bf16.vlgmr.msra.gmra.mxu2 %v4811_v8  ;;  %1417 = vmatpush.bf16.msra.mxu3 %v1338_v6  ;;  %v1137_v38 = vmul.f32 %v1135_v34, %v7715_v29  ;;  %v1105_v34 = vmul.f32 %v1103_v27, %v7716_v57  ;;  %v7726_v30 = vld [vmem:[#allocation22_spill] sm:$0xff] }
 0x500   :  { %1424 = vmatpush.bf16.msrb.mxu1 %v1335_v39  ;;  %v1109_v39 = vmul.f32 %v1104_v62, %v7716_v57  ;;  %v7721_v62 = vld [vmem:[#allocation41_spill] sm:$0xff]  ;;  %v1171_v57 = vmul.f32 %v1163_v51, %v7726_v30 }
 0x501   :  { %v4838_v42 = vpop.permute.xlu0 %1155  ;;  %v1264_v27 = vsel %vm199_vm3, %v1256_v59, %v7721_v62 }
 0x502   :  { %v4841_v11 = vpop.permute.xlu1 %1127  ;;  %3177 = vmatmul.msk.bf16.vlgmr.msra.gmra.mxu3 %vm1364_vm10, %v4794_v28  ;;  %v1164_v26 = vsel %vm115_vm6, %v4628_v20, %v4838_v42  ;;  %v7722_v20 = vld [vmem:[#allocation46_spill] sm:$0xff] }
 0x503   :  { %v1136_v17 = vsel %vm87_vm5, %v4841_v11, %v4614_v32  ;;  %v1295_v32 = vsel %vm227_vm0, %v4728_v22, %v4559_v50  ;;  %v7719_v50 = vld [vmem:[#allocation42_spill] sm:$0xff]  ;;  %v1175_v37 = vmul.f32 %v1164_v26, %v7726_v30 }
 0x504   :  { %v1141_v6 = vmul.f32 %v1136_v17, %v7715_v29  ;;  %1425 = vmatpush.bf16.msrb.mxu1 %v1331_v55  ;;  %v7718_v55 = vld [vmem:[#allocation40_spill] sm:$0xff]  ;;  %v1263_v22 = vsel %vm199_vm3, %v4630_v12, %v7719_v50  ;;  %v4898_v19 = vpop.permute.xlu2 %1123 }
 0x505   :  { %v1323_v17 = vpack.c.bf16 %v7718_v55, %v7717_v48  ;;  %v7724_v48 = vld [vmem:[#allocation15_spill] sm:$0xff]  ;;  %v7725_v55 = vld [vmem:[#allocation4_spill] sm:$0xff] }
 0x506   :  { %v1313_v44 = vpack.c.bf16 %v1141_v6, %v1137_v38  ;;  %v1071_v38 = vsel %vm32_vm7, %v7722_v20, %v4561_v13  ;;  %v1299_v6 = vmul.f32 %v1289_v3, %v7723_v40  ;;  %v1300_v12 = vmul.f32 %v1295_v32, %v7724_v48  ;;  %v7727_v3 = vld [vmem:[#allocation24_spill] sm:$0xff] }
 0x507   :  { %v1077_v50 = vmul.f32 %v1072_v53, %v7725_v55  ;;  %v1073_v62 = vmul.f32 %v1071_v38, %v7725_v55 }
 0x508   :  { %1373 = vmatpush.bf16.msra.mxu0 %v1313_v44  ;;  %1426 = vmatpush.bf16.msrb.mxu1 %v1327_v58  ;;  %v1309_v44 = vpack.c.bf16 %v1109_v39, %v1105_v34  ;;  %v1272_v58 = vmul.f32 %v1264_v27, %v7727_v3  ;;  %v7728_v34 = vld [vmem:[#allocation44_spill] sm:$0xff]  ;;  %v7729_v27 = vld [vmem:[#allocation21_spill] sm:$0xff] }
 0x509   :  { %v1288_v23 = vpop.permute.xlu0 %1287  ;;  %v1231_v51 = vsel %vm171_vm2, %v4589_v25, %v7728_v34  ;;  %v7736_v34 = vld [vmem:[#allocation23_spill] sm:$0xff] }
 0x50a   :  { %v1122_v52 = vpop.permute.xlu1 %1121  ;;  %v1290_v59 = vsel %vm227_vm0, %v4792_v60, %v1288_v23  ;;  %v1296_v13 = vsel %vm227_vm0, %v1288_v23, %v4621_v45  ;;  %v1232_v23 = vsel %vm171_vm2, %v4714_v18, %v4545_v9  ;;  %v1268_v45 = vmul.f32 %v1263_v22, %v7727_v3  ;;  %v7730_v18 = vld [vmem:[#allocation20_spill] sm:$0xff] }
 0x50b   :  { %v1131_v32 = vsel %vm87_vm5, %v4522_v21, %v1122_v52  ;;  %v1303_v53 = vmul.f32 %v1290_v59, %v7723_v40  ;;  %v1304_v26 = vmul.f32 %v1296_v13, %v7724_v48  ;;  %v1132_v21 = vsel %vm87_vm5, %v4645_v54, %v4898_v19 }
 0x50c   :  { %1374 = vmatpush.bf16.msra.mxu0 %v1309_v44  ;;  %1427 = vmatpush.bf16.msrb.mxu1 %v1323_v17  ;;  %v1139_v38 = vmul.f32 %v1131_v32, %v7729_v27  ;;  %v1305_v59 = vpack.c.bf16 %v1077_v50, %v1073_v62  ;;  %v1319_v9 = vpack.c.bf16 %v1175_v37, %v1171_v57  ;;  %v7732_v44 = vld [vmem:[#allocation26_spill] sm:$0xff]  ;;  %v1060_v32 = vpop.permute.xlu2 %1059 }
 0x50d   :  { %v1339_v60 = vpack.c.bf16 %v1303_v53, %v1299_v6  ;;  %v1340_v39 = vpack.c.bf16 %v1304_v26, %v1300_v12  ;;  %v1240_v17 = vmul.f32 %v1232_v23, %v7730_v18  ;;  %v1336_v13 = vpack.c.bf16 %v1272_v58, %v1268_v45  ;;  %v7733_v45 = vld [vmem:[#allocation3_spill] sm:$0xff] }
 0x50e   :  { %v1200_v54 = vsel %vm143_vm4, %v4769_v33, %v4606_v2  ;;  %v1143_v22 = vmul.f32 %v1132_v21, %v7729_v27  ;;  %v1236_v25 = vmul.f32 %v1231_v51, %v7730_v18  ;;  %v1099_v37 = vsel %vm59_vm8, %v4593_v1, %v4686_v63  ;;  %v7731_v2 = vld [vmem:[#allocation25_spill] sm:$0xff]  ;;  %v7753_v27 = vld [vmem:[#allocation18_spill] sm:$0xff] }
 0x50f   :  { %1445 = vmatpush.bf16.msrb.mxu3 %v1339_v60  ;;  %1473 = vmatpush.bf16.msrb.mxu2 %v1340_v39  ;;  %v1199_v57 = vsel %vm143_vm4, %v4647_v61, %v4533_v43  ;;  %v1208_v33 = vmul.f32 %v1200_v54, %v7731_v2  ;;  %v1107_v58 = vmul.f32 %v1099_v37, %v7732_v44  ;;  %v7734_v39 = vld [vmem:[#allocation39_spill] sm:$0xff]  ;;  %v7738_v54 = vld [vmem:[#allocation5_spill] sm:$0xff] }
 0x510   :  { %1375 = vmatpush.bf16.msra.mxu0 %v1305_v59  ;;  %1428 = vmatpush.bf16.msrb.mxu1 %v1319_v9  ;;  %v1315_v12 = vpack.c.bf16 %v1143_v22, %v1139_v38  ;;  %v1332_v50 = vpack.c.bf16 %v1240_v17, %v1236_v25  ;;  %v1204_v61 = vmul.f32 %v1199_v57, %v7731_v2  ;;  %v7737_v59 = vld [vmem:[#allocation6_spill] sm:$0xff]  ;;  %v7739_v37 = vld [vmem:[#allocation29_spill] sm:$0xff] }
 0x511   :  { %v1162_v26 = vsel %vm115_vm6, %v4838_v42, %v4688_v24  ;;  %v1161_v62 = vsel %vm115_vm6, %v7720_v46, %v4638_v4  ;;  %v7735_v24 = vld [vmem:[#allocation43_spill] sm:$0xff]  ;;  %v1130_v46 = vsel %vm87_vm5, %v4898_v19, %v4841_v11  ;;  %v1066_v25 = vsel %vm32_vm7, %v1060_v32, %v4828_v41 }
 0x512   :  { %v1092_v6 = vpop.permute.xlu1 %1091  ;;  %3178 = vmatmul.msk.bf16.vlgmr.msrb.gmra.mxu3 %vm1364_vm10, %v4794_v28  ;;  %3179 = vmatmul.msk.bf16.vlgmr.msrb.gmra.mxu2 %vm1364_vm10, %v4794_v28  ;;  %v1328_v28 = vpack.c.bf16 %v1208_v33, %v1204_v61  ;;  %v1176_v21 = vmul.f32 %v1162_v26, %v7733_v45  ;;  %v1324_v42 = vpack.c.bf16 %v7735_v24, %v7734_v39  ;;  %v5004_v33 = vpop.permute.xlu0 %1347 }
 0x513   :  { %v1100_v1 = vsel %vm59_vm8, %v4634_v49, %v1092_v6  ;;  %1376 = vmatmul.bf16.vlgmr.msra.gmra.mxu0 %v4811_v8  ;;  %v1068_v49 = vsel %vm32_vm7, %v4718_v10, %v1060_v32  ;;  %v1129_v10 = vsel %vm87_vm5, %v1122_v52, %v4636_v0  ;;  %v1172_v4 = vmul.f32 %v1161_v62, %v7733_v45 }
 0x514   :  { %1452 = vmatpush.bf16.msrb.mxu0 %v1336_v13  ;;  %v1111_v43 = vmul.f32 %v1100_v1, %v7732_v44  ;;  %1429 = vmatpush.bf16.msrb.mxu1 %v1315_v12  ;;  %v1079_v51 = vmul.f32 %v1068_v49, %v7736_v34  ;;  %v1140_v9 = vmul.f32 %v1129_v10, %v7737_v59 }
 0x515   :  { %v1320_v17 = vpack.c.bf16 %v1176_v21, %v1172_v4  ;;  %v1098_v13 = vsel %vm59_vm8, %v1092_v6, %v4751_v36  ;;  %v1144_v0 = vmul.f32 %v1130_v46, %v7737_v59  ;;  %v1097_v52 = vsel %vm59_vm8, %v4686_v63, %v7714_v14 }
 0x516   :  { %v1311_v53 = vpack.c.bf16 %v1111_v43, %v1107_v58  ;;  %v1112_v22 = vmul.f32 %v1098_v13, %v7738_v54  ;;  %v1108_v36 = vmul.f32 %v1097_v52, %v7738_v54  ;;  %v1080_v63 = vmul.f32 %v1066_v25, %v7739_v37 }
 0x517   :  { %v1316_v19 = vpack.c.bf16 %v1144_v0, %v1140_v9 }
 0x518   :  { %1453 = vmatpush.bf16.msrb.mxu0 %v1332_v50  ;;  %1430 = vmatpush.bf16.msrb.mxu1 %v1311_v53  ;;  %v1312_v6 = vpack.c.bf16 %v1112_v22, %v1108_v36 }
 0x51a   :  { %v1058_v23 = vpop.permute.xlu1 %1057 }
 0x51b   :  { %v1067_v60 = vsel %vm32_vm7, %v4591_v35, %v1058_v23  ;;  %v1065_v11 = vsel %vm32_vm7, %v1058_v23, %v7722_v20 }
 0x51c   :  { %1454 = vmatpush.bf16.msrb.mxu0 %v1328_v28  ;;  %v1075_v38 = vmul.f32 %v1067_v60, %v7736_v34  ;;  %v1076_v57 = vmul.f32 %v1065_v11, %v7739_v37  ;;  %v1783_v34 = vld [vmem:[%s7432_s3 + $0x48] sm:$0xff] }
 0x51e   :  { %v1307_v35 = vpack.c.bf16 %v1079_v51, %v1075_v38  ;;  %v1308_v14 = vpack.c.bf16 %v1080_v63, %v1076_v57 }
 0x520   :  { %1455 = vmatpush.bf16.msrb.mxu0 %v1324_v42  ;;  %1431 = vmatpush.bf16.msrb.mxu1 %v1307_v35 }
 0x523   :  { %1432 = vmatmul.bf16.vlgmr.msrb.gmra.mxu1 %v4811_v8 }
 0x524   :  { %1456 = vmatpush.bf16.msrb.mxu0 %v1320_v17 }
 0x528   :  { %1457 = vmatpush.bf16.msrb.mxu0 %v1316_v19 }
 0x52c   :  { %1458 = vmatpush.bf16.msrb.mxu0 %v1312_v6 }
 0x530   :  { %1459 = vmatpush.bf16.msrb.mxu0 %v1308_v14 }
 0x533   :  { %1460 = vmatmul.bf16.vlgmr.msrb.gmra.mxu0 %v4811_v8 }
 0x569   :  { %v5009_v41 = vpop.permute.xlu1 %1352 }
 0x578   :  { %v1391_v12 = vpop.f32.mrf.mxu1 }
 0x580   :  { %v1393_v61 = vpop.f32.mrf.mxu1 }
 0x582   :  { %v1405_v24 = vpop.f32.mrf.mxu2 }
 0x583   :  { %v1406_v42 = vadd.f32 %v1405_v24, %v5004_v33 }
 0x585   :  { %v1419_v20 = vpop.f32.mrf.mxu3 }
 0x586   :  { %v1420_v51 = vadd.f32 %v1419_v20, %v1406_v42 }
 0x588   :  { %v5048_v10 = vmax.f32 %v1420_v51, 0.0 }
 0x58a   :  { %v1407_v17 = vpop.f32.mrf.mxu2 }
 0x58b   :  { %v1408_v13 = vadd.f32 %v1407_v17, %v5009_v41 }
 0x58d   :  { %v1421_v53 = vpop.f32.mrf.mxu3 }
 0x58e   :  { %v1422_v0 = vadd.f32 %v1421_v53, %v1408_v13  ;;  %v1782_v13 = vld [vmem:[%s7432_s3 + $0x40] sm:$0xff] }
 0x590   :  { %v1377_v1 = vpop.f32.mrf.mxu0  ;;  %v5084_v52 = vmax.f32 %v1422_v0, 0.0 }
 0x591   :  { %v1378_v50 = vadd.f32 %v1377_v1, %v5004_v33 }
 0x593   :  { %v1392_v58 = vadd.f32 %v1391_v12, %v1378_v50 }
 0x595   :  { %v5007_v43 = vmax.f32 %v1392_v58, 0.0  ;;  %v1447_v21 = vpop.f32.mrf.mxu3  ;;  %v1475_v19 = vpop.f32.mrf.mxu2 }
 0x597   :  { %1616 = vrot.lane.b32.xlu1 %v5007_v43, %s3278_s26  ;;  %1648 = vrot.lane.b32.xlu0 %v5007_v43, %s3276_s22 }
 0x598   :  { %1680 = vrot.lane.b32.xlu2 %v5007_v43, %s3277_s23  ;;  %v1379_v8 = vpop.f32.mrf.mxu0 }
 0x599   :  { %v1380_v32 = vadd.f32 %v1379_v8, %v5009_v41 }
 0x59b   :  { %v1394_v28 = vadd.f32 %v1393_v61, %v1380_v32 }
 0x59d   :  { %v5018_v26 = vmax.f32 %v1394_v28, 0.0  ;;  %v1449_v46 = vpop.f32.mrf.mxu3  ;;  %v1477_v14 = vpop.f32.mrf.mxu2 }
 0x59f   :  { %1712 = vrot.lane.b32.xlu0 %v5007_v43, %s3275_s21 }
 0x5a0   :  { %1584 = vrot.lane.b32.xlu2 %v5007_v43, %s3280_s27  ;;  %v1433_v62 = vpop.f32.mrf.mxu1 }
 0x5a1   :  { %v1434_v23 = vadd.f32 %v1433_v62, %v5004_v33 }
 0x5a3   :  { %v1448_v60 = vadd.f32 %v1447_v21, %v1434_v23 }
 0x5a5   :  { %v5027_v39 = vmax.f32 %v1448_v60, 0.0 }
 0x5a7   :  { %7740 = vst [vmem:[#allocation45_spill] sm:$0xff] %v5027_v39  ;;  %1720 = vrot.lane.b32.xlu1 %v5027_v39, %s3275_s21  ;;  %1688 = vrot.lane.b32.xlu0 %v5027_v39, %s3277_s23 }
 0x5a8   :  { %1552 = vrot.lane.b32.xlu2 %v5007_v43, %s3279_s1  ;;  %v1435_v38 = vpop.f32.mrf.mxu1 }
 0x5a9   :  { %v1436_v4 = vadd.f32 %v1435_v38, %v5009_v41 }
 0x5ab   :  { %v1450_v35 = vadd.f32 %v1449_v46, %v1436_v4 }
 0x5ad   :  { %v5063_v9 = vmax.f32 %v1450_v35, 0.0 }
 0x5af   :  { %1650 = vrot.lane.b32.xlu1 %v5018_v26, %s3276_s22  ;;  %1656 = vrot.lane.b32.xlu0 %v5027_v39, %s3276_s22  ;;  %7741 = vst [vmem:[#allocation7_spill] sm:$0xff] %v5063_v9 }
 0x5b0   :  { %1520 = vrot.lane.b32.xlu2 %v5007_v43, %s3282_s29  ;;  %v1461_v22 = vpop.f32.mrf.mxu0 }
 0x5b1   :  { %v1462_v11 = vadd.f32 %v1461_v22, %v5004_v33 }
 0x5b3   :  { %v1476_v36 = vadd.f32 %v1475_v19, %v1462_v11 }
 0x5b5   :  { %v5101_v6 = vmax.f32 %v1476_v36, 0.0 }
 0x5b7   :  { %1714 = vrot.lane.b32.xlu1 %v5018_v26, %s3275_s21  ;;  %1624 = vrot.lane.b32.xlu0 %v5027_v39, %s3278_s26  ;;  %7742 = vst [vmem:[#allocation38_spill] sm:$0xff] %v5101_v6 }
 0x5b8   :  { %1488 = vrot.lane.b32.xlu2 %v5007_v43, %s3281_s28  ;;  %v1463_v57 = vpop.f32.mrf.mxu0 }
 0x5b9   :  { %v1464_v63 = vadd.f32 %v1463_v57, %v5009_v41 }
 0x5bb   :  { %v1478_v12 = vadd.f32 %v1477_v14, %v1464_v63  ;;  %v7749_v14 = vld [vmem:[#allocation17_spill] sm:$0xff] }
 0x5bd   :  { %v5112_v20 = vmax.f32 %v1478_v12, 0.0 }
 0x5bf   :  { %1684 = vrot.lane.b32.xlu1 %v5048_v10, %s3277_s23  ;;  %1682 = vrot.lane.b32.xlu0 %v5018_v26, %s3277_s23  ;;  %7743 = vst [vmem:[#allocation40_spill] sm:$0xff] %v5112_v20 }
 0x5c0   :  { %1618 = vrot.lane.b32.xlu2 %v5018_v26, %s3278_s26 }
 0x5c7   :  { %1492 = vrot.lane.b32.xlu1 %v5048_v10, %s3281_s28  ;;  %1586 = vrot.lane.b32.xlu0 %v5018_v26, %s3280_s27 }
 0x5c8   :  { %1652 = vrot.lane.b32.xlu2 %v5048_v10, %s3276_s22 }
 0x5cf   :  { %1690 = vrot.lane.b32.xlu1 %v5063_v9, %s3277_s23  ;;  %1554 = vrot.lane.b32.xlu0 %v5018_v26, %s3279_s1 }
 0x5d0   :  { %1556 = vrot.lane.b32.xlu2 %v5048_v10, %s3279_s1 }
 0x5d7   :  { %1658 = vrot.lane.b32.xlu1 %v5063_v9, %s3276_s22  ;;  %1522 = vrot.lane.b32.xlu0 %v5018_v26, %s3282_s29 }
 0x5d8   :  { %1716 = vrot.lane.b32.xlu2 %v5048_v10, %s3275_s21 }
 0x5df   :  { %1626 = vrot.lane.b32.xlu1 %v5063_v9, %s3278_s26  ;;  %1490 = vrot.lane.b32.xlu0 %v5018_v26, %s3281_s28 }
 0x5e0   :  { %1722 = vrot.lane.b32.xlu2 %v5063_v9, %s3275_s21 }
 0x5e7   :  { %1622 = vrot.lane.b32.xlu1 %v5084_v52, %s3278_s26  ;;  %1620 = vrot.lane.b32.xlu0 %v5048_v10, %s3278_s26 }
 0x5e8   :  { %1686 = vrot.lane.b32.xlu2 %v5084_v52, %s3277_s23 }
 0x5ef   :  { %1590 = vrot.lane.b32.xlu1 %v5084_v52, %s3280_s27  ;;  %1588 = vrot.lane.b32.xlu0 %v5048_v10, %s3280_s27 }
 0x5f0   :  { %1494 = vrot.lane.b32.xlu2 %v5084_v52, %s3281_s28 }
 0x5f2   :  { %v5099_v25 = vpop.permute.xlu2 %1680 }
 0x5f7   :  { %1526 = vrot.lane.b32.xlu1 %v5084_v52, %s3282_s29  ;;  %1524 = vrot.lane.b32.xlu0 %v5048_v10, %s3282_s29 }
 0x5f8   :  { %1660 = vrot.lane.b32.xlu2 %v5101_v6, %s3276_s22 }
 0x5fa   :  { %v5110_v33 = vpop.permute.xlu2 %1584 }
 0x5ff   :  { %1596 = vrot.lane.b32.xlu1 %v5101_v6, %s3280_s27  ;;  %1654 = vrot.lane.b32.xlu0 %v5084_v52, %s3276_s22 }
 0x600   :  { %1598 = vrot.lane.b32.xlu2 %v5112_v20, %s3280_s27 }
 0x602   :  { %v5120_v1 = vpop.permute.xlu2 %1552 }
 0x607   :  { %1564 = vrot.lane.b32.xlu1 %v5101_v6, %s3279_s1  ;;  %1558 = vrot.lane.b32.xlu0 %v5084_v52, %s3279_s1 }
 0x608   :  { %1566 = vrot.lane.b32.xlu2 %v5112_v20, %s3279_s1 }
 0x609   :  { %v5128_v50 = vpop.permute.xlu0 %1648  ;;  %v5138_v41 = vpop.permute.xlu1 %1616 }
 0x60a   :  { %7744 = vst [vmem:[#allocation42_spill] sm:$0xff] %v5128_v50  ;;  %v5130_v58 = vpop.permute.xlu2 %1520 }
 0x60b   :  { %7745 = vst [vmem:[#allocation47_spill] sm:$0xff] %v5138_v41 }
 0x60f   :  { %1532 = vrot.lane.b32.xlu1 %v5101_v6, %s3282_s29  ;;  %1718 = vrot.lane.b32.xlu0 %v5084_v52, %s3275_s21 }
 0x610   :  { %1534 = vrot.lane.b32.xlu2 %v5112_v20, %s3282_s29 }
 0x611   :  { %v5140_v61 = vpop.permute.xlu0 %1712 }
 0x612   :  { %v5142_v8 = vpop.permute.xlu2 %1488 }
 0x617   :  { %1500 = vrot.lane.b32.xlu1 %v5101_v6, %s3281_s28  ;;  %1628 = vrot.lane.b32.xlu0 %v5101_v6, %s3278_s26 }
 0x618   :  { %1502 = vrot.lane.b32.xlu2 %v5112_v20, %s3281_s28 }
 0x619   :  { %v5150_v32 = vpop.permute.xlu1 %1720  ;;  %v5152_v53 = vpop.permute.xlu0 %1688 }
 0x61a   :  { %v5154_v28 = vpop.permute.xlu2 %1618 }
 0x61b   :  { %7746 = vst [vmem:[#allocation41_spill] sm:$0xff] %v5154_v28 }
 0x61f   :  { %1692 = vrot.lane.b32.xlu1 %v5101_v6, %s3277_s23  ;;  %1662 = vrot.lane.b32.xlu0 %v5112_v20, %s3276_s22 }
 0x620   :  { %1694 = vrot.lane.b32.xlu2 %v5112_v20, %s3277_s23 }
 0x621   :  { %v5162_v62 = vpop.permute.xlu1 %1650  ;;  %v5164_v23 = vpop.permute.xlu0 %1656 }
 0x622   :  { %7747 = vst [vmem:[#allocation46_spill] sm:$0xff] %v5162_v62  ;;  %v1653_v21 = vpop.permute.xlu2 %1652 }
 0x623   :  { %7748 = vst [vmem:[#allocation4_spill] sm:$0xff] %v5164_v23 }
 0x627   :  { %1630 = vrot.lane.b32.xlu1 %v5112_v20, %s3278_s26  ;;  %1594 = vrot.lane.b32.xlu0 %v5063_v9, %s3280_s27 }
 0x628   :  { %1592 = vrot.lane.b32.xlu2 %v5027_v39, %s3280_s27 }
 0x629   :  { %v5172_v60 = vpop.permute.xlu1 %1714  ;;  %v5174_v24 = vpop.permute.xlu0 %1624 }
 0x62a   :  { %v5176_v42 = vpop.permute.xlu2 %1556 }
 0x62f   :  { %1560 = vrot.lane.b32.xlu1 %v5027_v39, %s3279_s1  ;;  %1528 = vrot.lane.b32.xlu0 %v5027_v39, %s3282_s29 }
 0x630   :  { %1562 = vrot.lane.b32.xlu2 %v5063_v9, %s3279_s1 }
 0x631   :  { %v1685_v51 = vpop.permute.xlu1 %1684  ;;  %v5184_v38 = vpop.permute.xlu0 %1682 }
 0x632   :  { %v5186_v4 = vpop.permute.xlu2 %1716  ;;  %v1698_v0 = vsel %vm199_vm3, %v1685_v51, %v5152_v53  ;;  %v1700_v22 = vsel %vm199_vm3, %v5099_v25, %v1685_v51 }
 0x633   :  { %v1704_v12 = vmul.f32 %v1700_v22, %v7749_v14 }
 0x637   :  { %1530 = vrot.lane.b32.xlu1 %v5063_v9, %s3282_s29  ;;  %1726 = vrot.lane.b32.xlu0 %v5112_v20, %s3275_s21 }
 0x638   :  { %1724 = vrot.lane.b32.xlu2 %v5101_v6, %s3275_s21  ;;  %v7754_v6 = vld [vmem:[#allocation12_spill] sm:$0xff] }
 0x639   :  { %v5194_v46 = vpop.permute.xlu1 %1492  ;;  %v5196_v35 = vpop.permute.xlu0 %1586 }
 0x63a   :  { %v5198_v17 = vpop.permute.xlu2 %1722 }
 0x63f   :  { %1496 = vrot.lane.b32.xlu1 %v5027_v39, %s3281_s28  ;;  %1786 = vperm.xlu0 %3273, %v1782_v13   ;;  %v7750_v13 = vld [vmem:[#allocation13_spill] sm:$0xff] }
 0x640   :  { %1498 = vrot.lane.b32.xlu2 %v5063_v9, %s3281_s28  ;;  %v1705_v49 = vmul.f32 %v1698_v0, %v7750_v13 }
 0x641   :  { %v5213_v19 = vpop.permute.xlu1 %1690  ;;  %v5215_v11 = vpop.permute.xlu0 %1554 }
 0x642   :  { %v1687_v36 = vpop.permute.xlu2 %1686 }
 0x643   :  { %v1699_v57 = vsel %vm199_vm3, %v1687_v36, %v5213_v19  ;;  %v1701_v63 = vsel %vm199_vm3, %v5184_v38, %v1687_v36 }
 0x644   :  { %v1708_v37 = vmul.f32 %v1701_v63, %v7749_v14  ;;  %v1709_v51 = vmul.f32 %v1699_v57, %v7750_v13 }
 0x646   :  { %v1772_v54 = vpack.c.bf16 %v1708_v37, %v1704_v12  ;;  %v1773_v44 = vpack.c.bf16 %v1709_v51, %v1705_v49  ;;  %v1666_v12 = vsel %vm171_vm2, %v1653_v21, %v5164_v23  ;;  %v1668_v51 = vsel %vm171_vm2, %v5128_v50, %v1653_v21 }
 0x647   :  { %1791 = vperm.xlu1 %3274, %v1783_v34   ;;  %v1672_v20 = vmul.f32 %v1668_v51, %v7753_v27  ;;  %v1673_v45 = vmul.f32 %v1666_v12, %v7754_v6 }
 0x648   :  { %1806 = vmatpush.bf16.msra.mxu3 %v1772_v54  ;;  %1834 = vmatpush.bf16.msra.mxu2 %v1773_v44 }
 0x649   :  { %v5230_v48 = vpop.permute.xlu1 %1658  ;;  %v5232_v36 = vpop.permute.xlu0 %1522 }
 0x64a   :  { %v5234_v22 = vpop.permute.xlu2 %1494 }
 0x651   :  { %v5236_v0 = vpop.permute.xlu1 %1626  ;;  %v5238_v63 = vpop.permute.xlu0 %1490 }
 0x652   :  { %7751 = vst [vmem:[#allocation44_spill] sm:$0xff] %v5236_v0  ;;  %v5240_v57 = vpop.permute.xlu2 %1660 }
 0x653   :  { %7752 = vst [vmem:[#allocation39_spill] sm:$0xff] %v5240_v57 }
 0x659   :  { %v1623_v13 = vpop.permute.xlu1 %1622  ;;  %v1621_v14 = vpop.permute.xlu0 %1620 }
 0x65a   :  { %v5242_v40 = vpop.permute.xlu2 %1598  ;;  %v1637_v30 = vsel %vm143_vm4, %v5154_v28, %v1623_v13  ;;  %v1636_v2 = vsel %vm143_vm4, %v5138_v41, %v1621_v14  ;;  %v1635_v12 = vsel %vm143_vm4, %v1623_v13, %v5236_v0  ;;  %v1634_v28 = vsel %vm143_vm4, %v1621_v14, %v5174_v24 }
 0x65b   :  { %v1644_v50 = vmul.f32 %v1637_v30, %v4298_v47  ;;  %v1640_v23 = vmul.f32 %v1636_v2, %v4298_v47 }
 0x661   :  { %v5244_v37 = vpop.permute.xlu1 %1590  ;;  %v5246_v34 = vpop.permute.xlu0 %1588 }
 0x662   :  { %v5248_v44 = vpop.permute.xlu2 %1566  ;;  %v1605_v2 = vsel %vm115_vm6, %v5196_v35, %v5244_v37 }
 0x669   :  { %v5250_v54 = vpop.permute.xlu1 %1526  ;;  %v5252_v49 = vpop.permute.xlu0 %1524 }
 0x66a   :  { %v5260_v59 = vpop.permute.xlu2 %1534 }
 0x671   :  { %v5264_v9 = vpop.permute.xlu1 %1596  ;;  %v1655_v39 = vpop.permute.xlu0 %1654 }
 0x672   :  { %v1667_v21 = vsel %vm171_vm2, %v1655_v39, %v5230_v48  ;;  %v1669_v51 = vsel %vm171_vm2, %v5162_v62, %v1655_v39  ;;  %v1645_v39 = vmul.f32 %v1635_v12, %v4230_v56  ;;  %v1641_v62 = vmul.f32 %v1634_v28, %v4230_v56  ;;  %v5290_v13 = vpop.permute.xlu2 %1502 }
 0x673   :  { %v1676_v18 = vmul.f32 %v1669_v51, %v7753_v27  ;;  %v1677_v41 = vmul.f32 %v1667_v21, %v7754_v6  ;;  %v1764_v51 = vpack.c.bf16 %v1644_v50, %v1640_v23  ;;  %v1606_v30 = vsel %vm115_vm6, %v5264_v9, %v5110_v33 }
 0x674   :  { %v1761_v50 = vpack.c.bf16 %v5084_v52, %v5048_v10  ;;  %v1613_v28 = vmul.f32 %v1605_v2, %v4215_v15  ;;  %v7755_v52 = vpack.c.bf16 %v5018_v26, %v5007_v43 }
 0x675   :  { %v1768_v57 = vpack.c.bf16 %v1676_v18, %v1672_v20  ;;  %v1769_v3 = vpack.c.bf16 %v1677_v41, %v1673_v45  ;;  %v1765_v18 = vpack.c.bf16 %v1645_v39, %v1641_v62  ;;  %v1607_v45 = vsel %vm115_vm6, %v5242_v40, %v5196_v35 }
 0x676   :  { %v1608_v20 = vmul.f32 %v1606_v30, %v4356_v16  ;;  %v1732_v41 = vsel %vm227_vm0, %v5140_v61, %v5186_v4  ;;  %v1612_v23 = vmul.f32 %v1607_v45, %v4356_v16  ;;  %v1575_v35 = vsel %vm87_vm5, %v5248_v44, %v5215_v11 }
 0x677   :  { %1807 = vmatpush.bf16.msra.mxu3 %v1768_v57  ;;  %1835 = vmatpush.bf16.msra.mxu2 %v1769_v3  ;;  %v1604_v3 = vsel %vm115_vm6, %v5110_v33, %v5246_v34  ;;  %v1572_v57 = vsel %vm87_vm5, %v5120_v1, %v5176_v42  ;;  %v1736_v21 = vmul.f32 %v1732_v41, %v4117_v5  ;;  %v3184_v41 = vld [vmem:[%s7433_s2 + $0x48] sm:$0xf0] }
 0x678   :  { %v1609_v33 = vmul.f32 %v1604_v3, %v4215_v15  ;;  %v1756_v43 = vpack.c.bf16 %v1612_v23, %v1608_v20  ;;  %v1580_v2 = vmul.f32 %v1575_v35, %v7715_v29  ;;  %v1541_v3 = vsel %vm59_vm8, %v5232_v36, %v5250_v54 }
 0x679   :  { %v5292_v0 = vpop.permute.xlu1 %1564  ;;  %v5294_v14 = vpop.permute.xlu0 %1558  ;;  %v1540_v45 = vsel %vm59_vm8, %v5130_v58, %v5252_v49 }
 0x67a   :  { %v1574_v62 = vsel %vm87_vm5, %v5292_v0, %v5120_v1  ;;  %v1573_v10 = vsel %vm87_vm5, %v5215_v11, %v5294_v14  ;;  %v1695_v30 = vpop.permute.xlu2 %1694 }
 0x67b   :  { %1808 = vmatpush.bf16.msra.mxu3 %v1764_v51  ;;  %1836 = vmatpush.bf16.msra.mxu2 %v1765_v18  ;;  %v1576_v12 = vmul.f32 %v1574_v62, %v7715_v29  ;;  %v1581_v26 = vmul.f32 %v1573_v10, %v4225_v31  ;;  %v1757_v18 = vpack.c.bf16 %v1613_v28, %v1609_v33 }
 0x67c   :  { %v1577_v28 = vmul.f32 %v1572_v57, %v4225_v31  ;;  %v1543_v33 = vsel %vm59_vm8, %v5260_v59, %v5232_v36  ;;  %v1509_v57 = vsel %vm32_vm7, %v5238_v63, %v5234_v22 }
 0x67d   :  { %v1752_v10 = vpack.c.bf16 %v1580_v2, %v1576_v12  ;;  %v1730_v12 = vsel %vm227_vm0, %v5186_v4, %v5150_v32  ;;  %v7758_v2 = vld [vmem:[#allocation28_spill] sm:$0xff] }
 0x67f   :  { %1809 = vmatpush.bf16.msra.mxu3 %v7755_v52  ;;  %1837 = vmatpush.bf16.msra.mxu2 %v1761_v50  ;;  %v3255_v50 = vld [vmem:[%s7433_s2 + $0x44] sm:$0xf]  ;;  %v7757_v52 = vld [vmem:[#allocation27_spill] sm:$0xff] }
 0x680   :  { %v1549_v35 = vmul.f32 %v1541_v3, %v7757_v52  ;;  %v5377_v15 = vor.u32 %v3255_v50, %v3184_v41  ;;  %v1517_v3 = vmul.f32 %v1509_v57, %v7758_v2  ;;  %v1703_v57 = vsel %vm199_vm3, %v1695_v30, %v5184_v38  ;;  %v7761_v38 = vld [vmem:[#allocation24_spill] sm:$0xff] }
 0x681   :  { %v5343_v39 = vpop.permute.xlu1 %1532  ;;  %v1719_v51 = vpop.permute.xlu0 %1718 }
 0x682   :  { %v1542_v11 = vsel %vm59_vm8, %v5343_v39, %v5130_v58  ;;  %v1733_v1 = vsel %vm227_vm0, %v5172_v60, %v1719_v51  ;;  %v7756_v58 = vld [vmem:[#allocation8_spill] sm:$0xff]  ;;  %v1731_v36 = vsel %vm227_vm0, %v1719_v51, %v5198_v17 }
 0x683   :  { %v1740_v20 = vmul.f32 %v1733_v1, %v4117_v5  ;;  %1810 = vmatpush.bf16.msra.mxu3 %v1756_v43  ;;  %1838 = vmatpush.bf16.msra.mxu2 %v1757_v18  ;;  %v1544_v62 = vmul.f32 %v1542_v11, %v7756_v58  ;;  %v1545_v43 = vmul.f32 %v1540_v45, %v7757_v52  ;;  %v7759_v45 = vld [vmem:[#allocation9_spill] sm:$0xff] }
 0x684   :  { %v1753_v1 = vpack.c.bf16 %v1581_v26, %v1577_v28  ;;  %v1548_v31 = vmul.f32 %v1543_v33, %v7756_v58  ;;  %v1508_v26 = vsel %vm32_vm7, %v5142_v8, %v5194_v46  ;;  %v3256_v28 = vld [vmem:[%s7433_s2 + $0x44] sm:$0xf0]  ;;  %v1737_v33 = vmul.f32 %v1730_v12, %v7759_v45  ;;  %v7760_v12 = vld [vmem:[#allocation10_spill] sm:$0xff] }
 0x685   :  { %v1776_v23 = vpack.c.bf16 %v1740_v20, %v1736_v21  ;;  %v1511_v21 = vsel %vm32_vm7, %v5290_v13, %v5238_v63  ;;  %v1741_v20 = vmul.f32 %v1731_v36, %v7759_v45  ;;  %v1749_v50 = vpack.c.bf16 %v1549_v35, %v1545_v43 }
 0x686   :  { %v1748_v18 = vpack.c.bf16 %v1548_v31, %v1544_v62  ;;  %v1516_v4 = vmul.f32 %v1511_v21, %v7725_v55  ;;  %v3182_v31 = vld [vmem:[%s7433_s2 + $0x40] sm:$0xf]  ;;  %v1593_v62 = vpop.permute.xlu2 %1592 }
 0x687   :  { %1811 = vmatpush.bf16.msra.mxu3 %v1752_v10  ;;  %1827 = vmatpush.bf16.msra.mxu1 %v1776_v23  ;;  %v1777_v10 = vpack.c.bf16 %v1741_v20, %v1737_v33  ;;  %v5419_v43 = vor.u32 %v3256_v28, %v3182_v31 }
 0x688   :  { %1839 = vmatpush.bf16.msra.mxu2 %v1753_v1  ;;  %v1697_v1 = vsel %vm199_vm3, %v5213_v19, %v1695_v30  ;;  %v1711_v30 = vmul.f32 %v1703_v57, %v7761_v38 }
 0x689   :  { %v5399_v11 = vpop.permute.xlu1 %1500  ;;  %v1629_v51 = vpop.permute.xlu0 %1628 }
 0x68a   :  { %v1510_v63 = vsel %vm32_vm7, %v5399_v11, %v5142_v8  ;;  %3188 = vmatmul.msk.bf16.vlgmr.msra.gmra.mxu1 %vm1364_vm10, %v5377_v15  ;;  %v1513_v8 = vmul.f32 %v1508_v26, %v7758_v2  ;;  %v1710_v26 = vmul.f32 %v1697_v1, %v7760_v12 }
 0x68b   :  { %v1512_v41 = vmul.f32 %v1510_v63, %v7725_v55  ;;  %1812 = vmatpush.bf16.msra.mxu3 %v1748_v18 }
 0x68c   :  { %1840 = vmatpush.bf16.msra.mxu2 %v1749_v50  ;;  %v1745_v35 = vpack.c.bf16 %v1517_v3, %v1513_v8  ;;  %v7762_v50 = vld [vmem:[#allocation46_spill] sm:$0xff]  ;;  %v7766_v8 = vld [vmem:[#allocation11_spill] sm:$0xff] }
 0x68d   :  { %v1744_v23 = vpack.c.bf16 %v1516_v4, %v1512_v41  ;;  %v7763_v4 = vld [vmem:[#allocation39_spill] sm:$0xff] }
 0x68f   :  { %1813 = vmatpush.bf16.msra.mxu3 %v1744_v23 }
 0x690   :  { %1841 = vmatpush.bf16.msra.mxu2 %v1745_v35  ;;  %v7767_v35 = vld [vmem:[#allocation20_spill] sm:$0xff] }
 0x691   :  { %v1693_v36 = vpop.permute.xlu1 %1692  ;;  %v1663_v21 = vpop.permute.xlu0 %1662 }
 0x692   :  { %v1696_v18 = vsel %vm199_vm3, %v5152_v53, %v1693_v36  ;;  %v1702_v3 = vsel %vm199_vm3, %v1693_v36, %v5099_v25  ;;  %v1665_v19 = vsel %vm171_vm2, %v5230_v48, %v1663_v21  ;;  %1814 = vmatmul.bf16.vlgmr.msra.gmra.mxu3 %v5419_v43  ;;  %v1671_v53 = vsel %vm171_vm2, %v1663_v21, %v7762_v50  ;;  %v7764_v25 = vld [vmem:[#allocation4_spill] sm:$0xff]  ;;  %v7765_v48 = vld [vmem:[#allocation42_spill] sm:$0xff]  ;;  %v7770_v50 = vld [vmem:[#allocation41_spill] sm:$0xff] }
 0x693   :  { %1855 = vmatpush.bf16.msrb.mxu3 %v1777_v10  ;;  %v1706_v20 = vmul.f32 %v1696_v18, %v7760_v12  ;;  %v1707_v63 = vmul.f32 %v1702_v3, %v7761_v38  ;;  %1842 = vmatmul.bf16.vlgmr.msra.gmra.mxu2 %v5419_v43  ;;  %v1664_v41 = vsel %vm171_vm2, %v7764_v25, %v7763_v4  ;;  %v1563_v10 = vpop.permute.xlu2 %1562  ;;  %v7768_v18 = vld [vmem:[#allocation47_spill] sm:$0xff]  ;;  %v7771_v25 = vld [vmem:[#allocation14_spill] sm:$0xff] }
 0x694   :  { %v1670_v31 = vsel %vm171_vm2, %v7763_v4, %v7765_v48  ;;  %v1678_v23 = vmul.f32 %v1665_v19, %v7766_v8  ;;  %v1679_v1 = vmul.f32 %v1671_v53, %v7767_v35  ;;  %v1674_v57 = vmul.f32 %v1664_v41, %v7766_v8  ;;  %v7772_v48 = vld [vmem:[#allocation25_spill] sm:$0xff] }
 0x695   :  { %v1774_v28 = vpack.c.bf16 %v1710_v26, %v1706_v20  ;;  %v1775_v33 = vpack.c.bf16 %v1711_v30, %v1707_v63  ;;  %v1675_v36 = vmul.f32 %v1670_v31, %v7767_v35  ;;  %v1632_v21 = vsel %vm143_vm4, %v5174_v24, %v1629_v51  ;;  %v7769_v20 = vld [vmem:[#allocation44_spill] sm:$0xff] }
 0x696   :  { %v1638_v26 = vsel %vm143_vm4, %v1629_v51, %v7768_v18  ;;  %v1770_v19 = vpack.c.bf16 %v1678_v23, %v1674_v57  ;;  %v1642_v41 = vmul.f32 %v1632_v21, %v7771_v25  ;;  %v1602_v57 = vsel %vm115_vm6, %v5246_v34, %v1593_v62  ;;  %v7773_v18 = vld [vmem:[#allocation22_spill] sm:$0xff] }
 0x697   :  { %1862 = vmatpush.bf16.msrb.mxu1 %v1774_v28  ;;  %1890 = vmatpush.bf16.msra.mxu0 %v1775_v33  ;;  %v1771_v4 = vpack.c.bf16 %v1679_v1, %v1675_v36  ;;  %v1643_v24 = vmul.f32 %v1638_v26, %v7772_v48  ;;  %v1600_v21 = vsel %vm115_vm6, %v1593_v62, %v5264_v9  ;;  %v7777_v9 = vld [vmem:[#allocation38_spill] sm:$0xff]  ;;  %v7778_v62 = vld [vmem:[#allocation40_spill] sm:$0xff] }
 0x699   :  { %v1631_v3 = vpop.permute.xlu1 %1630  ;;  %v1595_v30 = vpop.permute.xlu0 %1594 }
 0x69a   :  { %v1633_v63 = vsel %vm143_vm4, %v7769_v20, %v1631_v3  ;;  %v1639_v53 = vsel %vm143_vm4, %v1631_v3, %v7770_v50  ;;  %v1603_v23 = vsel %vm115_vm6, %v5244_v37, %v1595_v30  ;;  %v1601_v1 = vsel %vm115_vm6, %v1595_v30, %v5242_v40  ;;  %v7774_v37 = vld [vmem:[#allocation45_spill] sm:$0xff]  ;;  %v7775_v20 = vld [vmem:[#allocation7_spill] sm:$0xff] }
 0x69b   :  { %v1646_v31 = vmul.f32 %v1633_v63, %v7771_v25  ;;  %v1647_v51 = vmul.f32 %v1639_v53, %v7772_v48  ;;  %1863 = vmatpush.bf16.msrb.mxu1 %v1770_v19  ;;  %1891 = vmatpush.bf16.msra.mxu0 %v1771_v4  ;;  %v1725_v36 = vpop.permute.xlu2 %1724  ;;  %v1614_v26 = vmul.f32 %v1603_v23, %v7773_v18  ;;  %v7776_v50 = vld [vmem:[#allocation3_spill] sm:$0xff] }
 0x69c   :  { %v1762_v63 = vpack.c.bf16 %v7775_v20, %v7774_v37  ;;  %v1615_v40 = vmul.f32 %v1601_v1, %v7776_v50  ;;  %v1763_v53 = vpack.c.bf16 %v7778_v62, %v7777_v9  ;;  %v1610_v4 = vmul.f32 %v1602_v57, %v7773_v18  ;;  %v7784_v20 = vld [vmem:[#allocation5_spill] sm:$0xff] }
 0x69d   :  { %v1766_v28 = vpack.c.bf16 %v1646_v31, %v1642_v41  ;;  %v1767_v33 = vpack.c.bf16 %v1647_v51, %v1643_v24  ;;  %v1611_v41 = vmul.f32 %v1600_v21, %v7776_v50  ;;  %v1569_v24 = vsel %vm87_vm5, %v1563_v10, %v5248_v44  ;;  %v7779_v51 = vld [vmem:[#allocation21_spill] sm:$0xff]  ;;  %v7782_v21 = vld [vmem:[#allocation15_spill] sm:$0xff] }
 0x69e   :  { %v1734_v31 = vsel %vm227_vm0, %v1725_v36, %v5140_v61  ;;  %v1758_v1 = vpack.c.bf16 %v1614_v26, %v1610_v4  ;;  %v7781_v61 = vld [vmem:[#allocation2_spill] sm:$0xff] }
 0x69f   :  { %1864 = vmatpush.bf16.msrb.mxu1 %v1766_v28  ;;  %1892 = vmatpush.bf16.msra.mxu0 %v1767_v33  ;;  %v7780_v33 = vld [vmem:[#allocation6_spill] sm:$0xff] }
 0x6a0   :  { %v1583_v57 = vmul.f32 %v1569_v24, %v7780_v33  ;;  %v7783_v26 = vld [vmem:[#allocation26_spill] sm:$0xff] }
 0x6a1   :  { %v1561_v3 = vpop.permute.xlu1 %1560  ;;  %v1529_v19 = vpop.permute.xlu0 %1528 }
 0x6a2   :  { %v1568_v30 = vsel %vm87_vm5, %v1561_v3, %v5292_v0  ;;  %v1570_v34 = vsel %vm87_vm5, %v5176_v42, %v1561_v3  ;;  %3189 = vmatmul.msk.bf16.vlgmr.msrb.gmra.mxu3 %vm1364_vm10, %v5377_v15  ;;  %v1571_v0 = vsel %vm87_vm5, %v5294_v14, %v1563_v10  ;;  %v1728_v42 = vsel %vm227_vm0, %v5150_v32, %v1725_v36 }
 0x6a3   :  { %1865 = vmatpush.bf16.msrb.mxu1 %v1762_v63  ;;  %1893 = vmatpush.bf16.msra.mxu0 %v1763_v53  ;;  %v1578_v28 = vmul.f32 %v1570_v34, %v7779_v51  ;;  %v1579_v23 = vmul.f32 %v1568_v30, %v7780_v33  ;;  %v1536_v44 = vsel %vm59_vm8, %v1529_v19, %v5343_v39  ;;  %v1499_v24 = vpop.permute.xlu2 %1498 }
 0x6a4   :  { %v1538_v14 = vsel %vm59_vm8, %v5252_v49, %v1529_v19  ;;  %v1759_v10 = vpack.c.bf16 %v1615_v40, %v1611_v41  ;;  %v1582_v32 = vmul.f32 %v1571_v0, %v7779_v51  ;;  %v1738_v36 = vmul.f32 %v1728_v42, %v7781_v61 }
 0x6a5   :  { %v1739_v3 = vmul.f32 %v1734_v31, %v7782_v21  ;;  %v1546_v37 = vmul.f32 %v1538_v14, %v7783_v26  ;;  %v1547_v63 = vmul.f32 %v1536_v44, %v7784_v20  ;;  %v1755_v9 = vpack.c.bf16 %v1583_v57, %v1579_v23  ;;  %v7785_v44 = vld [vmem:[#allocation23_spill] sm:$0xff]  ;;  %v7786_v14 = vld [vmem:[#allocation29_spill] sm:$0xff] }
 0x6a6   :  { %v1754_v34 = vpack.c.bf16 %v1582_v32, %v1578_v28 }
 0x6a7   :  { %1866 = vmatpush.bf16.msrb.mxu1 %v1758_v1  ;;  %1894 = vmatpush.bf16.msra.mxu0 %v1759_v10 }
 0x6a9   :  { %v1531_v39 = vpop.permute.xlu1 %1530  ;;  %v1727_v30 = vpop.permute.xlu0 %1726 }
 0x6aa   :  { %v1537_v49 = vsel %vm59_vm8, %v1531_v39, %v5260_v59  ;;  %v1539_v19 = vsel %vm59_vm8, %v5250_v54, %v1531_v39  ;;  %v1729_v40 = vsel %vm227_vm0, %v5198_v17, %v1727_v30  ;;  %v1735_v62 = vsel %vm227_vm0, %v1727_v30, %v5172_v60 }
 0x6ab   :  { %v1550_v53 = vmul.f32 %v1539_v19, %v7783_v26  ;;  %v1551_v4 = vmul.f32 %v1537_v49, %v7784_v20  ;;  %v1742_v41 = vmul.f32 %v1729_v40, %v7781_v61  ;;  %v1743_v59 = vmul.f32 %v1735_v62, %v7782_v21  ;;  %1867 = vmatpush.bf16.msrb.mxu1 %v1754_v34 }
 0x6ac   :  { %1895 = vmatpush.bf16.msra.mxu0 %v1755_v9  ;;  %v1505_v60 = vsel %vm32_vm7, %v1499_v24, %v5290_v13  ;;  %v1507_v17 = vsel %vm32_vm7, %v5234_v22, %v1499_v24 }
 0x6ad   :  { %v1778_v54 = vpack.c.bf16 %v1742_v41, %v1738_v36  ;;  %v1779_v0 = vpack.c.bf16 %v1743_v59, %v1739_v3  ;;  %v1750_v42 = vpack.c.bf16 %v1550_v53, %v1546_v37  ;;  %v1751_v31 = vpack.c.bf16 %v1551_v4, %v1547_v63 }
 0x6ae   :  { %v1518_v13 = vmul.f32 %v1507_v17, %v7785_v44  ;;  %v1519_v10 = vmul.f32 %v1505_v60, %v7786_v14 }
 0x6af   :  { %1868 = vmatpush.bf16.msrb.mxu1 %v1750_v42  ;;  %1883 = vmatpush.bf16.msra.mxu3 %v1778_v54 }
 0x6b0   :  { %1896 = vmatpush.bf16.msra.mxu0 %v1751_v31  ;;  %1911 = vmatpush.bf16.msrb.mxu2 %v1779_v0 }
 0x6b1   :  { %v1497_v28 = vpop.permute.xlu1 %1496 }
 0x6b2   :  { %v1504_v23 = vsel %vm32_vm7, %v1497_v28, %v5399_v11  ;;  %v1506_v1 = vsel %vm32_vm7, %v5194_v46, %v1497_v28  ;;  %3190 = vmatmul.msk.bf16.vlgmr.msra.gmra.mxu3 %vm1364_vm10, %v5377_v15  ;;  %v5565_v46 = vpop.permute.xlu0 %1786 }
 0x6b3   :  { %v1514_v22 = vmul.f32 %v1506_v1, %v7785_v44  ;;  %v1515_v32 = vmul.f32 %v1504_v23, %v7786_v14  ;;  %3191 = vmatmul.msk.bf16.vlgmr.msrb.gmra.mxu2 %vm1364_vm10, %v5377_v15  ;;  %v2543_v44 = vld [vmem:[%s7432_s3 + $0x50] sm:$0xff] }
 0x6b5   :  { %v1746_v57 = vpack.c.bf16 %v1518_v13, %v1514_v22  ;;  %v1747_v11 = vpack.c.bf16 %v1519_v10, %v1515_v32 }
 0x6b7   :  { %1869 = vmatpush.bf16.msrb.mxu1 %v1746_v57  ;;  %1897 = vmatpush.bf16.msra.mxu0 %v1747_v11 }
 0x6b9   :  { %v5570_v15 = vpop.permute.xlu1 %1791 }
 0x6ba   :  { %1870 = vmatmul.bf16.vlgmr.msrb.gmra.mxu1 %v5419_v43  ;;  %1898 = vmatmul.bf16.vlgmr.msra.gmra.mxu0 %v5419_v43 }
 0x707   :  { %v1829_v36 = vpop.f32.mrf.mxu1 }
 0x70f   :  { %v1831_v43 = vpop.f32.mrf.mxu1 }
 0x715   :  { %v1815_v3 = vpop.f32.mrf.mxu3 }
 0x716   :  { %v1816_v37 = vadd.f32 %v1815_v3, %v5565_v46  ;;  %v1843_v40 = vpop.f32.mrf.mxu2 }
 0x717   :  { %v1844_v4 = vadd.f32 %v1843_v40, %v5565_v46 }
 0x718   :  { %v1830_v63 = vadd.f32 %v1829_v36, %v1816_v37 }
 0x71a   :  { %v1918_v39 = vmax.f32 %v1830_v63, 0.0 }
 0x71c   :  { %2054 = vrot.lane.b32.xlu1 %v1918_v39, %s3278_s26  ;;  %2086 = vrot.lane.b32.xlu0 %v1918_v39, %s3276_s22 }
 0x71d   :  { %2118 = vrot.lane.b32.xlu2 %v1918_v39, %s3277_s23  ;;  %v1817_v30 = vpop.f32.mrf.mxu3 }
 0x71e   :  { %v1818_v34 = vadd.f32 %v1817_v30, %v5570_v15  ;;  %v1845_v62 = vpop.f32.mrf.mxu2 }
 0x71f   :  { %v1846_v17 = vadd.f32 %v1845_v62, %v5570_v15 }
 0x720   :  { %v1832_v9 = vadd.f32 %v1831_v43, %v1818_v34 }
 0x722   :  { %v1922_v49 = vmax.f32 %v1832_v9, 0.0 }
 0x724   :  { %2022 = vrot.lane.b32.xlu1 %v1918_v39, %s3280_s27  ;;  %1958 = vrot.lane.b32.xlu0 %v1918_v39, %s3282_s29  ;;  %v5576_v19 = vpack.c.bf16 %v1922_v49, %v1918_v39 }
 0x725   :  { %2150 = vrot.lane.b32.xlu2 %v1918_v39, %s3275_s21  ;;  %v1857_v53 = vpop.f32.mrf.mxu3 }
 0x726   :  { %7787 = vst [vmem:[#allocation43_spill] sm:$0xff] %v5576_v19  ;;  %v1858_v41 = vadd.f32 %v1857_v53, %v1844_v4 }
 0x728   :  { %v5589_v24 = vmax.f32 %v1858_v41, 0.0 }
 0x72c   :  { %1990 = vrot.lane.b32.xlu1 %v1918_v39, %s3279_s1  ;;  %1926 = vrot.lane.b32.xlu0 %v1918_v39, %s3281_s28 }
 0x72d   :  { %2056 = vrot.lane.b32.xlu2 %v1922_v49, %s3278_s26  ;;  %v1859_v60 = vpop.f32.mrf.mxu3 }
 0x72e   :  { %v1860_v28 = vadd.f32 %v1859_v60, %v1846_v17 }
 0x730   :  { %v5618_v1 = vmax.f32 %v1860_v28, 0.0 }
 0x734   :  { %2088 = vrot.lane.b32.xlu1 %v1922_v49, %s3276_s22  ;;  %2120 = vrot.lane.b32.xlu0 %v1922_v49, %s3277_s23 }
 0x735   :  { %2024 = vrot.lane.b32.xlu2 %v1922_v49, %s3280_s27  ;;  %v1885_v3 = vpop.f32.mrf.mxu3 }
 0x736   :  { %v1913_v0 = vpop.f32.mrf.mxu2 }
 0x737   :  { %v1899_v59 = vpop.f32.mrf.mxu0  ;;  %v1871_v11 = vpop.f32.mrf.mxu1 }
 0x738   :  { %v1900_v54 = vadd.f32 %v1899_v59, %v5565_v46  ;;  %v1872_v37 = vadd.f32 %v1871_v11, %v5565_v46 }
 0x73a   :  { %v1914_v42 = vadd.f32 %v1913_v0, %v1900_v54  ;;  %v1886_v63 = vadd.f32 %v1885_v3, %v1872_v37  ;;  %v5740_v3 = vld [vmem:[%s7431_s0 + $0x7] ss:$8 sm:$0xf] }
 0x73b   :  { %v5747_v37 = vperm.slane %v5740_v3, 0 }
 0x73c   :  { %1960 = vrot.lane.b32.xlu1 %v1922_v49, %s3282_s29  ;;  %2152 = vrot.lane.b32.xlu0 %v1922_v49, %s3275_s21  ;;  %v5597_v31 = vmax.f32 %v1914_v42, 0.0  ;;  %v5660_v34 = vmax.f32 %v1886_v63, 0.0 }
 0x73d   :  { %1992 = vrot.lane.b32.xlu2 %v1922_v49, %s3279_s1  ;;  %v1887_v9 = vpop.f32.mrf.mxu3  ;;  %7795 = vst [vmem:[#allocation39_spill] sm:$0xff] %v5747_v37 }
 0x73e   :  { %7788 = vst [vmem:[#allocation18_spill] sm:$0xff] %v5597_v31  ;;  %v1915_v10 = vpop.f32.mrf.mxu2 }
 0x73f   :  { %v1901_v23 = vpop.f32.mrf.mxu0  ;;  %v1873_v39 = vpop.f32.mrf.mxu1 }
 0x740   :  { %v1902_v13 = vadd.f32 %v1901_v23, %v5570_v15  ;;  %v1874_v43 = vadd.f32 %v1873_v39, %v5570_v15 }
 0x742   :  { %v1916_v22 = vadd.f32 %v1915_v10, %v1902_v13  ;;  %v1888_v46 = vadd.f32 %v1887_v9, %v1874_v43 }
 0x744   :  { %1928 = vrot.lane.b32.xlu1 %v1922_v49, %s3281_s28  ;;  %2058 = vrot.lane.b32.xlu0 %v5589_v24, %s3278_s26  ;;  %v5627_v32 = vmax.f32 %v1916_v22, 0.0  ;;  %v5675_v53 = vmax.f32 %v1888_v46, 0.0  ;;  %v7796_v46 = vld [vmem:[#allocation17_spill] sm:$0xff] }
 0x745   :  { %2090 = vrot.lane.b32.xlu2 %v5589_v24, %s3276_s22 }
 0x746   :  { %7789 = vst [vmem:[#allocation12_spill] sm:$0xff] %v5627_v32 }
 0x747   :  { %7791 = vst [vmem:[#allocation27_spill] sm:$0xff] %v5675_v53 }
 0x74c   :  { %2122 = vrot.lane.b32.xlu1 %v5589_v24, %s3277_s23  ;;  %2034 = vrot.lane.b32.xlu0 %v5597_v31, %s3280_s27 }
 0x74d   :  { %2130 = vrot.lane.b32.xlu2 %v5597_v31, %s3277_s23 }
 0x754   :  { %2098 = vrot.lane.b32.xlu1 %v5597_v31, %s3276_s22  ;;  %2002 = vrot.lane.b32.xlu0 %v5597_v31, %s3279_s1 }
 0x755   :  { %1970 = vrot.lane.b32.xlu2 %v5597_v31, %s3282_s29 }
 0x75c   :  { %2066 = vrot.lane.b32.xlu1 %v5597_v31, %s3278_s26  ;;  %2026 = vrot.lane.b32.xlu0 %v5589_v24, %s3280_s27 }
 0x75d   :  { %1938 = vrot.lane.b32.xlu2 %v5597_v31, %s3281_s28 }
 0x764   :  { %2154 = vrot.lane.b32.xlu1 %v5589_v24, %s3275_s21  ;;  %1994 = vrot.lane.b32.xlu0 %v5589_v24, %s3279_s1 }
 0x765   :  { %2124 = vrot.lane.b32.xlu2 %v5618_v1, %s3277_s23 }
 0x76c   :  { %1962 = vrot.lane.b32.xlu1 %v5589_v24, %s3282_s29  ;;  %2092 = vrot.lane.b32.xlu0 %v5618_v1, %s3276_s22 }
 0x76d   :  { %2100 = vrot.lane.b32.xlu2 %v5627_v32, %s3276_s22 }
 0x774   :  { %2060 = vrot.lane.b32.xlu1 %v5618_v1, %s3278_s26  ;;  %2132 = vrot.lane.b32.xlu0 %v5627_v32, %s3277_s23 }
 0x775   :  { %2068 = vrot.lane.b32.xlu2 %v5627_v32, %s3278_s26 }
 0x777   :  { %v5641_v57 = vpop.permute.xlu2 %2118 }
 0x77c   :  { %2036 = vrot.lane.b32.xlu1 %v5627_v32, %s3280_s27  ;;  %1972 = vrot.lane.b32.xlu0 %v5627_v32, %s3282_s29 }
 0x77d   :  { %2156 = vrot.lane.b32.xlu2 %v5618_v1, %s3275_s21 }
 0x77f   :  { %v5649_v36 = vpop.permute.xlu2 %2150 }
 0x780   :  { %7790 = vst [vmem:[#allocation8_spill] sm:$0xff] %v5649_v36 }
 0x784   :  { %2004 = vrot.lane.b32.xlu1 %v5627_v32, %s3279_s1  ;;  %1940 = vrot.lane.b32.xlu0 %v5627_v32, %s3281_s28 }
 0x785   :  { %1964 = vrot.lane.b32.xlu2 %v5618_v1, %s3282_s29 }
 0x787   :  { %v5658_v30 = vpop.permute.xlu2 %2056 }
 0x78c   :  { %2028 = vrot.lane.b32.xlu1 %v5618_v1, %s3280_s27  ;;  %1998 = vrot.lane.b32.xlu0 %v5660_v34, %s3279_s1 }
 0x78d   :  { %2126 = vrot.lane.b32.xlu2 %v5660_v34, %s3277_s23 }
 0x78e   :  { %v5669_v49 = vpop.permute.xlu1 %2054  ;;  %v5671_v40 = vpop.permute.xlu0 %2086 }
 0x78f   :  { %v5673_v62 = vpop.permute.xlu2 %2024 }
 0x794   :  { %1996 = vrot.lane.b32.xlu1 %v5618_v1, %s3279_s1  ;;  %2128 = vrot.lane.b32.xlu0 %v5675_v53, %s3277_s23 }
 0x795   :  { %2094 = vrot.lane.b32.xlu2 %v5660_v34, %s3276_s22 }
 0x796   :  { %v5683_v15 = vpop.permute.xlu1 %2022  ;;  %v5685_v4 = vpop.permute.xlu0 %1958 }
 0x797   :  { %v5687_v41 = vpop.permute.xlu2 %1992 }
 0x79c   :  { %2062 = vrot.lane.b32.xlu1 %v5660_v34, %s3278_s26  ;;  %2096 = vrot.lane.b32.xlu0 %v5675_v53, %s3276_s22 }
 0x79d   :  { %2030 = vrot.lane.b32.xlu2 %v5660_v34, %s3280_s27 }
 0x79e   :  { %v5695_v59 = vpop.permute.xlu1 %1990  ;;  %v5697_v54 = vpop.permute.xlu0 %1926 }
 0x79f   :  { %v5699_v0 = vpop.permute.xlu2 %2090 }
 0x7a4   :  { %1966 = vrot.lane.b32.xlu1 %v5660_v34, %s3282_s29  ;;  %1932 = vrot.lane.b32.xlu0 %v5618_v1, %s3281_s28 }
 0x7a5   :  { %2064 = vrot.lane.b32.xlu2 %v5675_v53, %s3278_s26 }
 0x7a6   :  { %v5707_v42 = vpop.permute.xlu1 %2088  ;;  %v5709_v60 = vpop.permute.xlu0 %2120 }
 0x7a7   :  { %v5711_v17 = vpop.permute.xlu2 %2130 }
 0x7ac   :  { %2000 = vrot.lane.b32.xlu1 %v5675_v53, %s3279_s1  ;;  %2158 = vrot.lane.b32.xlu0 %v5660_v34, %s3275_s21 }
 0x7ad   :  { %1930 = vrot.lane.b32.xlu2 %v5589_v24, %s3281_s28 }
 0x7ae   :  { %v5719_v28 = vpop.permute.xlu1 %1960  ;;  %v5721_v23 = vpop.permute.xlu0 %2152 }
 0x7af   :  { %7792 = vst [vmem:[#allocation10_spill] sm:$0xff] %v5721_v23  ;;  %v5723_v13 = vpop.permute.xlu2 %1970 }
 0x7b0   :  { %7793 = vst [vmem:[#allocation24_spill] sm:$0xff] %v5723_v13 }
 0x7b4   :  { %2160 = vrot.lane.b32.xlu1 %v5675_v53, %s3275_s21  ;;  %2032 = vrot.lane.b32.xlu0 %v5675_v53, %s3280_s27 }
 0x7b5   :  { %2162 = vrot.lane.b32.xlu2 %v5597_v31, %s3275_s21  ;;  %v2544_v31 = vld [vmem:[%s7432_s3 + $0x58] sm:$0xff] }
 0x7b6   :  { %v5731_v10 = vpop.permute.xlu1 %1928  ;;  %v5733_v22 = vpop.permute.xlu0 %2058 }
 0x7b7   :  { %v5735_v11 = vpop.permute.xlu2 %1938 }
 0x7b8   :  { %7794 = vst [vmem:[#allocation46_spill] sm:$0xff] %v5735_v11 }
 0x7bc   :  { %1934 = vrot.lane.b32.xlu1 %v5660_v34, %s3281_s28  ;;  %2164 = vrot.lane.b32.xlu0 %v5627_v32, %s3275_s21 }
 0x7bd   :  { %1968 = vrot.lane.b32.xlu2 %v5675_v53, %s3282_s29 }
 0x7be   :  { %v5751_v63 = vpop.permute.xlu1 %2122  ;;  %v5753_v39 = vpop.permute.xlu0 %2034 }
 0x7bf   :  { %v2138_v43 = vsel %vm199_vm3, %v5641_v57, %v5751_v63  ;;  %v5759_v9 = vpop.permute.xlu2 %2124 }
 0x7c0   :  { %v2142_v14 = vmul.f32 %v2138_v43, %v7796_v46  ;;  %v5763_v20 = vmul.f32 %v5747_v37, %v2138_v43  ;;  %v2139_v32 = vsel %vm199_vm3, %v5709_v60, %v5759_v9  ;;  %v5782_v43 = vld [vmem:[%s7431_s0 + $0x6] ss:$8 sm:$0xf] }
 0x7c1   :  { %v2146_v61 = vmul.f32 %v2139_v32, %v7796_v46  ;;  %v5777_v21 = vmul.f32 %v5747_v37, %v2139_v32  ;;  %7799 = vst [vmem:[#allocation11_spill] sm:$0xff] %v5782_v43  ;;  %v5787_v45 = vperm.slane %v5782_v43, 3 }
 0x7c2   :  { %7797 = vst [vmem:[#allocation4_spill] sm:$0xff] %v5763_v20  ;;  %v5820_v20 = vld [vmem:[%s7431_s0 + $0x5] ss:$8 sm:$0xf] }
 0x7c3   :  { %7798 = vst [vmem:[#allocation42_spill] sm:$0xff] %v5777_v21  ;;  %v2210_v26 = vpack.c.bf16 %v2146_v61, %v2142_v14  ;;  %v5823_v21 = vperm.slane %v5820_v20, 3 }
 0x7c4   :  { %2552 = vperm.xlu1 %3274, %v2544_v31   ;;  %2547 = vperm.xlu0 %3273, %v2543_v44   ;;  %7800 = vst [vmem:[#allocation20_spill] sm:$0xff] %v5787_v45 }
 0x7c5   :  { %1936 = vrot.lane.b32.xlu2 %v5675_v53, %s3281_s28  ;;  %2244 = vmatpush.bf16.msrb.mxu3 %v2210_v26  ;;  %7805 = vst [vmem:[#allocation25_spill] sm:$0xff] %v5823_v21 }
 0x7c6   :  { %v5791_v32 = vpop.permute.xlu1 %2098  ;;  %v5793_v46 = vpop.permute.xlu0 %2002 }
 0x7c7   :  { %v2108_v61 = vsel %vm171_vm2, %v5791_v32, %v5671_v40  ;;  %v5799_v14 = vpop.permute.xlu2 %2100 }
 0x7c8   :  { %v5802_v44 = vmul.f32 %v2108_v61, %v7767_v35  ;;  %v5805_v31 = vmul.f32 %v5787_v45, %v2108_v61  ;;  %v2109_v26 = vsel %vm171_vm2, %v5799_v14, %v5707_v42 }
 0x7c9   :  { %v5812_v51 = vmul.f32 %v2109_v26, %v7767_v35  ;;  %v5815_v37 = vmul.f32 %v5787_v45, %v2109_v26 }
 0x7ca   :  { %7801 = vst [vmem:[#allocation47_spill] sm:$0xff] %v5802_v44 }
 0x7cb   :  { %7802 = vst [vmem:[#allocation44_spill] sm:$0xff] %v5805_v31 }
 0x7cc   :  { %7803 = vst [vmem:[#allocation41_spill] sm:$0xff] %v5812_v51 }
 0x7cd   :  { %7804 = vst [vmem:[#allocation14_spill] sm:$0xff] %v5815_v37  ;;  %v5858_v37 = vld [vmem:[%s7431_s0 + $0x20] ss:$8 sm:$0xf] }
 0x7ce   :  { %v5829_v50 = vpop.permute.xlu1 %2066  ;;  %v5831_v35 = vpop.permute.xlu0 %2026  ;;  %7810 = vst [vmem:[#allocation17_spill] sm:$0xff] %v5858_v37 }
 0x7cf   :  { %7806 = vst [vmem:[#allocation45_spill] sm:$0xff] %v5831_v35  ;;  %v2076_v26 = vsel %vm143_vm4, %v5829_v50, %v5669_v49  ;;  %v5841_v45 = vsel %vm115_vm6, %v5683_v15, %v5831_v35  ;;  %v5843_v18 = vpop.permute.xlu2 %2068  ;;  %v5867_v35 = vperm.slane %v5858_v37, 0 }
 0x7d0   :  { %7807 = vst [vmem:[#allocation7_spill] sm:$0xff] %v5841_v45  ;;  %v5846_v61 = vmul.f32 %v2076_v26, %v7772_v48  ;;  %v5849_v2 = vmul.f32 %v5823_v21, %v2076_v26  ;;  %v2077_v31 = vsel %vm143_vm4, %v5843_v18, %v5658_v30 }
 0x7d1   :  { %v5861_v44 = vmul.f32 %v2077_v31, %v7772_v48  ;;  %v5864_v51 = vmul.f32 %v5823_v21, %v2077_v31  ;;  %7813 = vst [vmem:[#allocation50_spill] sm:$0xff] %v5867_v35 }
 0x7d2   :  { %7808 = vst [vmem:[#allocation38_spill] sm:$0xff] %v5846_v61  ;;  %v5904_v61 = vld [vmem:[%s7431_s0 + $0x1] ss:$8 sm:$0xf] }
 0x7d3   :  { %7809 = vst [vmem:[#allocation40_spill] sm:$0xff] %v5849_v2 }
 0x7d4   :  { %7811 = vst [vmem:[#allocation48_spill] sm:$0xff] %v5861_v44 }
 0x7d5   :  { %7812 = vst [vmem:[#allocation49_spill] sm:$0xff] %v5864_v51 }
 0x7d6   :  { %v5873_v45 = vpop.permute.xlu1 %2154  ;;  %v5875_v53 = vpop.permute.xlu0 %1994  ;;  %7818 = vst [vmem:[#allocation55_spill] sm:$0xff] %v5904_v61 }
 0x7d7   :  { %7814 = vst [vmem:[#allocation51_spill] sm:$0xff] %v5875_v53  ;;  %v2170_v48 = vsel %vm227_vm0, %v5649_v36, %v5873_v45  ;;  %v5885_v31 = vsel %vm87_vm5, %v5695_v59, %v5875_v53  ;;  %v5887_v21 = vpop.permute.xlu2 %2156 }
 0x7d8   :  { %7815 = vst [vmem:[#allocation52_spill] sm:$0xff] %v5887_v21  ;;  %v2174_v26 = vmul.f32 %v2170_v48, %v4117_v5  ;;  %v5891_v33 = vmul.f32 %v5867_v35, %v2170_v48  ;;  %v2171_v2 = vsel %vm227_vm0, %v5721_v23, %v5887_v21  ;;  %v2106_v48 = vsel %vm171_vm2, %v5671_v40, %v5699_v0 }
 0x7d9   :  { %v2178_v51 = vmul.f32 %v2171_v2, %v4117_v5  ;;  %v5899_v37 = vmul.f32 %v5867_v35, %v2171_v2  ;;  %v5913_v23 = vperm.slane %v5904_v61, 1  ;;  %v5916_v5 = vperm.slane %v5782_v43, 0 }
 0x7da   :  { %7816 = vst [vmem:[#allocation53_spill] sm:$0xff] %v5891_v33  ;;  %v2110_v53 = vmul.f32 %v2106_v48, %v7753_v27 }
 0x7db   :  { %7817 = vst [vmem:[#allocation54_spill] sm:$0xff] %v5899_v37  ;;  %v2214_v44 = vpack.c.bf16 %v2178_v51, %v2174_v26  ;;  %v5944_v43 = vmul.f32 %v5916_v5, %v2106_v48  ;;  %v2140_v48 = vsel %vm199_vm3, %v5711_v17, %v5641_v57 }
 0x7dc   :  { %7819 = vst [vmem:[#allocation56_spill] sm:$0xff] %v5913_v23  ;;  %v5981_v57 = vmul.f32 %v2140_v48, %v7761_v38 }
 0x7dd   :  { %7820 = vst [vmem:[#allocation57_spill] sm:$0xff] %v5916_v5  ;;  %2265 = vmatpush.bf16.msra.mxu1 %v2214_v44 }
 0x7de   :  { %v5918_v2 = vpop.permute.xlu1 %1962  ;;  %v5920_v35 = vpop.permute.xlu0 %2092  ;;  %7824 = vst [vmem:[#allocation61_spill] sm:$0xff] %v5944_v43 }
 0x7df   :  { %7821 = vst [vmem:[#allocation58_spill] sm:$0xff] %v5918_v2  ;;  %v1978_v51 = vsel %vm59_vm8, %v5685_v4, %v5918_v2  ;;  %v2107_v40 = vsel %vm171_vm2, %v5707_v42, %v5920_v35  ;;  %v5931_v26 = vpop.permute.xlu2 %1964 }
 0x7e0   :  { %v5934_v44 = vmul.f32 %v1978_v51, %v7757_v52  ;;  %v5937_v36 = vmul.f32 %v5913_v23, %v1978_v51  ;;  %v2114_v33 = vmul.f32 %v2107_v40, %v7753_v27  ;;  %v5941_v37 = vmul.f32 %v5916_v5, %v2107_v40 }
 0x7e1   :  { %v1979_v42 = vsel %vm59_vm8, %v5719_v28, %v5931_v26  ;;  %v5957_v27 = vperm.slane %v5740_v3, 3 }
 0x7e2   :  { %7822 = vst [vmem:[#allocation59_spill] sm:$0xff] %v5937_v36  ;;  %v5951_v2 = vmul.f32 %v1979_v42, %v7757_v52  ;;  %v5954_v21 = vmul.f32 %v5913_v23, %v1979_v42  ;;  %v2206_v51 = vpack.c.bf16 %v2114_v33, %v2110_v53  ;;  %v5970_v33 = vperm.slane %v5820_v20, 0 }
 0x7e3   :  { %7823 = vst [vmem:[#allocation60_spill] sm:$0xff] %v5941_v37  ;;  %v2074_v53 = vsel %vm143_vm4, %v5669_v49, %v5733_v22 }
 0x7e4   :  { %7825 = vst [vmem:[#allocation62_spill] sm:$0xff] %v5954_v21  ;;  %2245 = vmatpush.bf16.msrb.mxu3 %v2206_v51  ;;  %v5984_v51 = vmul.f32 %v5957_v27, %v2140_v48  ;;  %v6008_v43 = vmul.f32 %v5970_v33, %v2074_v53 }
 0x7e5   :  { %7826 = vst [vmem:[#allocation63_spill] sm:$0xff] %v5957_v27 }
 0x7e6   :  { %7827 = vst [vmem:[#allocation64_spill] sm:$0xff] %v5970_v33  ;;  %v5976_v40 = vpop.permute.xlu1 %2060  ;;  %v5978_v23 = vpop.permute.xlu0 %2132 }
 0x7e7   :  { %7828 = vst [vmem:[#allocation65_spill] sm:$0xff] %v5984_v51  ;;  %v2075_v42 = vsel %vm143_vm4, %v5658_v30, %v5976_v40  ;;  %v2141_v49 = vsel %vm199_vm3, %v5978_v23, %v5709_v60  ;;  %v5994_v52 = vpop.permute.xlu2 %2126  ;;  %v2078_v30 = vmul.f32 %v2074_v53, %v4298_v47  ;;  %v6013_v60 = vld [vmem:[%s7431_s0 + $0x3] ss:$8 sm:$0xf] }
 0x7e8   :  { %v2082_v5 = vmul.f32 %v2075_v42, %v4298_v47  ;;  %v5998_v36 = vmul.f32 %v5970_v33, %v2075_v42  ;;  %v6001_v48 = vmul.f32 %v2141_v49, %v7761_v38  ;;  %v6004_v21 = vmul.f32 %v5957_v27, %v2141_v49  ;;  %7831 = vst [vmem:[#allocation68_spill] sm:$0xff] %v6008_v43 }
 0x7e9   :  { %v6022_v47 = vperm.slane %v5904_v61, 0  ;;  %v6025_v53 = vperm.slane %v6013_v60, 0  ;;  %v1980_v27 = vsel %vm59_vm8, %v5723_v13, %v5685_v4  ;;  %v1948_v43 = vsel %vm32_vm7, %v5735_v11, %v5697_v54 }
 0x7ea   :  { %7829 = vst [vmem:[#allocation66_spill] sm:$0xff] %v5998_v36  ;;  %v2202_v37 = vpack.c.bf16 %v2082_v5, %v2078_v30  ;;  %v2044_v5 = vsel %vm115_vm6, %v5753_v39, %v5683_v15  ;;  %v1982_v13 = vmul.f32 %v1980_v27, %v7756_v58 }
 0x7eb   :  { %7830 = vst [vmem:[#allocation67_spill] sm:$0xff] %v6004_v21  ;;  %v6055_v33 = vmul.f32 %v6022_v47, %v1980_v27  ;;  %v2046_v51 = vmul.f32 %v2044_v5, %v4356_v16  ;;  %v6059_v21 = vmul.f32 %v6025_v53, %v2044_v5 }
 0x7ec   :  { %7832 = vst [vmem:[#allocation69_spill] sm:$0xff] %v6022_v47  ;;  %2246 = vmatpush.bf16.msrb.mxu3 %v2202_v37 }
 0x7ed   :  { %7833 = vst [vmem:[#allocation70_spill] sm:$0xff] %v6025_v53 }
 0x7ee   :  { %v6035_v30 = vpop.permute.xlu1 %2036  ;;  %v6037_v38 = vpop.permute.xlu0 %1972  ;;  %7837 = vst [vmem:[#allocation74_spill] sm:$0xff] %v6055_v33 }
 0x7ef   :  { %7834 = vst [vmem:[#allocation71_spill] sm:$0xff] %v6037_v38  ;;  %v2045_v49 = vsel %vm115_vm6, %v6035_v30, %v5673_v62  ;;  %v1981_v37 = vsel %vm59_vm8, %v6037_v38, %v5719_v28  ;;  %v2095_v61 = vpop.permute.xlu2 %2094  ;;  %v6065_v28 = vld [vmem:[%s7431_s0] ss:$8 sm:$0xf] }
 0x7f0   :  { %v2050_v4 = vmul.f32 %v2045_v49, %v4356_v16  ;;  %v6049_v42 = vmul.f32 %v6025_v53, %v2045_v49  ;;  %v6052_v15 = vmul.f32 %v6022_v47, %v1981_v37  ;;  %7838 = vst [vmem:[#allocation75_spill] sm:$0xff] %v6059_v21  ;;  %2247 = vmatpush.bf16.msrb.mxu3 %v5576_v19  ;;  %v6070_v49 = vld [vmem:[%s7431_s0 + $0x2] ss:$8 sm:$0xf]  ;;  %v6077_v53 = vperm.slane %v6065_v28, 0 }
 0x7f1   :  { %7839 = vst [vmem:[#allocation76_spill] sm:$0xff] %v6065_v28  ;;  %v6080_v19 = vperm.slane %v6070_v49, 0  ;;  %v1986_v11 = vmul.f32 %v1981_v37, %v7756_v58  ;;  %v1950_v37 = vmul.f32 %v1948_v43, %v7725_v55  ;;  %v6140_v58 = vsel %vm199_vm3, %v5751_v63, %v5994_v52 }
 0x7f2   :  { %7835 = vst [vmem:[#allocation72_spill] sm:$0xff] %v6049_v42  ;;  %v2194_v47 = vpack.c.bf16 %v2050_v4, %v2046_v51  ;;  %v2012_v51 = vsel %vm87_vm5, %v5793_v46, %v5695_v59  ;;  %v6110_v28 = vmul.f32 %v6077_v53, %v1948_v43 }
 0x7f3   :  { %7836 = vst [vmem:[#allocation73_spill] sm:$0xff] %v6052_v15  ;;  %v2014_v21 = vmul.f32 %v2012_v51, %v7715_v29  ;;  %v6114_v42 = vmul.f32 %v6080_v19, %v2012_v51 }
 0x7f4   :  { %7840 = vst [vmem:[#allocation77_spill] sm:$0xff] %v6077_v53  ;;  %2248 = vmatpush.bf16.msrb.mxu3 %v2194_v47 }
 0x7f5   :  { %7841 = vst [vmem:[#allocation78_spill] sm:$0xff] %v6080_v19 }
 0x7f6   :  { %v6090_v4 = vpop.permute.xlu1 %2004  ;;  %v6092_v5 = vpop.permute.xlu0 %1940  ;;  %7845 = vst [vmem:[#allocation82_spill] sm:$0xff] %v6110_v28 }
 0x7f7   :  { %7842 = vst [vmem:[#allocation79_spill] sm:$0xff] %v6092_v5  ;;  %v2013_v16 = vsel %vm87_vm5, %v6090_v4, %v5687_v41  ;;  %v1949_v47 = vsel %vm32_vm7, %v6092_v5, %v5731_v10  ;;  %v6117_v36 = vpop.permute.xlu2 %2030 }
 0x7f8   :  { %v2018_v33 = vmul.f32 %v2013_v16, %v7715_v29  ;;  %v6104_v15 = vmul.f32 %v6080_v19, %v2013_v16  ;;  %v6107_v59 = vmul.f32 %v6077_v53, %v1949_v47  ;;  %7846 = vst [vmem:[#allocation83_spill] sm:$0xff] %v6114_v42  ;;  %v1954_v51 = vmul.f32 %v1949_v47, %v7725_v55 }
 0x7f9   :  { %v2186_v19 = vpack.c.bf16 %v1986_v11, %v1982_v13 }
 0x7fa   :  { %7843 = vst [vmem:[#allocation80_spill] sm:$0xff] %v6104_v15  ;;  %v2190_v5 = vpack.c.bf16 %v2018_v33, %v2014_v21  ;;  %v2182_v21 = vpack.c.bf16 %v1954_v51, %v1950_v37  ;;  %v6134_v33 = vsel %vm199_vm3, %v5994_v52, %v5711_v17  ;;  %v7847_v17 = vld [vmem:[#allocation13_spill] sm:$0xff]  ;;  %v3257_v51 = vld [vmem:[%s7433_s2 + $0x74] sm:$0xf]  ;;  %v3194_v37 = vld [vmem:[%s7433_s2 + $0x70] sm:$0xf] }
 0x7fb   :  { %7844 = vst [vmem:[#allocation81_spill] sm:$0xff] %v6107_v59  ;;  %v2143_v11 = vmul.f32 %v6140_v58, %v7847_v17  ;;  %v2144_v63 = vmul.f32 %v6134_v33, %v7760_v12 }
 0x7fc   :  { %2249 = vmatpush.bf16.msrb.mxu3 %v2190_v5 }
 0x7fe   :  { %v6124_v53 = vpop.permute.xlu1 %2028  ;;  %v6126_v29 = vpop.permute.xlu0 %1998 }
 0x7ff   :  { %v2065_v27 = vpop.permute.xlu2 %2064 }
 0x800   :  { %2250 = vmatpush.bf16.msrb.mxu3 %v2186_v19 }
 0x804   :  { %2251 = vmatpush.bf16.msrb.mxu3 %v2182_v21 }
 0x806   :  { %v6142_v5 = vpop.permute.xlu1 %1996  ;;  %v2129_v13 = vpop.permute.xlu0 %2128 }
 0x807   :  { %v6147_v55 = vsel %vm199_vm3, %v2129_v13, %v5978_v23  ;;  %v6152_v19 = vsel %vm199_vm3, %v5759_v9, %v2129_v13  ;;  %v3196_v9 = vld [vmem:[%s7433_s2 + $0x78] sm:$0xf0] }
 0x808   :  { %v2147_v43 = vmul.f32 %v6152_v19, %v7847_v17  ;;  %v2148_v52 = vmul.f32 %v6147_v55, %v7760_v12  ;;  %v6171_v21 = vor.u32 %v3257_v51, %v3196_v9  ;;  %v3258_v12 = vld [vmem:[%s7433_s2 + $0x74] sm:$0xf0]  ;;  %v2071_v17 = vsel %vm143_vm4, %v2065_v27, %v5843_v18  ;;  %v6197_v18 = vpop.permute.xlu2 %1930 }
 0x809   :  { %v6176_v13 = vor.u32 %v3258_v12, %v3194_v37 }
 0x80a   :  { %v2211_v47 = vpack.c.bf16 %v2147_v43, %v2143_v11  ;;  %v2212_v23 = vpack.c.bf16 %v2148_v52, %v2144_v63  ;;  %3200 = vmatmul.msk.bf16.vlgmr.msra.gmra.mxu1 %vm1364_vm10, %v6171_v21  ;;  %v6186_v11 = vsel %vm171_vm2, %v2095_v61, %v5791_v32  ;;  %v6191_v63 = vsel %vm171_vm2, %v5699_v0, %v2095_v61 }
 0x80b   :  { %v6194_v43 = vperm.slane %v5820_v20, 2  ;;  %2252 = vmatmul.bf16.vlgmr.msrb.gmra.mxu3 %v6176_v13  ;;  %v2084_v61 = vmul.f32 %v2071_v17, %v7771_v25  ;;  %v2112_v37 = vmul.f32 %v6186_v11, %v7766_v8 }
 0x80c   :  { %2272 = vmatpush.bf16.msra.mxu2 %v2211_v47  ;;  %2300 = vmatpush.bf16.msrb.mxu1 %v2212_v23 }
 0x80d   :  { %7848 = vst [vmem:[#allocation13_spill] sm:$0xff] %v6194_v43 }
 0x80e   :  { %v2063_v52 = vpop.permute.xlu1 %2062  ;;  %v2097_v47 = vpop.permute.xlu0 %2096 }
 0x80f   :  { %v2070_v23 = vsel %vm143_vm4, %v2063_v52, %v5829_v50  ;;  %v6205_v32 = vsel %vm171_vm2, %v2097_v47, %v5799_v14  ;;  %v6210_v0 = vsel %vm171_vm2, %v5920_v35, %v2097_v47  ;;  %v6216_v51 = vsel %vm143_vm4, %v5733_v22, %v2063_v52 }
 0x810   :  { %v2080_v9 = vmul.f32 %v2070_v23, %v7771_v25  ;;  %v6220_v50 = vmul.f32 %v6194_v43, %v2070_v23  ;;  %v2111_v14 = vmul.f32 %v6191_v63, %v7754_v6  ;;  %v2115_v35 = vmul.f32 %v6210_v0, %v7754_v6 }
 0x811   :  { %v2116_v12 = vmul.f32 %v6205_v32, %v7766_v8  ;;  %v6233_v22 = vsel %vm143_vm4, %v5976_v40, %v2065_v27  ;;  %v6236_v25 = vmul.f32 %v6194_v43, %v2071_v17  ;;  %v2079_v47 = vmul.f32 %v6216_v51, %v4230_v56 }
 0x812   :  { %v2204_v52 = vpack.c.bf16 %v2084_v61, %v2080_v9  ;;  %v2207_v23 = vpack.c.bf16 %v2115_v35, %v2111_v14  ;;  %v2083_v8 = vmul.f32 %v6233_v22, %v4230_v56  ;;  %v6252_v17 = vsel %vm115_vm6, %v5673_v62, %v6124_v53  ;;  %v6254_v61 = vpop.permute.xlu2 %2162  ;;  %v7849_v9 = vld [vmem:[#allocation16_spill] sm:$0xff]  ;;  %v7850_v62 = vld [vmem:[#allocation27_spill] sm:$0xff] }
 0x813   :  { %v2208_v38 = vpack.c.bf16 %v2116_v12, %v2112_v37  ;;  %v2051_v56 = vmul.f32 %v6252_v17, %v7849_v9  ;;  %v6266_v14 = vsel %vm87_vm5, %v5687_v41, %v6142_v5  ;;  %v6270_v37 = vpack.c.bf16 %v7850_v62, %v5660_v34  ;;  %v7852_v35 = vld [vmem:[#allocation7_spill] sm:$0xff] }
 0x814   :  { %2273 = vmatpush.bf16.msra.mxu2 %v2207_v23  ;;  %v2203_v27 = vpack.c.bf16 %v2083_v8, %v2079_v47  ;;  %v2047_v12 = vmul.f32 %v7852_v35, %v7849_v9  ;;  %v7854_v47 = vld [vmem:[#allocation19_spill] sm:$0xff] }
 0x815   :  { %2301 = vmatpush.bf16.msrb.mxu1 %v2208_v38  ;;  %v6260_v38 = vpack.c.bf16 %v5618_v1, %v5589_v24  ;;  %7851 = vst [vmem:[#allocation16_spill] sm:$0xff] %v6270_v37  ;;  %v6280_v24 = vperm.slane %v6070_v49, 3  ;;  %v2019_v34 = vmul.f32 %v6266_v14, %v7854_v47  ;;  %v2015_v6 = vmul.f32 %v5885_v31, %v7854_v47 }
 0x816   :  { %v6244_v16 = vpop.permute.xlu1 %1966  ;;  %v6246_v40 = vpop.permute.xlu0 %1932  ;;  %v2195_v8 = vpack.c.bf16 %v2051_v56, %v2047_v12  ;;  %v2038_v56 = vsel %vm115_vm6, %v6117_v36, %v5753_v39  ;;  %v7858_v12 = vld [vmem:[#allocation45_spill] sm:$0xff]  ;;  %v6325_v39 = vperm.slane %v6013_v60, 3 }
 0x817   :  { %7853 = vst [vmem:[#allocation27_spill] sm:$0xff] %v6280_v24 }
 0x818   :  { %2274 = vmatpush.bf16.msra.mxu2 %v2203_v27  ;;  %v7855_v27 = vld [vmem:[#allocation6_spill] sm:$0xff]  ;;  %7861 = vst [vmem:[#allocation84_spill] sm:$0xff] %v6325_v39  ;;  %v6373_v15 = vmul.f32 %v6325_v39, %v2038_v56 }
 0x819   :  { %2302 = vmatpush.bf16.msrb.mxu1 %v2204_v52  ;;  %v2006_v52 = vsel %vm87_vm5, %v6126_v29, %v5793_v46 }
 0x81a   :  { %v6289_v9 = vmul.f32 %v2006_v52, %v7855_v27  ;;  %v6300_v43 = vmul.f32 %v6280_v24, %v2006_v52  ;;  %v6318_v52 = vsel %vm32_vm7, %v5731_v10, %v6246_v40  ;;  %v6320_v47 = vpop.permute.xlu2 %1968  ;;  %v7863_v10 = vld [vmem:[#allocation3_spill] sm:$0xff] }
 0x81b   :  { %7860 = vst [vmem:[#allocation45_spill] sm:$0xff] %v6318_v52 }
 0x81c   :  { %2275 = vmatpush.bf16.msra.mxu2 %v6260_v38  ;;  %7857 = vst [vmem:[#allocation19_spill] sm:$0xff] %v6300_v43 }
 0x81d   :  { %2303 = vmatpush.bf16.msrb.mxu1 %v6270_v37  ;;  %7868 = vst [vmem:[#allocation3_spill] sm:$0xff] %v6373_v15 }
 0x81e   :  { %v2001_v1 = vpop.permute.xlu1 %2000  ;;  %v2159_v41 = vpop.permute.xlu0 %2158 }
 0x81f   :  { %v2007_v23 = vsel %vm87_vm5, %v2001_v1, %v6090_v4 }
 0x820   :  { %v6292_v46 = vmul.f32 %v2007_v23, %v7855_v27  ;;  %v6295_v62 = vmul.f32 %v6280_v24, %v2007_v23  ;;  %2276 = vmatpush.bf16.msra.mxu2 %v2195_v8  ;;  %v6312_v23 = vsel %vm115_vm6, %v7858_v12, %v6117_v36  ;;  %v2191_v8 = vpack.c.bf16 %v2019_v34, %v2015_v6  ;;  %v7862_v12 = vld [vmem:[#allocation22_spill] sm:$0xff]  ;;  %v7864_v34 = vld [vmem:[#allocation28_spill] sm:$0xff] }
 0x821   :  { %7859 = vst [vmem:[#allocation6_spill] sm:$0xff] %v6312_v23  ;;  %v6330_v36 = vsel %vm227_vm0, %v5873_v45, %v2159_v41  ;;  %v2048_v4 = vmul.f32 %v6312_v23, %v7862_v12  ;;  %v6335_v24 = vmul.f32 %v2038_v56, %v7863_v10  ;;  %v6341_v6 = vsel %vm32_vm7, %v5697_v54, %v6197_v18 }
 0x822   :  { %7856 = vst [vmem:[#allocation7_spill] sm:$0xff] %v6295_v62  ;;  %v1955_v27 = vmul.f32 %v6318_v52, %v7864_v34  ;;  %v6348_v45 = vsel %vm87_vm5, %v6142_v5, %v2001_v1  ;;  %v7867_v52 = vld [vmem:[#allocation9_spill] sm:$0xff] }
 0x823   :  { %v2175_v42 = vmul.f32 %v6330_v36, %v7867_v52 }
 0x824   :  { %2277 = vmatpush.bf16.msra.mxu2 %v2191_v8  ;;  %v7865_v8 = vld [vmem:[#allocation52_spill] sm:$0xff] }
 0x826   :  { %v2161_v43 = vpop.permute.xlu1 %2160  ;;  %v2033_v62 = vpop.permute.xlu0 %2032 }
 0x827   :  { %v6353_v28 = vsel %vm227_vm0, %v7865_v8, %v2161_v43  ;;  %v2039_v54 = vsel %vm115_vm6, %v2033_v62, %v6035_v30  ;;  %v6361_v59 = vsel %vm115_vm6, %v6124_v53, %v2033_v62  ;;  %v7869_v30 = vld [vmem:[#allocation51_spill] sm:$0xff]  ;;  %v1951_v62 = vmul.f32 %v6341_v6, %v7864_v34 }
 0x828   :  { %7866 = vst [vmem:[#allocation22_spill] sm:$0xff] %v6361_v59  ;;  %v2179_v5 = vmul.f32 %v6353_v28, %v7867_v52  ;;  %v2052_v1 = vmul.f32 %v6361_v59, %v7862_v12  ;;  %v6370_v8 = vmul.f32 %v2039_v54, %v7863_v10  ;;  %v6379_v53 = vsel %vm87_vm5, %v7869_v30, %v6126_v29  ;;  %v7872_v10 = vld [vmem:[#allocation21_spill] sm:$0xff]  ;;  %v7873_v29 = vld [vmem:[#allocation58_spill] sm:$0xff] }
 0x829   :  { %v6384_v52 = vmul.f32 %v6325_v39, %v2039_v54  ;;  %v7871_v12 = vpack.c.bf16 %v5951_v2, %v5934_v44  ;;  %v2020_v56 = vmul.f32 %v6348_v45, %v7872_v10  ;;  %v6397_v34 = vsel %vm59_vm8, %v7873_v29, %v6244_v16  ;;  %v7876_v30 = vld [vmem:[#allocation26_spill] sm:$0xff]  ;;  %v7884_v39 = vld [vmem:[#allocation11_spill] sm:$0xff] }
 0x82a   :  { %v2215_v23 = vpack.c.bf16 %v2179_v5, %v2175_v42  ;;  %v2196_v37 = vpack.c.bf16 %v2052_v1, %v2048_v4  ;;  %v6403_v2 = vsel %vm59_vm8, %v5931_v26, %v6320_v47  ;;  %v2183_v44 = vpack.c.bf16 %v1955_v27, %v1951_v62  ;;  %v7874_v5 = vld [vmem:[#allocation8_spill] sm:$0xff]  ;;  %v6418_v26 = vpop.permute.xlu2 %1936 }
 0x82b   :  { %7870 = vst [vmem:[#allocation28_spill] sm:$0xff] %v6384_v52  ;;  %2278 = vmatpush.bf16.msra.mxu2 %v7871_v12  ;;  %v2016_v4 = vmul.f32 %v6379_v53, %v7872_v10  ;;  %v6410_v54 = vperm.slane %v5740_v3, 1  ;;  %v6416_v1 = vsel %vm227_vm0, %v6254_v61, %v7874_v5  ;;  %v7875_v27 = vpack.c.bf16 %v6001_v48, %v5981_v57 }
 0x82c   :  { %2293 = vmatpush.bf16.msrb.mxu0 %v2215_v23  ;;  %2304 = vmatpush.bf16.msrb.mxu1 %v2196_v37  ;;  %v1984_v23 = vmul.f32 %v6397_v34, %v7876_v30  ;;  %v1988_v37 = vmul.f32 %v6403_v2, %v7876_v30  ;;  %v6430_v62 = vsel %vm227_vm0, %v2159_v41, %v6254_v61  ;;  %v7878_v41 = vld [vmem:[#allocation15_spill] sm:$0xff]  ;;  %v6476_v15 = vperm.slane %v7884_v39, 1 }
 0x82d   :  { %v2192_v29 = vpack.c.bf16 %v2020_v56, %v2016_v4  ;;  %v2488_v61 = vmul.f32 %v6410_v54, %v6152_v19  ;;  %v2177_v56 = vmul.f32 %v6416_v1, %v7878_v41  ;;  %v7880_v19 = vld [vmem:[#allocation41_spill] sm:$0xff] }
 0x82e   :  { %v6432_v12 = vpop.permute.xlu1 %1934  ;;  %v2165_v10 = vpop.permute.xlu0 %2164  ;;  %v2188_v59 = vpack.c.bf16 %v1988_v37, %v1984_v23  ;;  %v7885_v23 = vld [vmem:[#allocation48_spill] sm:$0xff]  ;;  %v7886_v37 = vld [vmem:[#allocation38_spill] sm:$0xff] }
 0x82f   :  { %2279 = vmatpush.bf16.msra.mxu2 %v2183_v44  ;;  %v6438_v57 = vsel %vm32_vm7, %v6197_v18, %v6432_v12  ;;  %v6442_v48 = vsel %vm227_vm0, %v2161_v43, %v2165_v10  ;;  %v7877_v44 = vld [vmem:[#allocation10_spill] sm:$0xff]  ;;  %3201 = vmatmul.msk.bf16.vlgmr.msrb.gmra.mxu0 %vm1364_vm10, %v6171_v21  ;;  %v6461_v43 = vsel %vm32_vm7, %v6246_v40, %v6418_v26 }
 0x830   :  { %2328 = vmatpush.bf16.msra.mxu0 %v7875_v27  ;;  %v6447_v5 = vsel %vm227_vm0, %v2165_v10, %v7877_v44  ;;  %2305 = vmatpush.bf16.msrb.mxu1 %v2192_v29  ;;  %v7879_v18 = vld [vmem:[#allocation2_spill] sm:$0xff]  ;;  %v7881_v10 = vld [vmem:[#allocation47_spill] sm:$0xff]  ;;  %v2484_v40 = vmul.f32 %v6410_v54, %v6140_v58 }
 0x831   :  { %v2176_v4 = vmul.f32 %v6430_v62, %v7879_v18  ;;  %v2180_v27 = vmul.f32 %v6442_v48, %v7879_v18  ;;  %v2181_v30 = vmul.f32 %v6447_v5, %v7878_v41  ;;  %v7882_v44 = vpack.c.bf16 %v7880_v19, %v7881_v10  ;;  %v7883_v29 = vld [vmem:[#allocation23_spill] sm:$0xff] }
 0x832   :  { %v1952_v42 = vmul.f32 %v6438_v57, %v7883_v29  ;;  %2280 = vmatmul.bf16.vlgmr.msra.gmra.mxu2 %v6176_v13  ;;  %v6479_v41 = vperm.slane %v5740_v3, 2  ;;  %v1956_v19 = vmul.f32 %v6461_v43, %v7883_v29  ;;  %v2534_v10 = vpack.c.bf16 %v2488_v61, %v2484_v40  ;;  %v7889_v3 = vld [vmem:[#allocation4_spill] sm:$0xff] }
 0x833   :  { %v2216_v18 = vpack.c.bf16 %v2180_v27, %v2176_v4  ;;  %v2217_v52 = vpack.c.bf16 %v2181_v30, %v2177_v56  ;;  %v7887_v4 = vpack.c.bf16 %v7885_v23, %v7886_v37  ;;  %v7888_v56 = vld [vmem:[#allocation42_spill] sm:$0xff]  ;;  %v6496_v61 = vperm.slane %v5820_v20, 1  ;;  %v7892_v29 = vld [vmem:[#allocation12_spill] sm:$0xff]  ;;  %v7897_v23 = vld [vmem:[#allocation61_spill] sm:$0xff] }
 0x834   :  { %2329 = vmatpush.bf16.msra.mxu0 %v7882_v44  ;;  %2306 = vmatpush.bf16.msrb.mxu1 %v2188_v59  ;;  %v2470_v44 = vmul.f32 %v6476_v15, %v6210_v0  ;;  %v2489_v58 = vmul.f32 %v6479_v41, %v6147_v55  ;;  %v7890_v27 = vpack.c.bf16 %v7888_v56, %v7889_v3  ;;  %v6501_v55 = vperm.slane %v7884_v39, 2  ;;  %v7893_v20 = vld [vmem:[#allocation54_spill] sm:$0xff] }
 0x835   :  { %2321 = vmatpush.bf16.msra.mxu3 %v2216_v18  ;;  %2349 = vmatpush.bf16.msrb.mxu2 %v2217_v52  ;;  %v2184_v30 = vpack.c.bf16 %v1956_v19, %v1952_v42  ;;  %v2466_v59 = vmul.f32 %v6476_v15, %v6191_v63  ;;  %v2485_v0 = vmul.f32 %v6479_v41, %v6134_v33  ;;  %v7891_v52 = vld [vmem:[#allocation18_spill] sm:$0xff]  ;;  %v7894_v42 = vld [vmem:[#allocation53_spill] sm:$0xff] }
 0x836   :  { %v6505_v40 = vpack.c.bf16 %v7892_v29, %v7891_v52  ;;  %v2448_v63 = vmul.f32 %v6496_v61, %v6216_v51  ;;  %v7895_v18 = vpack.c.bf16 %v7893_v20, %v7894_v42  ;;  %v2471_v39 = vmul.f32 %v6501_v55, %v6205_v32  ;;  %v7908_v20 = vld [vmem:[#allocation43_spill] sm:$0xff] }
 0x837   :  { %v2530_v19 = vpack.c.bf16 %v2470_v44, %v2466_v59  ;;  %v2535_v33 = vpack.c.bf16 %v2489_v58, %v2485_v0  ;;  %v2467_v51 = vmul.f32 %v6501_v55, %v6186_v11  ;;  %v7899_v44 = vld [vmem:[#allocation24_spill] sm:$0xff]  ;;  %v7900_v58 = vld [vmem:[#allocation71_spill] sm:$0xff]  ;;  %v7901_v3 = vpack.c.bf16 %v6370_v8, %v6335_v24  ;;  %v7906_v8 = vld [vmem:[#allocation46_spill] sm:$0xff] }
 0x838   :  { %2330 = vmatpush.bf16.msra.mxu0 %v7887_v4  ;;  %2307 = vmatpush.bf16.msrb.mxu1 %v2184_v30  ;;  %v2452_v4 = vmul.f32 %v6496_v61, %v6233_v22  ;;  %v6529_v32 = vsel %vm59_vm8, %v6244_v16, %v7899_v44  ;;  %v6535_v56 = vsel %vm59_vm8, %v6320_v47, %v7900_v58  ;;  %v7903_v11 = vld [vmem:[#allocation68_spill] sm:$0xff]  ;;  %v6544_v0 = vperm.slane %v6013_v60, 1  ;;  %v7905_v16 = vld [vmem:[#allocation5_spill] sm:$0xff] }
 0x839   :  { %2567 = vmatpush.bf16.msrb.mxu3 %v7890_v27  ;;  %2595 = vmatpush.bf16.msra.mxu2 %v2534_v10  ;;  %v7896_v10 = vld [vmem:[#allocation60_spill] sm:$0xff]  ;;  %v7902_v27 = vld [vmem:[#allocation66_spill] sm:$0xff]  ;;  %v2531_v59 = vpack.c.bf16 %v2471_v39, %v2467_v51  ;;  %v1985_v52 = vmul.f32 %v6529_v32, %v7905_v16  ;;  %v1989_v47 = vmul.f32 %v6535_v56, %v7905_v16 }
 0x83a   :  { %3202 = vmatmul.msk.bf16.vlgmr.msra.gmra.mxu3 %vm1364_vm10, %v6171_v21  ;;  %v7898_v37 = vpack.c.bf16 %v7896_v10, %v7897_v23  ;;  %v2526_v22 = vpack.c.bf16 %v2452_v4, %v2448_v63  ;;  %v7904_v30 = vpack.c.bf16 %v7902_v27, %v7903_v11  ;;  %v2434_v24 = vmul.f32 %v6544_v0, %v6252_v17  ;;  %v7916_v51 = vld [vmem:[#allocation22_spill] sm:$0xff]  ;;  %v7917_v58 = vld [vmem:[#allocation16_spill] sm:$0xff] }
 0x83b   :  { %2308 = vmatmul.bf16.vlgmr.msrb.gmra.mxu1 %v6176_v13  ;;  %v6556_v29 = vsel %vm32_vm7, %v6432_v12, %v7906_v8  ;;  %v7907_v63 = vpack.c.bf16 %v6292_v46, %v6289_v9  ;;  %v2430_v42 = vmul.f32 %v6544_v0, %v7852_v35  ;;  %v7911_v9 = vld [vmem:[#allocation29_spill] sm:$0xff]  ;;  %v7912_v35 = vpack.c.bf16 %v6236_v25, %v6220_v50  ;;  %v7914_v25 = vld [vmem:[#allocation75_spill] sm:$0xff]  ;;  %v7918_v27 = vld [vmem:[#allocation6_spill] sm:$0xff] }
 0x83c   :  { %2588 = vmatpush.bf16.msra.mxu1 %v7895_v18  ;;  %2331 = vmatpush.bf16.msra.mxu0 %v6505_v40  ;;  %v6565_v18 = vperm.slane %v6070_v49, 1  ;;  %v1953_v46 = vmul.f32 %v6556_v29, %v7911_v9  ;;  %v2189_v39 = vpack.c.bf16 %v1989_v47, %v1985_v52  ;;  %v6585_v10 = vperm.slane %v6013_v60, 2  ;;  %v7913_v60 = vld [vmem:[#allocation72_spill] sm:$0xff]  ;;  %v7921_v47 = vld [vmem:[#allocation83_spill] sm:$0xff] }
 0x83d   :  { %2568 = vmatpush.bf16.msrb.mxu3 %v7898_v37  ;;  %2596 = vmatpush.bf16.msra.mxu2 %v2530_v19  ;;  %v7909_v19 = vld [vmem:[#allocation17_spill] sm:$0xff]  ;;  %v2522_v23 = vpack.c.bf16 %v2434_v24, %v2430_v42  ;;  %v3259_v37 = vld [vmem:[%s7433_s2 + $0x54] sm:$0xf]  ;;  %v7915_v4 = vpack.c.bf16 %v7913_v60, %v7914_v25  ;;  %v7923_v8 = vld [vmem:[#allocation55_spill] sm:$0xff] }
 0x83e   :  { %v6568_v17 = vperm.slane %v7909_v19, 1  ;;  %v2435_v44 = vmul.f32 %v6585_v10, %v7916_v51  ;;  %v2431_v11 = vmul.f32 %v6585_v10, %v7918_v27  ;;  %v7919_v16 = vld [vmem:[#allocation76_spill] sm:$0xff]  ;;  %v6628_v42 = vperm.slane %v7909_v19, 2  ;;  %v7933_v60 = vld [vmem:[#allocation62_spill] sm:$0xff]  ;;  %v7934_v25 = vld [vmem:[#allocation59_spill] sm:$0xff] }
 0x83f   :  { %v6617_v52 = vperm.slane %v7919_v16, 1  ;;  %v6670_v51 = vperm.slane %v7919_v16, 2  ;;  %v7938_v27 = vld [vmem:[#allocation82_spill] sm:$0xff] }
 0x840   :  { %2623 = vmatpush.bf16.msrb.mxu1 %v2535_v33  ;;  %2332 = vmatpush.bf16.msra.mxu0 %v7901_v3  ;;  %v7910_v33 = vld [vmem:[#allocation79_spill] sm:$0xff]  ;;  %7924 = vst [vmem:[#allocation52_spill] sm:$0xff] %v6628_v42 }
 0x841   :  { %2569 = vmatpush.bf16.msrb.mxu3 %v7904_v30  ;;  %2597 = vmatpush.bf16.msra.mxu2 %v2526_v22  ;;  %v6574_v12 = vsel %vm32_vm7, %v6418_v26, %v7910_v33  ;;  %v2416_v26 = vmul.f32 %v6565_v18, %v6266_v14  ;;  %v2502_v14 = vmul.f32 %v6568_v17, %v6330_v36  ;;  %v6614_v30 = vperm.slane %v6070_v49, 2  ;;  %v7920_v36 = vld [vmem:[#allocation80_spill] sm:$0xff] }
 0x842   :  { %3203 = vmatmul.msk.bf16.vlgmr.msrb.gmra.mxu2 %vm1364_vm10, %v6171_v21  ;;  %v3223_v21 = vld [vmem:[%s7433_s2 + $0x58] sm:$0xf0]  ;;  %v1957_v50 = vmul.f32 %v6574_v12, %v7911_v9  ;;  %v7922_v24 = vpack.c.bf16 %v7920_v36, %v7921_v47  ;;  %v2523_v49 = vpack.c.bf16 %v2435_v44, %v2431_v11  ;;  %v6631_v33 = vperm.slane %v7909_v19, 3  ;;  %7936 = vst [vmem:[#allocation51_spill] sm:$0xff] %v6670_v51 }
 0x843   :  { %v6609_v3 = vor.u32 %v3259_v37, %v3223_v21  ;;  %v2413_v9 = vmul.f32 %v6614_v30, %v6379_v53  ;;  %v7930_v53 = vld [vmem:[#allocation67_spill] sm:$0xff]  ;;  %v7931_v37 = vld [vmem:[#allocation65_spill] sm:$0xff]  ;;  %v2377_v36 = vmul.f32 %v6670_v51, %v6438_v57  ;;  %v2381_v47 = vmul.f32 %v6670_v51, %v6461_v43 }
 0x844   :  { %2624 = vmatpush.bf16.msrb.mxu1 %v2531_v59  ;;  %2333 = vmatpush.bf16.msra.mxu0 %v7907_v63  ;;  %v2185_v22 = vpack.c.bf16 %v1957_v50, %v1953_v46  ;;  %v6623_v63 = vperm.slane %v7923_v8, 2  ;;  %7925 = vst [vmem:[#allocation9_spill] sm:$0xff] %v6631_v33  ;;  %v7926_v46 = vld [vmem:[#allocation45_spill] sm:$0xff]  ;;  %v2508_v19 = vmul.f32 %v6631_v33, %v6447_v5  ;;  %v6687_v57 = vperm.slane %v7923_v8, 3  ;;  %v7947_v43 = vld [vmem:[#allocation3_spill] sm:$0xff] }
 0x845   :  { %2570 = vmatpush.bf16.msrb.mxu3 %v7908_v20  ;;  %2598 = vmatpush.bf16.msra.mxu2 %v6260_v38  ;;  %v2506_v38 = vmul.f32 %v6568_v17, %v6353_v28  ;;  %v2412_v28 = vmul.f32 %v6565_v18, %v5885_v31  ;;  %v2417_v20 = vmul.f32 %v6614_v30, %v6348_v45  ;;  %v7951_v8 = vld [vmem:[#allocation19_spill] sm:$0xff] }
 0x846   :  { %v2507_v45 = vmul.f32 %v6628_v42, %v6442_v48  ;;  %v7932_v21 = vpack.c.bf16 %v7930_v53, %v7931_v37  ;;  %v3221_v48 = vld [vmem:[%s7433_s2 + $0x50] sm:$0xf]  ;;  %v2399_v5 = vmul.f32 %v6623_v63, %v6403_v2  ;;  %v2503_v50 = vmul.f32 %v6628_v42, %v6430_v62  ;;  %v7937_v2 = vld [vmem:[#allocation81_spill] sm:$0xff]  ;;  %v7940_v62 = vld [vmem:[#allocation14_spill] sm:$0xff] }
 0x847   :  { %v2538_v59 = vpack.c.bf16 %v2506_v38, %v2502_v14  ;;  %v2518_v31 = vpack.c.bf16 %v2416_v26, %v2412_v28  ;;  %v7927_v26 = vld [vmem:[#allocation73_spill] sm:$0xff]  ;;  %v7928_v38 = vld [vmem:[#allocation74_spill] sm:$0xff]  ;;  %v2519_v28 = vpack.c.bf16 %v2417_v20, %v2413_v9  ;;  %v2504_v14 = vmul.f32 %v6631_v33, %v6416_v1  ;;  %v7944_v20 = vld [vmem:[#allocation40_spill] sm:$0xff] }
 0x848   :  { %2625 = vmatpush.bf16.msrb.mxu1 %v7912_v35  ;;  %2334 = vmatpush.bf16.msra.mxu0 %v2189_v39  ;;  %v2380_v35 = vmul.f32 %v6617_v52, %v7926_v46  ;;  %v2376_v39 = vmul.f32 %v6617_v52, %v6341_v6  ;;  %v2395_v6 = vmul.f32 %v6623_v63, %v6397_v34  ;;  %v7946_v46 = vld [vmem:[#allocation28_spill] sm:$0xff]  ;;  %v724_v33 = vld [vmem:[%s7432_s3 + $0x68] sm:$0xff] }
 0x849   :  { %2571 = vmatpush.bf16.msrb.mxu3 %v7915_v4  ;;  %2599 = vmatpush.bf16.msra.mxu2 %v2522_v23  ;;  %v7929_v23 = vpack.c.bf16 %v7927_v26, %v7928_v38  ;;  %v7935_v4 = vpack.c.bf16 %v7933_v60, %v7934_v25  ;;  %v2539_v44 = vpack.c.bf16 %v2507_v45, %v2503_v50 }
 0x84a   :  { %v2510_v34 = vpack.c.bf16 %v2380_v35, %v2376_v39  ;;  %v7939_v11 = vpack.c.bf16 %v7937_v2, %v7938_v27  ;;  %v2515_v1 = vpack.c.bf16 %v2399_v5, %v2395_v6  ;;  %v2511_v9 = vpack.c.bf16 %v2381_v47, %v2377_v36  ;;  %v6753_v27 = vpop.permute.xlu1 %2552 }
 0x84b   :  { %3227 = vmatmul.msk.bf16.vlgmr.msra.gmra.mxu1 %vm1364_vm10, %v6609_v3  ;;  %v7948_v35 = vpack.c.bf16 %v7946_v46, %v7947_v43  ;;  %v2396_v45 = vmul.f32 %v6687_v57, %v6529_v32  ;;  %v2400_v39 = vmul.f32 %v6687_v57, %v6535_v56 }
 0x84c   :  { %2626 = vmatpush.bf16.msrb.mxu1 %v7917_v58  ;;  %2335 = vmatpush.bf16.msra.mxu0 %v2185_v22  ;;  %v2540_v22 = vpack.c.bf16 %v2508_v19, %v2504_v14  ;;  %v6699_v19 = vperm.slane %v7919_v16, 3 }
 0x84d   :  { %2572 = vmatpush.bf16.msrb.mxu3 %v7922_v24  ;;  %2600 = vmatpush.bf16.msra.mxu2 %v2518_v31  ;;  %v7943_v24 = vld [vmem:[#allocation49_spill] sm:$0xff] }
 0x84e   :  { %7949 = vst [vmem:[#allocation21_spill] sm:$0xff] %v6699_v19  ;;  %v2378_v38 = vmul.f32 %v6699_v19, %v6556_v29  ;;  %v2382_v32 = vmul.f32 %v6699_v19, %v6574_v12 }
 0x84f   :  { %2336 = vmatmul.bf16.vlgmr.msra.gmra.mxu0 %v6176_v13  ;;  %v3260_v13 = vld [vmem:[%s7433_s2 + $0x54] sm:$0xf0] }
 0x850   :  { %2616 = vmatpush.bf16.msrb.mxu0 %v2538_v59  ;;  %2627 = vmatpush.bf16.msrb.mxu1 %v2523_v49  ;;  %v3222_v58 = vor.u32 %v3260_v13, %v3221_v48  ;;  %v7941_v59 = vld [vmem:[#allocation44_spill] sm:$0xff]  ;;  %v7945_v49 = vpack.c.bf16 %v7943_v24, %v7944_v20  ;;  %v2512_v56 = vpack.c.bf16 %v2382_v32, %v2378_v38 }
 0x851   :  { %2573 = vmatpush.bf16.msrb.mxu3 %v7929_v23  ;;  %2601 = vmatpush.bf16.msra.mxu2 %v7935_v4  ;;  %v7942_v31 = vpack.c.bf16 %v7940_v62, %v7941_v59  ;;  %v2516_v23 = vpack.c.bf16 %v2400_v39, %v2396_v45  ;;  %v6740_v4 = vpop.permute.xlu0 %2547 }
 0x854   :  { %2651 = vmatpush.bf16.msra.mxu0 %v7932_v21  ;;  %2628 = vmatpush.bf16.msrb.mxu1 %v2519_v28 }
 0x855   :  { %2574 = vmatpush.bf16.msrb.mxu3 %v7939_v11  ;;  %2602 = vmatpush.bf16.msra.mxu2 %v2510_v34 }
 0x858   :  { %2652 = vmatpush.bf16.msra.mxu0 %v7942_v31  ;;  %2575 = vmatmul.bf16.vlgmr.msrb.gmra.mxu3 %v3222_v58 }
 0x859   :  { %2644 = vmatpush.bf16.msra.mxu3 %v2539_v44  ;;  %2672 = vmatpush.bf16.msrb.mxu2 %v2540_v22 }
 0x85a   :  { %2629 = vmatpush.bf16.msrb.mxu1 %v2515_v1  ;;  %2603 = vmatmul.bf16.vlgmr.msra.gmra.mxu2 %v3222_v58 }
 0x85c   :  { %2653 = vmatpush.bf16.msra.mxu0 %v7945_v49 }
 0x85e   :  { %2630 = vmatpush.bf16.msrb.mxu1 %v2511_v9 }
 0x85f   :  { %3228 = vmatmul.msk.bf16.vlgmr.msrb.gmra.mxu0 %vm1364_vm10, %v6609_v3 }
 0x860   :  { %2654 = vmatpush.bf16.msra.mxu0 %v6505_v40  ;;  %v7950_v40 = vld [vmem:[#allocation7_spill] sm:$0xff] }
 0x861   :  { %2631 = vmatmul.bf16.vlgmr.msrb.gmra.mxu1 %v3222_v58  ;;  %v7952_v26 = vpack.c.bf16 %v7950_v40, %v7951_v8 }
 0x864   :  { %2655 = vmatpush.bf16.msra.mxu0 %v7948_v35 }
 0x868   :  { %2656 = vmatpush.bf16.msra.mxu0 %v7952_v26  ;;  %3229 = vmatmul.msk.bf16.vlgmr.msra.gmra.mxu3 %vm1364_vm10, %v6609_v3 }
 0x86a   :  { %3230 = vmatmul.msk.bf16.vlgmr.msrb.gmra.mxu2 %vm1364_vm10, %v6609_v3 }
 0x86c   :  { %2657 = vmatpush.bf16.msra.mxu0 %v2516_v23 }
 0x870   :  { %2658 = vmatpush.bf16.msra.mxu0 %v2512_v56 }
 0x873   :  { %2659 = vmatmul.bf16.vlgmr.msra.gmra.mxu0 %v3222_v58 }
 0x887   :  { %v6712_v16 = vpop.f32.mrf.mxu1 }
 0x888   :  { %7953 = vst [vmem:[#allocation58_spill] sm:$0xff] %v6712_v16  ;;  %v2221_v16 = vld [vmem:[%s7432_s3 + $0x78] sm:$0xff] }
 0x88e   :  { %v6714_v53 = vpop.f32.mrf.mxu3 }
 0x88f   :  { %7954 = vst [vmem:[#allocation8_spill] sm:$0xff] %v6714_v53  ;;  %v6716_v37 = vpop.f32.mrf.mxu1 }
 0x890   :  { %7955 = vst [vmem:[#allocation26_spill] sm:$0xff] %v6716_v37 }
 0x896   :  { %v6720_v21 = vpop.f32.mrf.mxu3 }
 0x897   :  { %7957 = vst [vmem:[#allocation15_spill] sm:$0xff] %v6720_v21 }
 0x8ac   :  { %v6722_v48 = vpop.f32.mrf.mxu0 }
 0x8ad   :  { %7958 = vst [vmem:[#allocation2_spill] sm:$0xff] %v6722_v48  ;;  %v2220_v48 = vld [vmem:[%s7432_s3 + $0x70] sm:$0xff] }
 0x8b4   :  { %v6730_v6 = vpop.f32.mrf.mxu0 }
 0x8b5   :  { %v6718_v29 = vpop.f32.mrf.mxu2  ;;  %7962 = vst [vmem:[#allocation11_spill] sm:$0xff] %v6730_v6 }
 0x8b6   :  { %7956 = vst [vmem:[#allocation10_spill] sm:$0xff] %v6718_v29 }
 0x8b8   :  { %v6724_v12 = vpop.f32.mrf.mxu1 }
 0x8b9   :  { %7959 = vst [vmem:[#allocation41_spill] sm:$0xff] %v6724_v12  ;;  %v2981_v12 = vld [vmem:[%s7432_s3 + $0x80] sm:$0xff] }
 0x8bd   :  { %v6726_v13 = vpop.f32.mrf.mxu2  ;;  %v6728_v3 = vpop.f32.mrf.mxu3 }
 0x8be   :  { %7960 = vst [vmem:[#allocation47_spill] sm:$0xff] %v6726_v13 }
 0x8bf   :  { %7961 = vst [vmem:[#allocation23_spill] sm:$0xff] %v6728_v3 }
 0x8c0   :  { %v6732_v5 = vpop.f32.mrf.mxu1 }
 0x8c1   :  { %7963 = vst [vmem:[#allocation48_spill] sm:$0xff] %v6732_v5 }
 0x8c5   :  { %v6734_v50 = vpop.f32.mrf.mxu2  ;;  %v6736_v60 = vpop.f32.mrf.mxu3 }
 0x8c6   :  { %7964 = vst [vmem:[#allocation38_spill] sm:$0xff] %v6734_v50  ;;  %v7971_v50 = vld [vmem:[#allocation39_spill] sm:$0xff] }
 0x8c7   :  { %7965 = vst [vmem:[#allocation42_spill] sm:$0xff] %v6736_v60 }
 0x8c8   :  { %v2590_v28 = vpop.f32.mrf.mxu1 }
 0x8cc   :  { %v6738_v25 = vpop.f32.mrf.mxu0 }
 0x8cd   :  { %7966 = vst [vmem:[#allocation4_spill] sm:$0xff] %v6738_v25  ;;  %v6742_v14 = vpop.f32.mrf.mxu2 }
 0x8ce   :  { %7967 = vst [vmem:[#allocation18_spill] sm:$0xff] %v6742_v14 }
 0x8d0   :  { %v2592_v59 = vpop.f32.mrf.mxu1 }
 0x8d4   :  { %v6745_v22 = vpop.f32.mrf.mxu0 }
 0x8d5   :  { %7968 = vst [vmem:[#allocation12_spill] sm:$0xff] %v6745_v22 }
 0x8db   :  { %v2576_v44 = vpop.f32.mrf.mxu3 }
 0x8dc   :  { %v2577_v34 = vadd.f32 %v2576_v44, %v6740_v4  ;;  %v2618_v24 = vpop.f32.mrf.mxu0 }
 0x8dd   :  { %v2604_v31 = vpop.f32.mrf.mxu2 }
 0x8de   :  { %v2591_v58 = vadd.f32 %v2590_v28, %v2577_v34  ;;  %v2605_v1 = vadd.f32 %v2604_v31, %v6740_v4  ;;  %v2632_v46 = vpop.f32.mrf.mxu1 }
 0x8df   :  { %v2633_v35 = vadd.f32 %v2632_v46, %v6740_v4 }
 0x8e0   :  { %v6747_v2 = vmax.f32 %v2591_v58, 0.0  ;;  %v2619_v49 = vadd.f32 %v2618_v24, %v2605_v1 }
 0x8e2   :  { %2687 = vrot.lane.b32.xlu0 %v6747_v2, %s3281_s28  ;;  %2719 = vrot.lane.b32.xlu1 %v6747_v2, %s3282_s29  ;;  %v6769_v9 = vmax.f32 %v2619_v49, 0.0 }
 0x8e3   :  { %2879 = vrot.lane.b32.xlu2 %v6747_v2, %s3277_s23  ;;  %v2578_v11 = vpop.f32.mrf.mxu3 }
 0x8e4   :  { %v2579_v62 = vadd.f32 %v2578_v11, %v6753_v27  ;;  %v2620_v28 = vpop.f32.mrf.mxu0 }
 0x8e5   :  { %v2606_v23 = vpop.f32.mrf.mxu2 }
 0x8e6   :  { %v2593_v36 = vadd.f32 %v2592_v59, %v2579_v62  ;;  %v2634_v39 = vpop.f32.mrf.mxu1  ;;  %v2607_v56 = vadd.f32 %v2606_v23, %v6753_v27 }
 0x8e7   :  { %v2635_v26 = vadd.f32 %v2634_v39, %v6753_v27 }
 0x8e8   :  { %v6759_v47 = vmax.f32 %v2593_v36, 0.0  ;;  %v2621_v44 = vadd.f32 %v2620_v28, %v2607_v56 }
 0x8ea   :  { %2881 = vrot.lane.b32.xlu0 %v6759_v47, %s3277_s23  ;;  %2689 = vrot.lane.b32.xlu1 %v6759_v47, %s3281_s28  ;;  %v6820_v34 = vmax.f32 %v2621_v44, 0.0 }
 0x8eb   :  { %2847 = vrot.lane.b32.xlu2 %v6747_v2, %s3276_s22  ;;  %v2646_v43 = vpop.f32.mrf.mxu3 }
 0x8ec   :  { %v2647_v45 = vadd.f32 %v2646_v43, %v2633_v35 }
 0x8ed   :  { %v2674_v59 = vpop.f32.mrf.mxu2 }
 0x8ee   :  { %v6802_v40 = vmax.f32 %v2647_v45, 0.0 }
 0x8f0   :  { %v2660_v58 = vpop.f32.mrf.mxu0 }
 0x8f1   :  { %v2661_v62 = vadd.f32 %v2660_v58, %v6740_v4 }
 0x8f2   :  { %2849 = vrot.lane.b32.xlu0 %v6759_v47, %s3276_s22  ;;  %2883 = vrot.lane.b32.xlu1 %v6769_v9, %s3277_s23 }
 0x8f3   :  { %2815 = vrot.lane.b32.xlu2 %v6747_v2, %s3278_s26  ;;  %v2648_v8 = vpop.f32.mrf.mxu3  ;;  %v2675_v31 = vadd.f32 %v2674_v59, %v2661_v62 }
 0x8f4   :  { %v2649_v38 = vadd.f32 %v2648_v8, %v2635_v26 }
 0x8f5   :  { %v6851_v1 = vmax.f32 %v2675_v31, 0.0  ;;  %v2676_v46 = vpop.f32.mrf.mxu2 }
 0x8f6   :  { %v6811_v32 = vmax.f32 %v2649_v38, 0.0 }
 0x8f8   :  { %v2662_v4 = vpop.f32.mrf.mxu0 }
 0x8f9   :  { %v2663_v49 = vadd.f32 %v2662_v4, %v6753_v27 }
 0x8fa   :  { %2817 = vrot.lane.b32.xlu0 %v6759_v47, %s3278_s26  ;;  %2851 = vrot.lane.b32.xlu1 %v6769_v9, %s3276_s22 }
 0x8fb   :  { %2783 = vrot.lane.b32.xlu2 %v6747_v2, %s3280_s27  ;;  %v2677_v43 = vadd.f32 %v2676_v46, %v2663_v49 }
 0x8fd   :  { %v6874_v8 = vmax.f32 %v2677_v43, 0.0 }
 0x902   :  { %2785 = vrot.lane.b32.xlu0 %v6759_v47, %s3280_s27  ;;  %2819 = vrot.lane.b32.xlu1 %v6769_v9, %s3278_s26 }
 0x903   :  { %2751 = vrot.lane.b32.xlu2 %v6747_v2, %s3279_s1 }
 0x90a   :  { %2753 = vrot.lane.b32.xlu0 %v6759_v47, %s3279_s1  ;;  %2787 = vrot.lane.b32.xlu1 %v6769_v9, %s3280_s27 }
 0x90b   :  { %2911 = vrot.lane.b32.xlu2 %v6747_v2, %s3275_s21 }
 0x912   :  { %2913 = vrot.lane.b32.xlu0 %v6759_v47, %s3275_s21  ;;  %2755 = vrot.lane.b32.xlu1 %v6769_v9, %s3279_s1 }
 0x913   :  { %2721 = vrot.lane.b32.xlu2 %v6759_v47, %s3282_s29 }
 0x91a   :  { %2887 = vrot.lane.b32.xlu0 %v6802_v40, %s3277_s23  ;;  %2915 = vrot.lane.b32.xlu1 %v6769_v9, %s3275_s21 }
 0x91b   :  { %2791 = vrot.lane.b32.xlu2 %v6802_v40, %s3280_s27 }
 0x922   :  { %2855 = vrot.lane.b32.xlu0 %v6802_v40, %s3276_s22  ;;  %2889 = vrot.lane.b32.xlu1 %v6811_v32, %s3277_s23 }
 0x923   :  { %2691 = vrot.lane.b32.xlu2 %v6769_v9, %s3281_s28 }
 0x92a   :  { %2823 = vrot.lane.b32.xlu0 %v6802_v40, %s3278_s26  ;;  %2857 = vrot.lane.b32.xlu1 %v6811_v32, %s3276_s22 }
 0x92b   :  { %2885 = vrot.lane.b32.xlu2 %v6820_v34, %s3277_s23 }
 0x932   :  { %2919 = vrot.lane.b32.xlu0 %v6802_v40, %s3275_s21  ;;  %2825 = vrot.lane.b32.xlu1 %v6811_v32, %s3278_s26 }
 0x933   :  { %2853 = vrot.lane.b32.xlu2 %v6820_v34, %s3276_s22 }
 0x93a   :  { %2723 = vrot.lane.b32.xlu0 %v6769_v9, %s3282_s29  ;;  %2921 = vrot.lane.b32.xlu1 %v6811_v32, %s3275_s21 }
 0x93b   :  { %2821 = vrot.lane.b32.xlu2 %v6820_v34, %s3278_s26 }
 0x93d   :  { %v6840_v11 = vpop.permute.xlu2 %2879 }
 0x942   :  { %2693 = vrot.lane.b32.xlu0 %v6820_v34, %s3281_s28  ;;  %2725 = vrot.lane.b32.xlu1 %v6820_v34, %s3282_s29 }
 0x943   :  { %2789 = vrot.lane.b32.xlu2 %v6820_v34, %s3280_s27 }
 0x945   :  { %v6849_v36 = vpop.permute.xlu2 %2847 }
 0x94a   :  { %2795 = vrot.lane.b32.xlu0 %v6851_v1, %s3280_s27  ;;  %2859 = vrot.lane.b32.xlu1 %v6851_v1, %s3276_s22 }
 0x94b   :  { %2757 = vrot.lane.b32.xlu2 %v6820_v34, %s3279_s1 }
 0x94d   :  { %v6859_v24 = vpop.permute.xlu2 %2815 }
 0x952   :  { %2763 = vrot.lane.b32.xlu0 %v6851_v1, %s3279_s1  ;;  %2699 = vrot.lane.b32.xlu1 %v6851_v1, %s3281_s28 }
 0x953   :  { %2917 = vrot.lane.b32.xlu2 %v6820_v34, %s3275_s21 }
 0x954   :  { %v6868_v35 = vpop.permute.xlu0 %2687  ;;  %v6870_v45 = vpop.permute.xlu1 %2719 }
 0x955   :  { %v6872_v39 = vpop.permute.xlu2 %2783 }
 0x95a   :  { %2827 = vrot.lane.b32.xlu0 %v6851_v1, %s3278_s26  ;;  %2797 = vrot.lane.b32.xlu1 %v6874_v8, %s3280_s27 }
 0x95b   :  { %2891 = vrot.lane.b32.xlu2 %v6851_v1, %s3277_s23 }
 0x95c   :  { %v6882_v27 = vpop.permute.xlu0 %2881  ;;  %v6884_v26 = vpop.permute.xlu1 %2689 }
 0x95d   :  { %v6886_v38 = vpop.permute.xlu2 %2751 }
 0x962   :  { %2893 = vrot.lane.b32.xlu0 %v6874_v8, %s3277_s23  ;;  %2765 = vrot.lane.b32.xlu1 %v6874_v8, %s3279_s1 }
 0x963   :  { %2731 = vrot.lane.b32.xlu2 %v6851_v1, %s3282_s29 }
 0x964   :  { %v6894_v23 = vpop.permute.xlu0 %2849  ;;  %v2884_v56 = vpop.permute.xlu1 %2883 }
 0x965   :  { %v6896_v28 = vpop.permute.xlu2 %2911  ;;  %v2899_v14 = vsel %vm199_vm3, %v6840_v11, %v2884_v56 }
 0x966   :  { %v2903_v5 = vmul.f32 %v2899_v14, %v7971_v50 }
 0x96a   :  { %2733 = vrot.lane.b32.xlu0 %v6874_v8, %s3282_s29  ;;  %2829 = vrot.lane.b32.xlu1 %v6874_v8, %s3278_s26 }
 0x96b   :  { %2861 = vrot.lane.b32.xlu2 %v6874_v8, %s3276_s22 }
 0x96c   :  { %v6904_v44 = vpop.permute.xlu0 %2817  ;;  %v6906_v58 = vpop.permute.xlu1 %2851 }
 0x96d   :  { %v6908_v62 = vpop.permute.xlu2 %2721 }
 0x972   :  { %2793 = vrot.lane.b32.xlu0 %v6811_v32, %s3280_s27  ;;  %2759 = vrot.lane.b32.xlu1 %v6802_v40, %s3279_s1 }
 0x973   :  { %2701 = vrot.lane.b32.xlu2 %v6874_v8, %s3281_s28 }
 0x974   :  { %v6916_v59 = vpop.permute.xlu0 %2785  ;;  %v6918_v31 = vpop.permute.xlu1 %2819 }
 0x975   :  { %v6920_v4 = vpop.permute.xlu2 %2791 }
 0x97a   :  { %2727 = vrot.lane.b32.xlu0 %v6802_v40, %s3282_s29  ;;  %2729 = vrot.lane.b32.xlu1 %v6811_v32, %s3282_s29 }
 0x97b   :  { %2761 = vrot.lane.b32.xlu2 %v6811_v32, %s3279_s1 }
 0x97c   :  { %v6928_v49 = vpop.permute.xlu0 %2753  ;;  %v6930_v46 = vpop.permute.xlu1 %2787 }
 0x97d   :  { %v6936_v43 = vsel %vm115_vm6, %v6930_v46, %v6920_v4  ;;  %v6938_v20 = vpop.permute.xlu2 %2691 }
 0x97e   :  { %7969 = vst [vmem:[#allocation54_spill] sm:$0xff] %v6938_v20 }
 0x982   :  { %2925 = vrot.lane.b32.xlu0 %v6874_v8, %s3275_s21  ;;  %2695 = vrot.lane.b32.xlu1 %v6802_v40, %s3281_s28 }
 0x983   :  { %2923 = vrot.lane.b32.xlu2 %v6851_v1, %s3275_s21 }
 0x984   :  { %v6949_v60 = vpop.permute.xlu0 %2913  ;;  %v6951_v6 = vpop.permute.xlu1 %2755 }
 0x985   :  { %7970 = vst [vmem:[#allocation53_spill] sm:$0xff] %v6949_v60  ;;  %v2886_v37 = vpop.permute.xlu2 %2885 }
 0x986   :  { %v2900_v22 = vsel %vm199_vm3, %v6882_v27, %v2886_v37 }
 0x987   :  { %v2907_v3 = vmul.f32 %v2900_v22, %v7971_v50  ;;  %v2867_v50 = vsel %vm171_vm2, %v6849_v36, %v6906_v58 }
 0x989   :  { %v2971_v13 = vpack.c.bf16 %v2907_v3, %v2903_v5  ;;  %v7972_v3 = vld [vmem:[#allocation57_spill] sm:$0xff]  ;;  %v723_v5 = vld [vmem:[%s7432_s3 + $0x60] sm:$0xff] }
 0x98a   :  { %2224 = vperm.xlu0 %3273, %v2220_v48   ;;  %2229 = vperm.xlu1 %3274, %v2221_v16   ;;  %v2871_v48 = vmul.f32 %v2867_v50, %v7972_v3 }
 0x98b   :  { %2697 = vrot.lane.b32.xlu2 %v6811_v32, %s3281_s28  ;;  %3005 = vmatpush.bf16.msrb.mxu3 %v2971_v13  ;;  %v2982_v13 = vld [vmem:[%s7432_s3 + $0x88] sm:$0xff] }
 0x98c   :  { %v6970_v14 = vpop.permute.xlu0 %2887  ;;  %v2916_v22 = vpop.permute.xlu1 %2915 }
 0x98d   :  { %v2854_v21 = vpop.permute.xlu2 %2853  ;;  %v2897_v50 = vsel %vm199_vm3, %v2884_v56, %v6970_v14 }
 0x98e   :  { %v2868_v25 = vsel %vm171_vm2, %v6894_v23, %v2854_v21 }
 0x98f   :  { %v2875_v16 = vmul.f32 %v2868_v25, %v7972_v3  ;;  %v2835_v25 = vsel %vm143_vm4, %v6859_v24, %v6918_v31 }
 0x991   :  { %v2967_v29 = vpack.c.bf16 %v2875_v16, %v2871_v48 }
 0x992   :  { %2990 = vperm.xlu0 %3273, %v2982_v13   ;;  %727 = vperm.xlu1 %3274, %v723_v5   ;;  %v2904_v13 = vmul.f32 %v2897_v50, %v6410_v54 }
 0x993   :  { %2985 = vperm.xlu2 %3272, %v2981_v12   ;;  %3006 = vmatpush.bf16.msrb.mxu3 %v2967_v29  ;;  %v7973_v12 = vld [vmem:[#allocation64_spill] sm:$0xff] }
 0x994   :  { %v6993_v3 = vpop.permute.xlu0 %2855  ;;  %v6995_v53 = vpop.permute.xlu1 %2889  ;;  %v2839_v5 = vmul.f32 %v2835_v25, %v7973_v12 }
 0x995   :  { %v2898_v48 = vsel %vm199_vm3, %v2886_v37, %v6995_v53  ;;  %v2822_v16 = vpop.permute.xlu2 %2821 }
 0x996   :  { %v2908_v56 = vmul.f32 %v2898_v48, %v6410_v54  ;;  %v2836_v29 = vsel %vm143_vm4, %v6904_v44, %v2822_v16  ;;  %v2865_v54 = vsel %vm171_vm2, %v6906_v58, %v6993_v3 }
 0x997   :  { %v2843_v19 = vmul.f32 %v2836_v29, %v7973_v12  ;;  %v2803_v12 = vsel %vm115_vm6, %v6872_v39, %v6930_v46 }
 0x998   :  { %v2972_v51 = vpack.c.bf16 %v2908_v56, %v2904_v13  ;;  %v7974_v13 = vpack.c.bf16 %v6759_v47, %v6747_v2 }
 0x999   :  { %v2963_v42 = vpack.c.bf16 %v2843_v19, %v2839_v5  ;;  %v2872_v19 = vmul.f32 %v2865_v54, %v6476_v15 }
 0x99a   :  { %3033 = vmatpush.bf16.msra.mxu2 %v2972_v51 }
 0x99b   :  { %732 = vperm.xlu2 %3272, %v724_v33   ;;  %3007 = vmatpush.bf16.msrb.mxu3 %v2963_v42 }
 0x99c   :  { %v7014_v37 = vpop.permute.xlu0 %2823  ;;  %v7016_v50 = vpop.permute.xlu1 %2857 }
 0x99d   :  { %v2866_v25 = vsel %vm171_vm2, %v2854_v21, %v7016_v50  ;;  %v7021_v48 = vpop.permute.xlu2 %2789  ;;  %v2833_v42 = vsel %vm143_vm4, %v6918_v31, %v7014_v37 }
 0x99e   :  { %v2876_v51 = vmul.f32 %v2866_v25, %v6476_v15  ;;  %v2840_v2 = vmul.f32 %v2833_v42, %v6496_v61  ;;  %v2804_v31 = vsel %vm115_vm6, %v6916_v59, %v7021_v48 }
 0x99f   :  { %3008 = vmatpush.bf16.msrb.mxu3 %v7974_v13  ;;  %v2812_v5 = vmul.f32 %v2804_v31, %v6544_v0  ;;  %v2808_v13 = vmul.f32 %v2803_v12, %v6544_v0  ;;  %v3261_v31 = vld [vmem:[%s7433_s2 + $0x84] sm:$0xf]  ;;  %v3235_v12 = vld [vmem:[%s7433_s2 + $0x88] sm:$0xf0] }
 0x9a0   :  { %v2968_v33 = vpack.c.bf16 %v2876_v51, %v2872_v19  ;;  %v2960_v19 = vpack.c.bf16 %v6820_v34, %v6769_v9  ;;  %v7975_v34 = vld [vmem:[#allocation50_spill] sm:$0xff] }
 0x9a2   :  { %3034 = vmatpush.bf16.msra.mxu2 %v2968_v33 }
 0x9a4   :  { %v7032_v58 = vpop.permute.xlu0 %2919  ;;  %v7034_v21 = vpop.permute.xlu1 %2825 }
 0x9a5   :  { %v2834_v56 = vsel %vm143_vm4, %v2822_v16, %v7034_v21  ;;  %v7039_v15 = vpop.permute.xlu2 %2757  ;;  %v2931_v16 = vsel %vm227_vm0, %v6896_v28, %v2916_v22 }
 0x9a6   :  { %v2844_v47 = vmul.f32 %v2834_v56, %v6496_v61  ;;  %v2929_v61 = vsel %vm227_vm0, %v2916_v22, %v7032_v58  ;;  %v2772_v46 = vsel %vm87_vm5, %v6928_v49, %v7039_v15  ;;  %v2771_v22 = vsel %vm87_vm5, %v6886_v38, %v6951_v6 }
 0x9a7   :  { %v2935_v42 = vmul.f32 %v2931_v16, %v7975_v34  ;;  %v2936_v56 = vmul.f32 %v2929_v61, %v6568_v17  ;;  %v2776_v16 = vmul.f32 %v2771_v22, %v6565_v18 }
 0x9a8   :  { %v2964_v29 = vpack.c.bf16 %v2844_v47, %v2840_v2  ;;  %v2780_v47 = vmul.f32 %v2772_v46, %v6565_v18 }
 0x9aa   :  { %3035 = vmatpush.bf16.msra.mxu2 %v2964_v29  ;;  %v2956_v29 = vpack.c.bf16 %v2812_v5, %v2808_v13  ;;  %v7095_v5 = vor.u32 %v3261_v31, %v3235_v12  ;;  %v2952_v13 = vpack.c.bf16 %v2780_v47, %v2776_v16  ;;  %v3262_v31 = vld [vmem:[%s7433_s2 + $0x84] sm:$0xf0] }
 0x9ac   :  { %v7058_v54 = vpop.permute.xlu0 %2723  ;;  %v7060_v25 = vpop.permute.xlu1 %2921  ;;  %7976 = vst [vmem:[#allocation60_spill] sm:$0xff] %v7095_v5 }
 0x9ad   :  { %v2918_v51 = vpop.permute.xlu2 %2917 }
 0x9ae   :  { %v2930_v33 = vsel %vm227_vm0, %v2918_v51, %v7060_v25  ;;  %v2932_v9 = vsel %vm227_vm0, %v6949_v60, %v2918_v51  ;;  %3036 = vmatpush.bf16.msra.mxu2 %v2960_v19 }
 0x9af   :  { %v2939_v0 = vmul.f32 %v2932_v9, %v7975_v34  ;;  %v2940_v2 = vmul.f32 %v2930_v33, %v6568_v17  ;;  %v2739_v17 = vsel %vm59_vm8, %v6870_v45, %v7058_v54  ;;  %v7977_v9 = vld [vmem:[#allocation56_spill] sm:$0xff] }
 0x9b0   :  { %v2744_v34 = vmul.f32 %v2739_v17, %v7977_v9 }
 0x9b1   :  { %v2975_v19 = vpack.c.bf16 %v2939_v0, %v2935_v42  ;;  %v2976_v51 = vpack.c.bf16 %v2940_v2, %v2936_v56  ;;  %v2707_v56 = vsel %vm32_vm7, %v6868_v35, %v6938_v20 }
 0x9b2   :  { %3037 = vmatpush.bf16.msra.mxu2 %v2956_v29  ;;  %v2712_v47 = vmul.f32 %v2707_v56, %v6617_v52  ;;  %v3233_v29 = vld [vmem:[%s7433_s2 + $0x80] sm:$0xf] }
 0x9b3   :  { %3026 = vmatpush.bf16.msra.mxu1 %v2975_v19  ;;  %3054 = vmatpush.bf16.msrb.mxu0 %v2976_v51  ;;  %v7131_v17 = vor.u32 %v3262_v31, %v3233_v29 }
 0x9b4   :  { %v7097_v61 = vpop.permute.xlu0 %2693  ;;  %v7099_v46 = vpop.permute.xlu1 %2725 }
 0x9b5   :  { %v2708_v18 = vsel %vm32_vm7, %v6884_v26, %v7097_v61  ;;  %v2740_v22 = vsel %vm59_vm8, %v6908_v62, %v7099_v46  ;;  %v2892_v33 = vpop.permute.xlu2 %2891 }
 0x9b6   :  { %v2748_v42 = vmul.f32 %v2740_v22, %v7977_v9  ;;  %3038 = vmatpush.bf16.msra.mxu2 %v2952_v13  ;;  %3240 = vmatmul.msk.bf16.vlgmr.msrb.gmra.mxu0 %vm1364_vm10, %v7095_v5  ;;  %v2716_v0 = vmul.f32 %v2708_v18, %v6617_v52  ;;  %v2895_v31 = vsel %vm199_vm3, %v6970_v14, %v2892_v33 }
 0x9b7   :  { %3239 = vmatmul.msk.bf16.vlgmr.msra.gmra.mxu1 %vm1364_vm10, %v7095_v5 }
 0x9b8   :  { %v2948_v2 = vpack.c.bf16 %v2748_v42, %v2744_v34  ;;  %v2944_v51 = vpack.c.bf16 %v2716_v0, %v2712_v47  ;;  %v7978_v0 = vld [vmem:[#allocation70_spill] sm:$0xff] }
 0x9ba   :  { %3039 = vmatpush.bf16.msra.mxu2 %v2948_v2 }
 0x9bc   :  { %v7127_v12 = vpop.permute.xlu0 %2795  ;;  %v2860_v19 = vpop.permute.xlu1 %2859 }
 0x9bd   :  { %v7129_v16 = vpop.permute.xlu2 %2731  ;;  %v2805_v22 = vsel %vm115_vm6, %v7127_v12, %v6872_v39  ;;  %v2901_v39 = vsel %vm199_vm3, %v2892_v33, %v6840_v11 }
 0x9be   :  { %3040 = vmatpush.bf16.msra.mxu2 %v2944_v51  ;;  %v2807_v2 = vmul.f32 %v2805_v22, %v7978_v0  ;;  %v2905_v51 = vmul.f32 %v2895_v31, %v6479_v41  ;;  %v7979_v22 = vld [vmem:[#allocation63_spill] sm:$0xff] }
 0x9bf   :  { %v2906_v5 = vmul.f32 %v2901_v39, %v7979_v22  ;;  %v7981_v39 = vld [vmem:[#allocation20_spill] sm:$0xff] }
 0x9c1   :  { %3041 = vmatmul.bf16.vlgmr.msra.gmra.mxu2 %v7131_v17 }
 0x9c4   :  { %v7134_v52 = vpop.permute.xlu0 %2763  ;;  %v7136_v13 = vpop.permute.xlu1 %2699 }
 0x9c5   :  { %v2862_v18 = vpop.permute.xlu2 %2861 }
 0x9c6   :  { %v2870_v11 = vsel %vm171_vm2, %v2862_v18, %v6894_v23 }
 0x9cc   :  { %v2828_v9 = vpop.permute.xlu0 %2827  ;;  %v7142_v34 = vpop.permute.xlu1 %2797 }
 0x9cd   :  { %v2806_v42 = vsel %vm115_vm6, %v7142_v34, %v6916_v59  ;;  %v7148_v56 = vpop.permute.xlu2 %2701  ;;  %v2773_v59 = vsel %vm87_vm5, %v7134_v52, %v6886_v38 }
 0x9ce   :  { %v2811_v47 = vmul.f32 %v2806_v42, %v7978_v0  ;;  %v2864_v42 = vsel %vm171_vm2, %v7016_v50, %v2862_v18 }
 0x9d0   :  { %v2955_v29 = vpack.c.bf16 %v2811_v47, %v2807_v2  ;;  %v7980_v47 = vld [vmem:[#allocation78_spill] sm:$0xff] }
 0x9d2   :  { %3009 = vmatpush.bf16.msrb.mxu3 %v2955_v29  ;;  %v2775_v29 = vmul.f32 %v2773_v59, %v7980_v47 }
 0x9d4   :  { %v2894_v0 = vpop.permute.xlu0 %2893  ;;  %v7167_v14 = vpop.permute.xlu1 %2765 }
 0x9d5   :  { %v2896_v33 = vsel %vm199_vm3, %v6995_v53, %v2894_v0  ;;  %v2902_v38 = vsel %vm199_vm3, %v2894_v0, %v6882_v27  ;;  %v2774_v50 = vsel %vm87_vm5, %v7167_v14, %v6928_v49  ;;  %v7182_v2 = vpop.permute.xlu2 %2761  ;;  %v2863_v53 = vsel %vm171_vm2, %v6993_v3, %v2860_v19 }
 0x9d6   :  { %v2909_v31 = vmul.f32 %v2896_v33, %v6479_v41  ;;  %v2910_v23 = vmul.f32 %v2902_v38, %v7979_v22  ;;  %v2779_v18 = vmul.f32 %v2774_v50, %v7980_v47  ;;  %v2869_v27 = vsel %vm171_vm2, %v2860_v19, %v6849_v36  ;;  %v7982_v19 = vld [vmem:[#allocation69_spill] sm:$0xff] }
 0x9d7   :  { %v2877_v49 = vmul.f32 %v2864_v42, %v6501_v55  ;;  %v2878_v0 = vmul.f32 %v2870_v11, %v7981_v39  ;;  %v2741_v41 = vsel %vm59_vm8, %v7129_v16, %v6870_v45  ;;  %v2831_v3 = vsel %vm143_vm4, %v7014_v37, %v2828_v9  ;;  %v7983_v42 = vld [vmem:[#allocation13_spill] sm:$0xff] }
 0x9d8   :  { %v2973_v20 = vpack.c.bf16 %v2909_v31, %v2905_v51  ;;  %v2974_v59 = vpack.c.bf16 %v2910_v23, %v2906_v5  ;;  %v2951_v60 = vpack.c.bf16 %v2779_v18, %v2775_v29  ;;  %v2873_v22 = vmul.f32 %v2863_v53, %v6501_v55 }
 0x9d9   :  { %v2874_v36 = vmul.f32 %v2869_v27, %v7981_v39  ;;  %v2837_v5 = vsel %vm143_vm4, %v2828_v9, %v6859_v24  ;;  %v2743_v51 = vmul.f32 %v2741_v41, %v7982_v19  ;;  %v2841_v11 = vmul.f32 %v2831_v3, %v7983_v42  ;;  %v7984_v9 = vld [vmem:[#allocation25_spill] sm:$0xff] }
 0x9da   :  { %3010 = vmatpush.bf16.msrb.mxu3 %v2951_v60  ;;  %3061 = vmatpush.bf16.msrb.mxu1 %v2973_v20  ;;  %v2969_v38 = vpack.c.bf16 %v2877_v49, %v2873_v22  ;;  %v2710_v55 = vsel %vm32_vm7, %v7148_v56, %v6884_v26  ;;  %v2842_v47 = vmul.f32 %v2837_v5, %v7984_v9 }
 0x9db   :  { %3089 = vmatpush.bf16.msra.mxu0 %v2974_v59  ;;  %v2970_v50 = vpack.c.bf16 %v2878_v0, %v2874_v36  ;;  %v2799_v49 = vsel %vm115_vm6, %v6920_v4, %v7127_v12  ;;  %v2962_v41 = vpack.c.bf16 %v6874_v8, %v6851_v1  ;;  %v7986_v1 = vld [vmem:[#allocation84_spill] sm:$0xff] }
 0x9dc   :  { %v2734_v45 = vpop.permute.xlu0 %2733  ;;  %v2830_v33 = vpop.permute.xlu1 %2829  ;;  %v2810_v8 = vmul.f32 %v2799_v49, %v7986_v1 }
 0x9dd   :  { %v2742_v60 = vsel %vm59_vm8, %v2734_v45, %v6908_v62  ;;  %v2832_v20 = vsel %vm143_vm4, %v7034_v21, %v2830_v33  ;;  %v2838_v24 = vsel %vm143_vm4, %v2830_v33, %v6904_v44  ;;  %v7223_v37 = vpop.permute.xlu2 %2923  ;;  %v2709_v62 = vsel %vm32_vm7, %v7136_v13, %v6868_v35  ;;  %v7985_v21 = vld [vmem:[#allocation77_spill] sm:$0xff] }
 0x9de   :  { %v2747_v29 = vmul.f32 %v2742_v60, %v7982_v19  ;;  %v2845_v26 = vmul.f32 %v2832_v20, %v7983_v42  ;;  %v2846_v31 = vmul.f32 %v2838_v24, %v7984_v9  ;;  %3062 = vmatpush.bf16.msrb.mxu1 %v2969_v38  ;;  %v2715_v23 = vmul.f32 %v2710_v55, %v7985_v21 }
 0x9df   :  { %3090 = vmatpush.bf16.msra.mxu0 %v2970_v50  ;;  %v2711_v27 = vmul.f32 %v2709_v62, %v7985_v21  ;;  %v2961_v35 = vpack.c.bf16 %v6811_v32, %v6802_v40  ;;  %v2809_v32 = vmul.f32 %v6936_v43, %v6585_v10  ;;  %v7991_v21 = vld [vmem:[#allocation21_spill] sm:$0xff] }
 0x9e0   :  { %v2947_v44 = vpack.c.bf16 %v2747_v29, %v2743_v51  ;;  %v2965_v18 = vpack.c.bf16 %v2845_v26, %v2841_v11  ;;  %v2966_v53 = vpack.c.bf16 %v2846_v31, %v2842_v47  ;;  %v7988_v47 = vld [vmem:[#allocation52_spill] sm:$0xff]  ;;  %v7989_v26 = vld [vmem:[#allocation9_spill] sm:$0xff] }
 0x9e1   :  { %v2943_v59 = vpack.c.bf16 %v2715_v23, %v2711_v27 }
 0x9e2   :  { %3011 = vmatpush.bf16.msrb.mxu3 %v2947_v44  ;;  %3063 = vmatpush.bf16.msrb.mxu1 %v2965_v18 }
 0x9e3   :  { %3091 = vmatpush.bf16.msra.mxu0 %v2966_v53  ;;  %v7993_v53 = vld [vmem:[#allocation54_spill] sm:$0xff] }
 0x9e4   :  { %v2794_v39 = vpop.permute.xlu0 %2793  ;;  %v2760_v0 = vpop.permute.xlu1 %2759 }
 0x9e5   :  { %v2800_v3 = vsel %vm115_vm6, %v2794_v39, %v7142_v34  ;;  %v2802_v22 = vsel %vm115_vm6, %v7021_v48, %v2794_v39  ;;  %v2767_v4 = vsel %vm87_vm5, %v2760_v0, %v7134_v52  ;;  %v2769_v12 = vsel %vm87_vm5, %v6951_v6, %v2760_v0  ;;  %v2698_v40 = vpop.permute.xlu2 %2697  ;;  %v7987_v52 = vld [vmem:[#allocation27_spill] sm:$0xff] }
 0x9e6   :  { %v2813_v34 = vmul.f32 %v2802_v22, %v6585_v10  ;;  %v2814_v36 = vmul.f32 %v2800_v3, %v7986_v1  ;;  %3012 = vmatpush.bf16.msrb.mxu3 %v2943_v59  ;;  %v2768_v48 = vsel %vm87_vm5, %v7182_v2, %v7167_v14  ;;  %v2770_v6 = vsel %vm87_vm5, %v7039_v15, %v7182_v2  ;;  %v7995_v3 = vld [vmem:[#allocation33_spill] sm:$0xff] }
 0x9e7   :  { %3064 = vmatpush.bf16.msrb.mxu1 %v2961_v35  ;;  %3092 = vmatpush.bf16.msra.mxu0 %v2962_v41  ;;  %v2777_v43 = vmul.f32 %v2769_v12, %v6614_v30  ;;  %v2778_v5 = vmul.f32 %v2767_v4, %v7987_v52  ;;  %v2781_v51 = vmul.f32 %v2770_v6, %v6614_v30  ;;  %v7994_v35 = vld [vmem:[#allocation31_spill] sm:$0xff] }
 0x9e8   :  { %v2957_v10 = vpack.c.bf16 %v2813_v34, %v2809_v32  ;;  %v2958_v19 = vpack.c.bf16 %v2814_v36, %v2810_v8  ;;  %v2782_v42 = vmul.f32 %v2768_v48, %v7987_v52  ;;  %v7996_v4 = vld [vmem:[#allocation35_spill] sm:$0xff]  ;;  %v7998_v48 = vld [vmem:[#allocation8_spill] sm:$0xff] }
 0x9e9   :  { %3013 = vmatmul.bf16.vlgmr.msrb.gmra.mxu3 %v7131_v17  ;;  %v2953_v33 = vpack.c.bf16 %v2781_v51, %v2777_v43  ;;  %v7999_v43 = vld [vmem:[#allocation10_spill] sm:$0xff] }
 0x9ea   :  { %v2954_v15 = vpack.c.bf16 %v2782_v42, %v2778_v5  ;;  %v8000_v5 = vld [vmem:[#allocation41_spill] sm:$0xff]  ;;  %v8002_v42 = vld [vmem:[#allocation15_spill] sm:$0xff] }
 0x9eb   :  { %3065 = vmatpush.bf16.msrb.mxu1 %v2957_v10  ;;  %3093 = vmatpush.bf16.msra.mxu0 %v2958_v19  ;;  %v8001_v19 = vld [vmem:[#allocation4_spill] sm:$0xff] }
 0x9ec   :  { %v2728_v14 = vpop.permute.xlu0 %2727  ;;  %v2730_v11 = vpop.permute.xlu1 %2729 }
 0x9ed   :  { %v2735_v2 = vsel %vm59_vm8, %v2728_v14, %v7129_v16  ;;  %v2737_v38 = vsel %vm59_vm8, %v7058_v54, %v2728_v14  ;;  %v2736_v50 = vsel %vm59_vm8, %v2730_v11, %v2734_v45  ;;  %v2738_v30 = vsel %vm59_vm8, %v7099_v46, %v2730_v11  ;;  %v7284_v55 = vpop.permute.xlu2 %2985  ;;  %v8003_v11 = vld [vmem:[#allocation47_spill] sm:$0xff] }
 0x9ee   :  { %v2745_v60 = vmul.f32 %v2737_v38, %v6623_v63  ;;  %v2746_v20 = vmul.f32 %v2735_v2, %v6687_v57  ;;  %v2749_v24 = vmul.f32 %v2738_v30, %v6623_v63  ;;  %v2750_v16 = vmul.f32 %v2736_v50, %v6687_v57  ;;  %v8005_v2 = vld [vmem:[#allocation58_spill] sm:$0xff] }
 0x9ef   :  { %3066 = vmatpush.bf16.msrb.mxu1 %v2953_v33  ;;  %3094 = vmatpush.bf16.msra.mxu0 %v2954_v15  ;;  %v2927_v45 = vsel %vm227_vm0, %v7032_v58, %v7223_v37  ;;  %v2933_v46 = vsel %vm227_vm0, %v7223_v37, %v6896_v28  ;;  %v2704_v63 = vsel %vm32_vm7, %v2698_v40, %v7148_v56  ;;  %v7990_v58 = vld [vmem:[#allocation51_spill] sm:$0xff]  ;;  %v7992_v37 = vld [vmem:[#allocation53_spill] sm:$0xff]  ;;  %v8004_v15 = vld [vmem:[#allocation60_spill] sm:$0xff] }
 0x9f0   :  { %v2949_v54 = vpack.c.bf16 %v2749_v24, %v2745_v60  ;;  %v2950_v9 = vpack.c.bf16 %v2750_v16, %v2746_v20  ;;  %v2706_v57 = vsel %vm32_vm7, %v7097_v61, %v2698_v40  ;;  %v2937_v29 = vmul.f32 %v2927_v45, %v7988_v47  ;;  %v8006_v50 = vld [vmem:[#allocation2_spill] sm:$0xff]  ;;  %v8007_v60 = vld [vmem:[#allocation23_spill] sm:$0xff]  ;;  %v8008_v24 = vld [vmem:[#allocation48_spill] sm:$0xff] }
 0x9f1   :  { %v2938_v31 = vmul.f32 %v2933_v46, %v7989_v26  ;;  %v2717_v62 = vmul.f32 %v2706_v57, %v7990_v58  ;;  %v2718_v23 = vmul.f32 %v2704_v63, %v7991_v21  ;;  %v8010_v45 = vld [vmem:[#allocation12_spill] sm:$0xff]  ;;  %v8011_v63 = vld [vmem:[#allocation26_spill] sm:$0xff] }
 0x9f3   :  { %3067 = vmatpush.bf16.msrb.mxu1 %v2949_v54  ;;  %3095 = vmatpush.bf16.msra.mxu0 %v2950_v9  ;;  %v8009_v54 = vld [vmem:[#allocation38_spill] sm:$0xff] }
 0x9f4   :  { %v2926_v44 = vpop.permute.xlu0 %2925  ;;  %v2696_v28 = vpop.permute.xlu1 %2695 }
 0x9f5   :  { %v2928_v56 = vsel %vm227_vm0, %v7060_v25, %v2926_v44  ;;  %v2934_v61 = vsel %vm227_vm0, %v2926_v44, %v7992_v37  ;;  %v2703_v18 = vsel %vm32_vm7, %v2696_v28, %v7136_v13  ;;  %v2705_v27 = vsel %vm32_vm7, %v7993_v53, %v2696_v28  ;;  %v733_v49 = vpop.permute.xlu2 %732  ;;  %v7997_v13 = vld [vmem:[#allocation37_spill] sm:$0xff]  ;;  %v8016_v44 = vld [vmem:[#allocation32_spill] sm:$0xff] }
 0x9f6   :  { %v2941_v39 = vmul.f32 %v2928_v56, %v7988_v47  ;;  %v2942_v0 = vmul.f32 %v2934_v61, %v7989_v26  ;;  %v2713_v59 = vmul.f32 %v2705_v27, %v7990_v58  ;;  %v2714_v25 = vmul.f32 %v2703_v18, %v7991_v21  ;;  %v8012_v47 = vld [vmem:[#allocation11_spill] sm:$0xff]  ;;  %v8015_v21 = vld [vmem:[#allocation30_spill] sm:$0xff]  ;;  %v8018_v61 = vld [vmem:[#allocation36_spill] sm:$0xff] }
 0x9f7   :  { %v767_v41 = vadd.f32 %v7994_v35, %v733_v49  ;;  %v781_v22 = vadd.f32 %v7995_v3, %v733_v49  ;;  %v795_v12 = vadd.f32 %v7996_v4, %v733_v49  ;;  %v809_v40 = vadd.f32 %v7997_v13, %v733_v49  ;;  %v8017_v56 = vld [vmem:[#allocation34_spill] sm:$0xff] }
 0x9f8   :  { %v2977_v32 = vpack.c.bf16 %v2941_v39, %v2937_v29  ;;  %v2978_v7 = vpack.c.bf16 %v2942_v0, %v2938_v31  ;;  %v2945_v1 = vpack.c.bf16 %v2717_v62, %v2713_v59  ;;  %v2946_v8 = vpack.c.bf16 %v2718_v23, %v2714_v25  ;;  %v8014_v31 = vld [vmem:[#allocation18_spill] sm:$0xff] }
 0x9f9   :  { %815 = vst [vmem:[%s7434_s4 + $0x20] sm:$0xff] %v767_v41 }
 0x9fa   :  { %816 = vst [vmem:[%s7434_s4 + $0x28] sm:$0xff] %v781_v22  ;;  %3068 = vmatpush.bf16.msrb.mxu1 %v2945_v1  ;;  %3082 = vmatpush.bf16.msra.mxu3 %v2977_v32 }
 0x9fb   :  { %817 = vst [vmem:[%s7434_s4 + $0x30] sm:$0xff] %v795_v12  ;;  %3096 = vmatpush.bf16.msra.mxu0 %v2946_v8  ;;  %3110 = vmatpush.bf16.msrb.mxu2 %v2978_v7 }
 0x9fc   :  { %818 = vst [vmem:[%s7434_s4 + $0x38] sm:$0xff] %v809_v40  ;;  %v2225_v34 = vpop.permute.xlu0 %2224  ;;  %v2230_v36 = vpop.permute.xlu1 %2229 }
 0x9fd   :  { %v2254_v6 = vadd.f32 %v7998_v48, %v2225_v34  ;;  %v2282_v52 = vadd.f32 %v7999_v43, %v2225_v34  ;;  %v2310_v10 = vadd.f32 %v8000_v5, %v2225_v34  ;;  %v2338_v51 = vadd.f32 %v8001_v19, %v2225_v34  ;;  %3069 = vmatmul.bf16.vlgmr.msrb.gmra.mxu1 %v7131_v17 }
 0x9fe   :  { %v2256_v14 = vadd.f32 %v8002_v42, %v2230_v36  ;;  %v2284_v33 = vadd.f32 %v8003_v11, %v2230_v36  ;;  %3241 = vmatmul.msk.bf16.vlgmr.msra.gmra.mxu3 %vm1364_vm10, %v8004_v15  ;;  %v2312_v16 = vadd.f32 %v8008_v24, %v2230_v36  ;;  %3097 = vmatmul.bf16.vlgmr.msra.gmra.mxu0 %v7131_v17  ;;  %v8013_v17 = vld [vmem:[#allocation42_spill] sm:$0xff] }
 0x9ff   :  { %v2268_v38 = vadd.f32 %v8005_v2, %v2254_v6  ;;  %v2296_v30 = vadd.f32 %v8006_v50, %v2282_v52  ;;  %v2324_v20 = vadd.f32 %v8007_v60, %v2310_v10  ;;  %v2352_v9 = vadd.f32 %v8009_v54, %v2338_v51  ;;  %3242 = vmatmul.msk.bf16.vlgmr.msrb.gmra.mxu2 %vm1364_vm10, %v8004_v15 }
 0xa00   :  { %v2340_v46 = vadd.f32 %v8010_v45, %v2230_v36  ;;  %v2270_v57 = vadd.f32 %v8011_v63, %v2256_v14  ;;  %v2298_v29 = vadd.f32 %v8012_v47, %v2284_v33  ;;  %v2326_v26 = vadd.f32 %v8013_v17, %v2312_v16 }
 0xa01   :  { %3204 = vst [vmem:[%s7434_s4 + $0x40] sm:$0xff] %v2268_v38 }
 0xa02   :  { %3205 = vst [vmem:[%s7434_s4 + $0x48] sm:$0xff] %v2296_v30  ;;  %v2354_v58 = vadd.f32 %v8014_v31, %v2340_v46 }
 0xa03   :  { %3206 = vst [vmem:[%s7434_s4 + $0x50] sm:$0xff] %v2324_v20 }
 0xa04   :  { %3207 = vst [vmem:[%s7434_s4 + $0x58] sm:$0xff] %v2352_v9  ;;  %v728_v62 = vpop.permute.xlu1 %727  ;;  %v2991_v0 = vpop.permute.xlu0 %2990 }
 0xa05   :  { %3208 = vst [vmem:[%s7434_s4 + $0x60] sm:$0xff] %v2270_v57  ;;  %v765_v23 = vadd.f32 %v8015_v21, %v728_v62  ;;  %v779_v28 = vadd.f32 %v8016_v44, %v728_v62  ;;  %v793_v37 = vadd.f32 %v8017_v56, %v728_v62  ;;  %v807_v18 = vadd.f32 %v8018_v61, %v728_v62 }
 0xa06   :  { %3209 = vst [vmem:[%s7434_s4 + $0x68] sm:$0xff] %v2298_v29 }
 0xa07   :  { %3210 = vst [vmem:[%s7434_s4 + $0x70] sm:$0xff] %v2326_v26 }
 0xa08   :  { %3211 = vst [vmem:[%s7434_s4 + $0x78] sm:$0xff] %v2354_v58 }
 0xa09   :  { %811 = vst [vmem:[%s7434_s4] sm:$0xff] %v765_v23 }
 0xa0a   :  { %812 = vst [vmem:[%s7434_s4 + $0x8] sm:$0xff] %v779_v28 }
 0xa0b   :  { %813 = vst [vmem:[%s7434_s4 + $0x10] sm:$0xff] %v793_v37 }
 0xa0c   :  { %814 = vst [vmem:[%s7434_s4 + $0x18] sm:$0xff] %v807_v18 }
 0xa33   :  { %v3056_v53 = vpop.f32.mrf.mxu0 }
 0xa34   :  { %v3028_v3 = vpop.f32.mrf.mxu1 }
 0xa3b   :  { %v3058_v25 = vpop.f32.mrf.mxu0 }
 0xa3c   :  { %v3030_v13 = vpop.f32.mrf.mxu1 }
 0xa44   :  { %v3042_v27 = vpop.f32.mrf.mxu2 }
 0xa45   :  { %v3043_v49 = vadd.f32 %v3042_v27, %v7284_v55 }
 0xa47   :  { %v3057_v39 = vadd.f32 %v3056_v53, %v3043_v49 }
 0xa49   :  { %3244 = vst [vmem:[%s7434_s4 + $0x88] sm:$0xff] %v3057_v39 }
 0xa4c   :  { %v3044_v59 = vpop.f32.mrf.mxu2 }
 0xa4d   :  { %v3045_v35 = vadd.f32 %v3044_v59, %v2991_v0 }
 0xa4f   :  { %v3059_v41 = vadd.f32 %v3058_v25, %v3045_v35 }
 0xa51   :  { %3248 = vst [vmem:[%s7434_s4 + $0xa8] sm:$0xff] %v3059_v41 }
 0xa6c   :  { %v3014_v22 = vpop.f32.mrf.mxu3 }
 0xa6d   :  { %v3015_v4 = vadd.f32 %v3014_v22, %v7284_v55 }
 0xa6f   :  { %v3029_v12 = vadd.f32 %v3028_v3, %v3015_v4 }
 0xa71   :  { %3243 = vst [vmem:[%s7434_s4 + $0x80] sm:$0xff] %v3029_v12 }
 0xa74   :  { %v3016_v40 = vpop.f32.mrf.mxu3 }
 0xa75   :  { %v3017_v32 = vadd.f32 %v3016_v40, %v2991_v0 }
 0xa77   :  { %v3031_v7 = vadd.f32 %v3030_v13, %v3017_v32 }
 0xa79   :  { %3247 = vst [vmem:[%s7434_s4 + $0xa0] sm:$0xff] %v3031_v7 }
 0xa7a   :  { %v3070_v1 = vpop.f32.mrf.mxu1 }
 0xa7b   :  { %v3098_v8 = vpop.f32.mrf.mxu0  ;;  %v3071_v34 = vadd.f32 %v3070_v1, %v7284_v55 }
 0xa7c   :  { %v3099_v48 = vadd.f32 %v3098_v8, %v7284_v55 }
 0xa81   :  { %v3084_v36 = vpop.f32.mrf.mxu3 }
 0xa82   :  { %v3085_v6 = vadd.f32 %v3084_v36, %v3071_v34  ;;  %v3112_v43 = vpop.f32.mrf.mxu2  ;;  %v3072_v5 = vpop.f32.mrf.mxu1 }
 0xa83   :  { %v3113_v52 = vadd.f32 %v3112_v43, %v3099_v48  ;;  %v3100_v10 = vpop.f32.mrf.mxu0  ;;  %v3073_v19 = vadd.f32 %v3072_v5, %v2991_v0 }
 0xa84   :  { %3245 = vst [vmem:[%s7434_s4 + $0x90] sm:$0xff] %v3085_v6  ;;  %v3101_v42 = vadd.f32 %v3100_v10, %v2991_v0 }
 0xa85   :  { %3246 = vst [vmem:[%s7434_s4 + $0x98] sm:$0xff] %v3113_v52 }
 0xa89   :  { %v3086_v51 = vpop.f32.mrf.mxu3 }
 0xa8a   :  { %v3087_v14 = vadd.f32 %v3086_v51, %v3073_v19  ;;  %v3114_v11 = vpop.f32.mrf.mxu2 }
 0xa8b   :  { %v3115_v55 = vadd.f32 %v3114_v11, %v3101_v42 }
 0xa8c   :  { %3249 = vst [vmem:[%s7434_s4 + $0xb0] sm:$0xff] %v3087_v14 }
 0xa8d   :  { %3250 = vst [vmem:[%s7434_s4 + $0xb8] sm:$0xff] %v3115_v55 }

</bundles_post_ra>
